<compile_context>
chip_gen: v6e
topology: v6e:2x2x1
jax: 0.10.0
libtpu: 0.0.40
codegen_flags: <defaults>
</compile_context>

<pallas_src>
import functools

import jax
import jax.numpy as jnp
from jax.experimental import pallas as pl
from jax.experimental.pallas import tpu as pltpu

# ----------------------------- config ---------------------------------------
PATCH = 14
CHANNELS = 3
IMG = 28                                 # -> (IMG//PATCH)**2 = 4 patches/image
PATCH_DIM = CHANNELS * PATCH * PATCH     # 588, as in the module
EMBED_DIM = 128
NUM_HEADS = 16                           # matches module; head_dim = 8
HEAD_DIM = EMBED_DIM // NUM_HEADS
MLP_HIDDEN = 256
NUM_BLOCKS = 2
MODEL_DIM = 64
MODEL_DIM_PAD = 128                      # lane-dense head output, sliced back
PROJ_HIDDEN = MODEL_DIM * 4              # VisionProjection: hidden = model_dim*4
VOCAB = 32
IMAGE_TOKEN_ID = 1
LN_EPS = 1e-5

VMEM_SPEC = pl.BlockSpec(memory_space=pltpu.MemorySpace.VMEM)


# ----------------------------- in-kernel math --------------------------------
def _layernorm(x, g, b, eps):
    # f32 statistics (biased variance), matching nn.LayerNorm.
    mu = jnp.mean(x, axis=-1, keepdims=True)
    xc = x - mu
    var = jnp.mean(xc * xc, axis=-1, keepdims=True)
    return xc * jax.lax.rsqrt(var + eps) * g + b


def _gelu_tanh(x):
    # nn.GELU(approximate='tanh'), in f32.
    c = 0.7978845608028654  # sqrt(2/pi)
    return 0.5 * x * (1.0 + jnp.tanh(c * (x + 0.044715 * x * x * x)))


# ----------------------------- Pallas kernels --------------------------------
def _patch_embed_kernel(p_ref, w_ref, b_ref, pos_ref, o_ref):
    """LinearPatchEmbedding (588 -> D) + positional embedding add (bf16 MXU)."""
    y = jnp.dot(p_ref[...], w_ref[...], preferred_element_type=jnp.float32)
    o_ref[...] = y + b_ref[...] + pos_ref[...]


def _vit_blocks_kernel(x_ref, ln1g_ref, ln1b_ref,
                       wq_ref, wk_ref, wv_ref, bq_ref, bk_ref, bv_ref,
                       projw_ref, projb_ref, ln2g_ref, ln2b_ref,
                       fc1w_ref, fc1b_ref, fc2w_ref, fc2b_ref,
                       o_ref, *, num_heads, head_dim, eps):
    """One VitBlock per inner grid step for one image (outer grid step).

    The activation is carried in o_ref itself (its out-spec block index is
    constant across the block axis, so it stays VMEM-resident); per-block bf16
    weights stream in via the auto-pipelined BlockSpecs.
    """
    @pl.when(pl.program_id(1) == 0)
    def _():
        o_ref[...] = x_ref[...]                  # init carried activation (f32)

    x = o_ref[0]                                 # (n_tok, D), f32
    n_tok, D = x.shape
    H, dh = num_heads, head_dim

    # -------- attention branch:  x + proj(MHSA(ln1(x))) ----------------------
    y = _layernorm(x, ln1g_ref[0], ln1b_ref[0], eps)            # f32
    y3 = jnp.broadcast_to(y.astype(jnp.bfloat16)[None], (H, n_tok, D))

    # Head-batched q/k/v projections: K = D (full-width MXU contraction),
    # weights pre-arranged as (H, dh, D) slabs so no in-kernel head slicing.
    q = jnp.einsum('hnd,hkd->hnk', y3, wq_ref[0],
                   preferred_element_type=jnp.float32) + bq_ref[0]
    k = jnp.einsum('hnd,hkd->hnk', y3, wk_ref[0],
                   preferred_element_type=jnp.float32) + bk_ref[0]
    v = jnp.einsum('hnd,hkd->hnk', y3, wv_ref[0],
                   preferred_element_type=jnp.float32) + bv_ref[0]

    scale = 1.0 / (dh ** 0.5)                    # SDPA default scaling
    s = jnp.einsum('hqd,hkd->hqk', q.astype(jnp.bfloat16),
                   k.astype(jnp.bfloat16),
                   preferred_element_type=jnp.float32) * scale
    # f32 softmax (max-subtraction + exp + exact reciprocal).
    m = jnp.max(s, axis=-1, keepdims=True)
    p = jnp.exp(s - m)
    p = p * pl.reciprocal(jnp.sum(p, axis=-1, keepdims=True), approx=False)

    o3 = jnp.einsum('hqk,hkd->hqd', p.astype(jnp.bfloat16),
                    v.astype(jnp.bfloat16),
                    preferred_element_type=jnp.float32)          # (H, n, dh)

    # Output projection folded per head (batched, leading-batch form) and
    # reduced over heads with a cheap VPU sum — no head re-concat / relayout.
    head_proj = jnp.einsum('hqd,hdn->hqn', o3.astype(jnp.bfloat16),
                           projw_ref[0],
                           preferred_element_type=jnp.float32)   # (H, n, D)
    x = x + jnp.sum(head_proj, axis=0) + projb_ref[0]

    # -------- MLP branch:  x + fc2(gelu(fc1(ln2(x)))) -------------------------
    y2 = _layernorm(x, ln2g_ref[0], ln2b_ref[0], eps)
    hid = _gelu_tanh(jnp.dot(y2.astype(jnp.bfloat16), fc1w_ref[0],
                             preferred_element_type=jnp.float32) + fc1b_ref[0])
    x = x + jnp.dot(hid.astype(jnp.bfloat16), fc2w_ref[0],
                    preferred_element_type=jnp.float32) + fc2b_ref[0]

    o_ref[0] = x                                 # carry (and final writeback)


def _vision_head_kernel(x_ref, g_ref, b_ref, w1_ref, b1_ref, w2_ref, b2_ref,
                        o_ref, *, eps):
    """Final LayerNorm + VisionProjection MLP; lane-dense padded output."""
    y = _layernorm(x_ref[...], g_ref[...], b_ref[...], eps)
    h = _gelu_tanh(jnp.dot(y.astype(jnp.bfloat16), w1_ref[...],
                           preferred_element_type=jnp.float32) + b1_ref[...])
    o_ref[...] = jnp.dot(h.astype(jnp.bfloat16), w2_ref[...],
                         preferred_element_type=jnp.float32) + b2_ref[...]


# ----------------------------- model forward ---------------------------------
def vision_encoder_forward(pixels, p):
    """VisionEncoder: EncoderWrapper(VisionTransformer) + VisionProjection."""
    B, C, H_img, W_img = pixels.shape
    h, w = H_img // PATCH, W_img // PATCH
    n = h * w
    M = B * n
    D = EMBED_DIM
    H_, dh = NUM_HEADS, HEAD_DIM

    # LinearPatchEmbedding unfold — tiny one-shot relayout of the raw pixels,
    # kept in XLA; matmul inputs are cast to bf16.
    patches = pixels.reshape(B, C, h, PATCH, w, PATCH)
    patches = patches.transpose(0, 2, 4, 1, 3, 5).reshape(M, PATCH_DIM)
    patches = patches.astype(jnp.bfloat16)
    pos = jnp.broadcast_to(p["pos_embed"], (B, n, D)).reshape(M, D)

    # ---- 1) patch embedding + pos embed ----
    x = pl.pallas_call(
        _patch_embed_kernel,
        out_shape=jax.ShapeDtypeStruct((M, D), jnp.float32),
        in_specs=[VMEM_SPEC] * 4,
        out_specs=VMEM_SPEC,
    )(patches, p["patch_w"], p["patch_b"], pos)
    x = x.reshape(B, n, D)

    # ---- 2) all ViT blocks, grid = (images, blocks) ----
    blk = p["blocks"]

    def _wspec(shape):
        zeros = (0,) * len(shape)
        return pl.BlockSpec((1,) + tuple(shape), lambda b, i, z=zeros: (i,) + z)

    grid_spec = pltpu.PrefetchScalarGridSpec(
        num_scalar_prefetch=0,
        grid=(B, NUM_BLOCKS),
        in_specs=[
            pl.BlockSpec((1, n, D), lambda b, i: (b, 0, 0)),     # x (init only)
            _wspec((1, D)), _wspec((1, D)),                      # ln1 g, b
            _wspec((H_, dh, D)), _wspec((H_, dh, D)), _wspec((H_, dh, D)),  # wq/wk/wv
            _wspec((H_, 1, dh)), _wspec((H_, 1, dh)), _wspec((H_, 1, dh)),  # bq/bk/bv
            _wspec((H_, dh, D)), _wspec((1, D)),                 # proj w, b
            _wspec((1, D)), _wspec((1, D)),                      # ln2 g, b
            _wspec((D, MLP_HIDDEN)), _wspec((1, MLP_HIDDEN)),    # fc1 w, b
            _wspec((MLP_HIDDEN, D)), _wspec((1, D)),             # fc2 w, b
        ],
        out_specs=pl.BlockSpec((1, n, D), lambda b, i: (b, 0, 0)),
    )
    x = pl.pallas_call(
        functools.partial(_vit_blocks_kernel, num_heads=H_, head_dim=dh,
                          eps=LN_EPS),
        out_shape=jax.ShapeDtypeStruct((B, n, D), jnp.float32),
        grid_spec=grid_spec,
        compiler_params=pltpu.CompilerParams(
            dimension_semantics=("parallel", "arbitrary"),
            # NOTE(scale-up): at real dims raise this, tile MLP_HIDDEN, and use
            # flash-style key tiling; on v7x keep per-core residency < 64 MiB.
            vmem_limit_bytes=32 * 1024 * 1024),
    )(x, blk["ln1_g"], blk["ln1_b"],
      blk["wq"], blk["wk"], blk["wv"], blk["bq"], blk["bk"], blk["bv"],
      blk["proj_w"], blk["proj_b"], blk["ln2_g"], blk["ln2_b"],
      blk["fc1_w"], blk["fc1_b"], blk["fc2_w"], blk["fc2_b"])

    # ---- 3) final LayerNorm + VisionProjection (lane-dense padded out) ----
    out_pad = pl.pallas_call(
        functools.partial(_vision_head_kernel, eps=LN_EPS),
        out_shape=jax.ShapeDtypeStruct((M, MODEL_DIM_PAD), jnp.float32),
        in_specs=[VMEM_SPEC] * 7,
        out_specs=VMEM_SPEC,
    )(x.reshape(M, D), p["ln_f_g"], p["ln_f_b"],
      p["pfc1_w"], p["pfc1_b"], p["pfc2_w"], p["pfc2_b"])

    return out_pad[:, :MODEL_DIM].reshape(B, n, MODEL_DIM)


def moondream_forward(input_ids, image_input, params):
    """Moondream.forward: vision encode + splice image features into embeds."""
    image_features = vision_encoder_forward(image_input, params["vision"])

    embeds = params["embed_tokens"][input_ids]                    # (S, MODEL_DIM)
    mask = input_ids == IMAGE_TOKEN_ID
    flat = image_features.reshape(-1, MODEL_DIM)
    order = jnp.clip(jnp.cumsum(mask.astype(jnp.int32)) - 1, 0, flat.shape[0] - 1)
    inputs_embeds = jnp.where(mask[:, None], flat[order], embeds)

    # TODO(synk): PhiForCausalLM decoder, kv_caches/attn_metadata, logits and
    # sampler are external to this module; the merged input embeddings (the
    # part computed by Moondream itself) are returned.
    return inputs_embeds


# ----------------------------- parameters ------------------------------------
def init_params(key):
    """Synthetic weights in the module's natural (x @ W) layout."""
    keys = iter(jax.random.split(key, 32))

    def w(shape, scale=0.02):
        return (scale * jax.random.normal(next(keys), shape)).astype(jnp.float32)

    n_patches = (IMG // PATCH) ** 2
    NB, D, HM = NUM_BLOCKS, EMBED_DIM, MLP_HIDDEN
    blocks = dict(
        ln1_g=jnp.ones((NB, D), jnp.float32), ln1_b=jnp.zeros((NB, D), jnp.float32),
        qkv_w=w((NB, D, 3 * D)), qkv_b=w((NB, 3 * D)),
        proj_w=w((NB, D, D)), proj_b=w((NB, D)),
        ln2_g=jnp.ones((NB, D), jnp.float32), ln2_b=jnp.zeros((NB, D), jnp.float32),
        fc1_w=w((NB, D, HM)), fc1_b=w((NB, HM)),
        fc2_w=w((NB, HM, D)), fc2_b=w((NB, D)),
    )
    vision = dict(
        patch_w=w((PATCH_DIM, D)), patch_b=w((D,)),
        pos_embed=w((1, n_patches, D)),
        blocks=blocks,
        ln_f_g=jnp.ones((D,), jnp.float32), ln_f_b=jnp.zeros((D,), jnp.float32),
        pfc1_w=w((D, PROJ_HIDDEN)), pfc1_b=w((PROJ_HIDDEN,)),
        pfc2_w=w((PROJ_HIDDEN, MODEL_DIM)), pfc2_b=w((MODEL_DIM,)),
    )
    return dict(vision=vision, embed_tokens=w((VOCAB, MODEL_DIM)))


def prepare_vision_params(v):
    """One-time (outside jit) conversion to the kernel layout:
    bf16 MXU weights, head-major (H, dh, D) attention slabs stacked along the
    block axis, 2-D biases / LN params, lane-padded projection head."""
    NB, D, H, dh, HM = NUM_BLOCKS, EMBED_DIM, NUM_HEADS, HEAD_DIM, MLP_HIDDEN
    b = v["blocks"]
    qkv_w, qkv_b = b["qkv_w"], b["qkv_b"]          # (NB, D, 3D), (NB, 3D)

    def head_w(w2d):   # (NB, D_in, H*dh) -> (NB, H, dh, D_in), bf16
        return jnp.transpose(w2d.reshape(NB, D, H, dh), (0, 2, 3, 1)).astype(jnp.bfloat16)

    def head_b(b1d):   # (NB, H*dh) -> (NB, H, 1, dh), f32
        return b1d.reshape(NB, H, 1, dh)

    blocks = dict(
        ln1_g=b["ln1_g"].reshape(NB, 1, D), ln1_b=b["ln1_b"].reshape(NB, 1, D),
        wq=head_w(qkv_w[:, :, 0 * D:1 * D]),
        wk=head_w(qkv_w[:, :, 1 * D:2 * D]),
        wv=head_w(qkv_w[:, :, 2 * D:3 * D]),
        bq=head_b(qkv_b[:, 0 * D:1 * D]),
        bk=head_b(qkv_b[:, 1 * D:2 * D]),
        bv=head_b(qkv_b[:, 2 * D:3 * D]),
        proj_w=b["proj_w"].reshape(NB, H, dh, D).astype(jnp.bfloat16),
        proj_b=b["proj_b"].reshape(NB, 1, D),
        ln2_g=b["ln2_g"].reshape(NB, 1, D), ln2_b=b["ln2_b"].reshape(NB, 1, D),
        fc1_w=b["fc1_w"].astype(jnp.bfloat16), fc1_b=b["fc1_b"].reshape(NB, 1, HM),
        fc2_w=b["fc2_w"].astype(jnp.bfloat16), fc2_b=b["fc2_b"].reshape(NB, 1, D),
    )
    pfc2_w = jnp.zeros((PROJ_HIDDEN, MODEL_DIM_PAD), jnp.float32)
    pfc2_w = pfc2_w.at[:, :MODEL_DIM].set(v["pfc2_w"])
    pfc2_b = jnp.zeros((MODEL_DIM_PAD,), jnp.float32).at[:MODEL_DIM].set(v["pfc2_b"])
    return dict(
        patch_w=v["patch_w"].astype(jnp.bfloat16),
        patch_b=v["patch_b"].reshape(1, EMBED_DIM),
        pos_embed=v["pos_embed"],
        blocks=blocks,
        ln_f_g=v["ln_f_g"].reshape(1, EMBED_DIM),
        ln_f_b=v["ln_f_b"].reshape(1, EMBED_DIM),
        pfc1_w=v["pfc1_w"].astype(jnp.bfloat16),
        pfc1_b=v["pfc1_b"].reshape(1, PROJ_HIDDEN),
        pfc2_w=pfc2_w.astype(jnp.bfloat16),
        pfc2_b=pfc2_b.reshape(1, MODEL_DIM_PAD),
    )


# ----------------------------- main ------------------------------------------
if __name__ == "__main__":
    root = jax.random.PRNGKey(0)
    k_params, k_img, k_ids = jax.random.split(root, 3)

    raw = init_params(k_params)
    params = dict(vision=prepare_vision_params(raw["vision"]),
                  embed_tokens=raw["embed_tokens"])

    B = 2
    n_patches = (IMG // PATCH) ** 2                # 4
    n_image_tokens = B * n_patches                 # 8
    seq_len = n_image_tokens + 4                   # 12

    image_input = jax.random.normal(
        k_img, (B, CHANNELS, IMG, IMG), dtype=jnp.float32)
    text_ids = jax.random.randint(k_ids, (seq_len - n_image_tokens,), 2, VOCAB)
    input_ids = jnp.concatenate(
        [jnp.full((n_image_tokens,), IMAGE_TOKEN_ID, dtype=jnp.int32),
         text_ids.astype(jnp.int32)])

    fwd = jax.jit(moondream_forward)
    out = fwd(input_ids, image_input, params)
    jax.block_until_ready(out)
    assert out.shape == (seq_len, MODEL_DIM)
    print("KERNEL_OK")
</pallas_src>

<mosaic_0001>
module attributes {stable_mosaic.version = 11 : i64} {
  func.func @_vision_head_kernel(%arg0: memref<8x128xf32, #tpu.memory_space<vmem>>, %arg1: memref<1x128xf32, #tpu.memory_space<vmem>>, %arg2: memref<1x128xf32, #tpu.memory_space<vmem>>, %arg3: memref<128x256xbf16, #tpu.memory_space<vmem>>, %arg4: memref<1x256xf32, #tpu.memory_space<vmem>>, %arg5: memref<256x128xbf16, #tpu.memory_space<vmem>>, %arg6: memref<1x128xf32, #tpu.memory_space<vmem>>, %arg7: memref<8x128xf32, #tpu.memory_space<vmem>>) attributes {dimension_semantics = [], scalar_prefetch = 0 : i64, scratch_operands = 0 : i64, tpu.core_type = #tpu.core_type<tc>} {
    %c0 = arith.constant 0 : index
    %c0_0 = arith.constant 0 : index
    %0 = vector.load %arg0[%c0, %c0_0] : memref<8x128xf32, #tpu.memory_space<vmem>>, vector<8x128xf32>
    %c0_1 = arith.constant 0 : index
    %c0_2 = arith.constant 0 : index
    %1 = vector.load %arg1[%c0_1, %c0_2] : memref<1x128xf32, #tpu.memory_space<vmem>>, vector<1x128xf32>
    %c0_3 = arith.constant 0 : index
    %c0_4 = arith.constant 0 : index
    %2 = vector.load %arg2[%c0_3, %c0_4] : memref<1x128xf32, #tpu.memory_space<vmem>>, vector<1x128xf32>
    %cst = arith.constant dense<0.000000e+00> : vector<8xf32>
    %3 = vector.multi_reduction <add>, %0, %cst [1] : vector<8x128xf32> to vector<8xf32>
    %4 = vector.shape_cast %3 : vector<8xf32> to vector<8x1xf32>
    %cst_5 = arith.constant 1.280000e+02 : f32
    %5 = vector.broadcast %cst_5 : f32 to vector<8x1xf32>
    %6 = arith.divf %4, %5 : vector<8x1xf32>
    %7 = vector.broadcast %6 : vector<8x1xf32> to vector<8x128xf32>
    %8 = arith.subf %0, %7 : vector<8x128xf32>
    %9 = arith.mulf %8, %8 : vector<8x128xf32>
    %cst_6 = arith.constant dense<0.000000e+00> : vector<8xf32>
    %10 = vector.multi_reduction <add>, %9, %cst_6 [1] : vector<8x128xf32> to vector<8xf32>
    %11 = vector.shape_cast %10 : vector<8xf32> to vector<8x1xf32>
    %cst_7 = arith.constant 1.280000e+02 : f32
    %12 = vector.broadcast %cst_7 : f32 to vector<8x1xf32>
    %13 = arith.divf %11, %12 : vector<8x1xf32>
    %cst_8 = arith.constant 9.99999974E-6 : f32
    %14 = vector.broadcast %cst_8 : f32 to vector<8x1xf32>
    %15 = arith.addf %13, %14 : vector<8x1xf32>
    %16 = math.rsqrt %15 : vector<8x1xf32>
    %17 = vector.broadcast %16 : vector<8x1xf32> to vector<8x128xf32>
    %18 = arith.mulf %8, %17 : vector<8x128xf32>
    %19 = vector.broadcast %1 : vector<1x128xf32> to vector<8x128xf32>
    %20 = arith.mulf %18, %19 : vector<8x128xf32>
    %21 = vector.broadcast %2 : vector<1x128xf32> to vector<8x128xf32>
    %22 = arith.addf %20, %21 : vector<8x128xf32>
    %23 = arith.truncf %22 : vector<8x128xf32> to vector<8x128xbf16>
    %c0_9 = arith.constant 0 : index
    %c0_10 = arith.constant 0 : index
    %24 = vector.load %arg3[%c0_9, %c0_10] : memref<128x256xbf16, #tpu.memory_space<vmem>>, vector<128x256xbf16>
    %cst_11 = arith.constant dense<0.000000e+00> : vector<8x256xf32>
    %25 = tpu.matmul %23, %24, %cst_11 {dimension_numbers = #tpu.dot_dimension_numbers<[1], [0], [0], [1], [0, 0, 1, 1], [], []>} : vector<8x128xbf16>, vector<128x256xbf16>, vector<8x256xf32> -> vector<8x256xf32>
    %c0_12 = arith.constant 0 : index
    %c0_13 = arith.constant 0 : index
    %26 = vector.load %arg4[%c0_12, %c0_13] : memref<1x256xf32, #tpu.memory_space<vmem>>, vector<1x256xf32>
    %27 = vector.broadcast %26 : vector<1x256xf32> to vector<8x256xf32>
    %28 = arith.addf %25, %27 : vector<8x256xf32>
    %cst_14 = arith.constant 5.000000e-01 : f32
    %29 = vector.broadcast %cst_14 : f32 to vector<8x256xf32>
    %30 = arith.mulf %29, %28 : vector<8x256xf32>
    %cst_15 = arith.constant 4.471500e-02 : f32
    %31 = vector.broadcast %cst_15 : f32 to vector<8x256xf32>
    %32 = arith.mulf %31, %28 : vector<8x256xf32>
    %33 = arith.mulf %32, %28 : vector<8x256xf32>
    %34 = arith.mulf %33, %28 : vector<8x256xf32>
    %35 = arith.addf %28, %34 : vector<8x256xf32>
    %cst_16 = arith.constant 0.797884583 : f32
    %36 = vector.broadcast %cst_16 : f32 to vector<8x256xf32>
    %37 = arith.mulf %36, %35 : vector<8x256xf32>
    %38 = math.tanh %37 : vector<8x256xf32>
    %cst_17 = arith.constant 1.000000e+00 : f32
    %39 = vector.broadcast %cst_17 : f32 to vector<8x256xf32>
    %40 = arith.addf %39, %38 : vector<8x256xf32>
    %41 = arith.mulf %30, %40 : vector<8x256xf32>
    %42 = arith.truncf %41 : vector<8x256xf32> to vector<8x256xbf16>
    %c0_18 = arith.constant 0 : index
    %c0_19 = arith.constant 0 : index
    %43 = vector.load %arg5[%c0_18, %c0_19] : memref<256x128xbf16, #tpu.memory_space<vmem>>, vector<256x128xbf16>
    %cst_20 = arith.constant dense<0.000000e+00> : vector<8x128xf32>
    %44 = tpu.matmul %42, %43, %cst_20 {dimension_numbers = #tpu.dot_dimension_numbers<[1], [0], [0], [1], [0, 0, 1, 1], [], []>} : vector<8x256xbf16>, vector<256x128xbf16>, vector<8x128xf32> -> vector<8x128xf32>
    %c0_21 = arith.constant 0 : index
    %c0_22 = arith.constant 0 : index
    %45 = vector.load %arg6[%c0_21, %c0_22] : memref<1x128xf32, #tpu.memory_space<vmem>>, vector<1x128xf32>
    %46 = vector.broadcast %45 : vector<1x128xf32> to vector<8x128xf32>
    %47 = arith.addf %44, %46 : vector<8x128xf32>
    %c0_23 = arith.constant 0 : index
    %c0_24 = arith.constant 0 : index
    %48 = vector.load %arg7[%c0_23, %c0_24] : memref<8x128xf32, #tpu.memory_space<vmem>>, vector<8x128xf32>
    tpu.vector_store %arg7[%c0_23, %c0_24], %47 {strides = array<i32>} : memref<8x128xf32, #tpu.memory_space<vmem>>, vector<8x128xf32>,
    return
  }
}

module attributes {stable_mosaic.version = 11 : i64} {
  func.func @_patch_embed_kernel(%arg0: memref<8x588xbf16, #tpu.memory_space<vmem>>, %arg1: memref<588x128xbf16, #tpu.memory_space<vmem>>, %arg2: memref<1x128xf32, #tpu.memory_space<vmem>>, %arg3: memref<8x128xf32, #tpu.memory_space<vmem>>, %arg4: memref<8x128xf32, #tpu.memory_space<vmem>>) attributes {dimension_semantics = [], scalar_prefetch = 0 : i64, scratch_operands = 0 : i64, tpu.core_type = #tpu.core_type<tc>} {
    %c0 = arith.constant 0 : index
    %c0_0 = arith.constant 0 : index
    %0 = vector.load %arg0[%c0, %c0_0] : memref<8x588xbf16, #tpu.memory_space<vmem>>, vector<8x588xbf16>
    %c0_1 = arith.constant 0 : index
    %c0_2 = arith.constant 0 : index
    %1 = vector.load %arg1[%c0_1, %c0_2] : memref<588x128xbf16, #tpu.memory_space<vmem>>, vector<588x128xbf16>
    %cst = arith.constant dense<0.000000e+00> : vector<8x128xf32>
    %2 = tpu.matmul %0, %1, %cst {dimension_numbers = #tpu.dot_dimension_numbers<[1], [0], [0], [1], [0, 0, 1, 1], [], []>} : vector<8x588xbf16>, vector<588x128xbf16>, vector<8x128xf32> -> vector<8x128xf32>
    %c0_3 = arith.constant 0 : index
    %c0_4 = arith.constant 0 : index
    %3 = vector.load %arg2[%c0_3, %c0_4] : memref<1x128xf32, #tpu.memory_space<vmem>>, vector<1x128xf32>
    %4 = vector.broadcast %3 : vector<1x128xf32> to vector<8x128xf32>
    %5 = arith.addf %2, %4 : vector<8x128xf32>
    %c0_5 = arith.constant 0 : index
    %c0_6 = arith.constant 0 : index
    %6 = vector.load %arg3[%c0_5, %c0_6] : memref<8x128xf32, #tpu.memory_space<vmem>>, vector<8x128xf32>
    %7 = arith.addf %5, %6 : vector<8x128xf32>
    %c0_7 = arith.constant 0 : index
    %c0_8 = arith.constant 0 : index
    %8 = vector.load %arg4[%c0_7, %c0_8] : memref<8x128xf32, #tpu.memory_space<vmem>>, vector<8x128xf32>
    tpu.vector_store %arg4[%c0_7, %c0_8], %7 {strides = array<i32>} : memref<8x128xf32, #tpu.memory_space<vmem>>, vector<8x128xf32>,
    return
  }
}

module attributes {stable_mosaic.version = 11 : i64} {
  func.func @_vit_blocks_kernel(%arg0: i32, %arg1: i32, %arg2: memref<1x4x128xf32, #tpu.memory_space<vmem>>, %arg3: memref<1x1x128xf32, #tpu.memory_space<vmem>>, %arg4: memref<1x1x128xf32, #tpu.memory_space<vmem>>, %arg5: memref<1x16x8x128xbf16, #tpu.memory_space<vmem>>, %arg6: memref<1x16x8x128xbf16, #tpu.memory_space<vmem>>, %arg7: memref<1x16x8x128xbf16, #tpu.memory_space<vmem>>, %arg8: memref<1x16x1x8xf32, #tpu.memory_space<vmem>>, %arg9: memref<1x16x1x8xf32, #tpu.memory_space<vmem>>, %arg10: memref<1x16x1x8xf32, #tpu.memory_space<vmem>>, %arg11: memref<1x16x8x128xbf16, #tpu.memory_space<vmem>>, %arg12: memref<1x1x128xf32, #tpu.memory_space<vmem>>, %arg13: memref<1x1x128xf32, #tpu.memory_space<vmem>>, %arg14: memref<1x1x128xf32, #tpu.memory_space<vmem>>, %arg15: memref<1x128x256xbf16, #tpu.memory_space<vmem>>, %arg16: memref<1x1x256xf32, #tpu.memory_space<vmem>>, %arg17: memref<1x256x128xbf16, #tpu.memory_space<vmem>>, %arg18: memref<1x1x128xf32, #tpu.memory_space<vmem>>, %arg19: memref<1x4x128xf32, #tpu.memory_space<vmem>>) attributes {dimension_semantics = [#tpu.dimension_semantics<parallel>, #tpu.dimension_semantics<arbitrary>], iteration_bounds = array<i64: 2, 2>, scalar_prefetch = 0 : i64, scratch_operands = 0 : i64, tpu.core_type = #tpu.core_type<tc>, window_params = [{transform_indices = @transform_0, window_bounds = array<i64: 1, 4, 128>}, {transform_indices = @transform_1, window_bounds = array<i64: 1, 1, 128>}, {transform_indices = @transform_2, window_bounds = array<i64: 1, 1, 128>}, {transform_indices = @transform_3, window_bounds = array<i64: 1, 16, 8, 128>}, {transform_indices = @transform_4, window_bounds = array<i64: 1, 16, 8, 128>}, {transform_indices = @transform_5, window_bounds = array<i64: 1, 16, 8, 128>}, {transform_indices = @transform_6, window_bounds = array<i64: 1, 16, 1, 8>}, {transform_indices = @transform_7, window_bounds = array<i64: 1, 16, 1, 8>}, {transform_indices = @transform_8, window_bounds = array<i64: 1, 16, 1, 8>}, {transform_indices = @transform_9, window_bounds = array<i64: 1, 16, 8, 128>}, {transform_indices = @transform_10, window_bounds = array<i64: 1, 1, 128>}, {transform_indices = @transform_11, window_bounds = array<i64: 1, 1, 128>}, {transform_indices = @transform_12, window_bounds = array<i64: 1, 1, 128>}, {transform_indices = @transform_13, window_bounds = array<i64: 1, 128, 256>}, {transform_indices = @transform_14, window_bounds = array<i64: 1, 1, 256>}, {transform_indices = @transform_15, window_bounds = array<i64: 1, 256, 128>}, {transform_indices = @transform_16, window_bounds = array<i64: 1, 1, 128>}, {transform_indices = @transform_17, window_bounds = array<i64: 1, 4, 128>}]} {
    %c0_i32 = arith.constant 0 : i32
    %0 = arith.cmpi eq, %arg1, %c0_i32 : i32
    %1 = arith.extui %0 : i1 to i32
    %c0_i32_0 = arith.constant 0 : i32
    %2 = arith.cmpi ne, %1, %c0_i32_0 : i32
    scf.if %2 {
      %c0_86 = arith.constant 0 : index
      %c0_87 = arith.constant 0 : index
      %c0_88 = arith.constant 0 : index
      %139 = vector.load %arg2[%c0_86, %c0_87, %c0_88] : memref<1x4x128xf32, #tpu.memory_space<vmem>>, vector<1x4x128xf32>
      %c0_89 = arith.constant 0 : index
      %c0_90 = arith.constant 0 : index
      %c0_91 = arith.constant 0 : index
      %140 = vector.load %arg19[%c0_89, %c0_90, %c0_91] : memref<1x4x128xf32, #tpu.memory_space<vmem>>, vector<1x4x128xf32>
      tpu.vector_store %arg19[%c0_89, %c0_90, %c0_91], %139 {strides = array<i32>} : memref<1x4x128xf32, #tpu.memory_space<vmem>>, vector<1x4x128xf32>,
    } else {
    }
    %c0 = arith.constant 0 : index
    %c0_1 = arith.constant 0 : index
    %c0_2 = arith.constant 0 : index
    %3 = vector.load %arg19[%c0, %c0_1, %c0_2] : memref<1x4x128xf32, #tpu.memory_space<vmem>>, vector<1x4x128xf32>
    %4 = vector.shape_cast %3 : vector<1x4x128xf32> to vector<4x128xf32>
    %c0_3 = arith.constant 0 : index
    %c0_4 = arith.constant 0 : index
    %c0_5 = arith.constant 0 : index
    %5 = vector.load %arg3[%c0_3, %c0_4, %c0_5] : memref<1x1x128xf32, #tpu.memory_space<vmem>>, vector<1x1x128xf32>
    %6 = vector.shape_cast %5 : vector<1x1x128xf32> to vector<1x128xf32>
    %c0_6 = arith.constant 0 : index
    %c0_7 = arith.constant 0 : index
    %c0_8 = arith.constant 0 : index
    %7 = vector.load %arg4[%c0_6, %c0_7, %c0_8] : memref<1x1x128xf32, #tpu.memory_space<vmem>>, vector<1x1x128xf32>
    %8 = vector.shape_cast %7 : vector<1x1x128xf32> to vector<1x128xf32>
    %cst = arith.constant dense<0.000000e+00> : vector<4xf32>
    %9 = vector.multi_reduction <add>, %4, %cst [1] : vector<4x128xf32> to vector<4xf32>
    %10 = vector.shape_cast %9 : vector<4xf32> to vector<4x1xf32>
    %cst_9 = arith.constant 1.280000e+02 : f32
    %11 = vector.broadcast %cst_9 : f32 to vector<4x1xf32>
    %12 = arith.divf %10, %11 : vector<4x1xf32>
    %13 = vector.broadcast %12 : vector<4x1xf32> to vector<4x128xf32>
    %14 = arith.subf %4, %13 : vector<4x128xf32>
    %15 = arith.mulf %14, %14 : vector<4x128xf32>
    %cst_10 = arith.constant dense<0.000000e+00> : vector<4xf32>
    %16 = vector.multi_reduction <add>, %15, %cst_10 [1] : vector<4x128xf32> to vector<4xf32>
    %17 = vector.shape_cast %16 : vector<4xf32> to vector<4x1xf32>
    %cst_11 = arith.constant 1.280000e+02 : f32
    %18 = vector.broadcast %cst_11 : f32 to vector<4x1xf32>
    %19 = arith.divf %17, %18 : vector<4x1xf32>
    %cst_12 = arith.constant 9.99999974E-6 : f32
    %20 = vector.broadcast %cst_12 : f32 to vector<4x1xf32>
    %21 = arith.addf %19, %20 : vector<4x1xf32>
    %22 = math.rsqrt %21 : vector<4x1xf32>
    %23 = vector.broadcast %22 : vector<4x1xf32> to vector<4x128xf32>
    %24 = arith.mulf %14, %23 : vector<4x128xf32>
    %25 = vector.broadcast %6 : vector<1x128xf32> to vector<4x128xf32>
    %26 = arith.mulf %24, %25 : vector<4x128xf32>
    %27 = vector.broadcast %8 : vector<1x128xf32> to vector<4x128xf32>
    %28 = arith.addf %26, %27 : vector<4x128xf32>
    %29 = arith.truncf %28 : vector<4x128xf32> to vector<4x128xbf16>
    %30 = vector.shape_cast %29 : vector<4x128xbf16> to vector<1x4x128xbf16>
    %31 = vector.shape_cast %30 : vector<1x4x128xbf16> to vector<1x4x128xbf16>
    %32 = vector.broadcast %31 : vector<1x4x128xbf16> to vector<16x4x128xbf16>
    %c0_13 = arith.constant 0 : index
    %c0_14 = arith.constant 0 : index
    %c0_15 = arith.constant 0 : index
    %c0_16 = arith.constant 0 : index
    %33 = vector.load %arg5[%c0_13, %c0_14, %c0_15, %c0_16] : memref<1x16x8x128xbf16, #tpu.memory_space<vmem>>, vector<1x16x8x128xbf16>
    %34 = vector.shape_cast %33 : vector<1x16x8x128xbf16> to vector<16x8x128xbf16>
    "tpu.trace_start"() <{level = 10 : i32, message = "hnd,hkd->hnk"}> : () -> ()
    %cst_17 = arith.constant dense<0.000000e+00> : vector<16x4x8xf32>
    %35 = tpu.matmul %32, %34, %cst_17 {dimension_numbers = #tpu.dot_dimension_numbers<[2], [2], [1], [1], [0, 0, 0, 1, 1, 1], [0], [0]>} : vector<16x4x128xbf16>, vector<16x8x128xbf16>, vector<16x4x8xf32> -> vector<16x4x8xf32>
    "tpu.trace_stop"() : () -> ()
    %c0_18 = arith.constant 0 : index
    %c0_19 = arith.constant 0 : index
    %c0_20 = arith.constant 0 : index
    %c0_21 = arith.constant 0 : index
    %36 = vector.load %arg8[%c0_18, %c0_19, %c0_20, %c0_21] : memref<1x16x1x8xf32, #tpu.memory_space<vmem>>, vector<1x16x1x8xf32>
    %37 = vector.shape_cast %36 : vector<1x16x1x8xf32> to vector<16x1x8xf32>
    %38 = vector.broadcast %37 : vector<16x1x8xf32> to vector<16x4x8xf32>
    %39 = arith.addf %35, %38 : vector<16x4x8xf32>
    %c0_22 = arith.constant 0 : index
    %c0_23 = arith.constant 0 : index
    %c0_24 = arith.constant 0 : index
    %c0_25 = arith.constant 0 : index
    %40 = vector.load %arg6[%c0_22, %c0_23, %c0_24, %c0_25] : memref<1x16x8x128xbf16, #tpu.memory_space<vmem>>, vector<1x16x8x128xbf16>
    %41 = vector.shape_cast %40 : vector<1x16x8x128xbf16> to vector<16x8x128xbf16>
    "tpu.trace_start"() <{level = 10 : i32, message = "hnd,hkd->hnk"}> : () -> ()
    %cst_26 = arith.constant dense<0.000000e+00> : vector<16x4x8xf32>
    %42 = tpu.matmul %32, %41, %cst_26 {dimension_numbers = #tpu.dot_dimension_numbers<[2], [2], [1], [1], [0, 0, 0, 1, 1, 1], [0], [0]>} : vector<16x4x128xbf16>, vector<16x8x128xbf16>, vector<16x4x8xf32> -> vector<16x4x8xf32>
    "tpu.trace_stop"() : () -> ()
    %c0_27 = arith.constant 0 : index
    %c0_28 = arith.constant 0 : index
    %c0_29 = arith.constant 0 : index
    %c0_30 = arith.constant 0 : index
    %43 = vector.load %arg9[%c0_27, %c0_28, %c0_29, %c0_30] : memref<1x16x1x8xf32, #tpu.memory_space<vmem>>, vector<1x16x1x8xf32>
    %44 = vector.shape_cast %43 : vector<1x16x1x8xf32> to vector<16x1x8xf32>
    %45 = vector.broadcast %44 : vector<16x1x8xf32> to vector<16x4x8xf32>
    %46 = arith.addf %42, %45 : vector<16x4x8xf32>
    %c0_31 = arith.constant 0 : index
    %c0_32 = arith.constant 0 : index
    %c0_33 = arith.constant 0 : index
    %c0_34 = arith.constant 0 : index
    %47 = vector.load %arg7[%c0_31, %c0_32, %c0_33, %c0_34] : memref<1x16x8x128xbf16, #tpu.memory_space<vmem>>, vector<1x16x8x128xbf16>
    %48 = vector.shape_cast %47 : vector<1x16x8x128xbf16> to vector<16x8x128xbf16>
    "tpu.trace_start"() <{level = 10 : i32, message = "hnd,hkd->hnk"}> : () -> ()
    %cst_35 = arith.constant dense<0.000000e+00> : vector<16x4x8xf32>
    %49 = tpu.matmul %32, %48, %cst_35 {dimension_numbers = #tpu.dot_dimension_numbers<[2], [2], [1], [1], [0, 0, 0, 1, 1, 1], [0], [0]>} : vector<16x4x128xbf16>, vector<16x8x128xbf16>, vector<16x4x8xf32> -> vector<16x4x8xf32>
    "tpu.trace_stop"() : () -> ()
    %c0_36 = arith.constant 0 : index
    %c0_37 = arith.constant 0 : index
    %c0_38 = arith.constant 0 : index
    %c0_39 = arith.constant 0 : index
    %50 = vector.load %arg10[%c0_36, %c0_37, %c0_38, %c0_39] : memref<1x16x1x8xf32, #tpu.memory_space<vmem>>, vector<1x16x1x8xf32>
    %51 = vector.shape_cast %50 : vector<1x16x1x8xf32> to vector<16x1x8xf32>
    %52 = vector.broadcast %51 : vector<16x1x8xf32> to vector<16x4x8xf32>
    %53 = arith.addf %49, %52 : vector<16x4x8xf32>
    %54 = arith.truncf %39 : vector<16x4x8xf32> to vector<16x4x8xbf16>
    %55 = arith.truncf %46 : vector<16x4x8xf32> to vector<16x4x8xbf16>
    "tpu.trace_start"() <{level = 10 : i32, message = "hqd,hkd->hqk"}> : () -> ()
    %cst_40 = arith.constant dense<0.000000e+00> : vector<16x4x4xf32>
    %56 = tpu.matmul %54, %55, %cst_40 {dimension_numbers = #tpu.dot_dimension_numbers<[2], [2], [1], [1], [0, 0, 0, 1, 1, 1], [0], [0]>} : vector<16x4x8xbf16>, vector<16x4x8xbf16>, vector<16x4x4xf32> -> vector<16x4x4xf32>
    "tpu.trace_stop"() : () -> ()
    %cst_41 = arith.constant 0.353553385 : f32
    %57 = vector.broadcast %cst_41 : f32 to vector<16x4x4xf32>
    %58 = arith.mulf %56, %57 : vector<16x4x4xf32>
    %cst_42 = arith.constant dense<0xFF800000> : vector<16x4xf32>
    %59 = vector.multi_reduction <maximumf>, %58, %cst_42 [2] : vector<16x4x4xf32> to vector<16x4xf32>
    %60 = vector.shape_cast %59 : vector<16x4xf32> to vector<16x4x1xf32>
    %61 = vector.broadcast %60 : vector<16x4x1xf32> to vector<16x4x4xf32>
    %62 = arith.subf %58, %61 : vector<16x4x4xf32>
    %63 = math.exp %62 : vector<16x4x4xf32>
    %cst_43 = arith.constant dense<0.000000e+00> : vector<16x4xf32>
    %64 = vector.multi_reduction <add>, %63, %cst_43 [2] : vector<16x4x4xf32> to vector<16x4xf32>
    %65 = vector.shape_cast %64 : vector<16x4xf32> to vector<16x4x1xf32>
    %66 = tpu.reciprocal %65 : vector<16x4x1xf32> -> vector<16x4x1xf32>
    %67 = vector.broadcast %66 : vector<16x4x1xf32> to vector<16x4x4xf32>
    %68 = arith.mulf %63, %67 : vector<16x4x4xf32>
    %69 = arith.truncf %68 : vector<16x4x4xf32> to vector<16x4x4xbf16>
    %70 = arith.truncf %53 : vector<16x4x8xf32> to vector<16x4x8xbf16>
    "tpu.trace_start"() <{level = 10 : i32, message = "hqk,hkd->hqd"}> : () -> ()
    %cst_44 = arith.constant dense<0.000000e+00> : vector<16x4x8xf32>
    %71 = tpu.matmul %69, %70, %cst_44 {dimension_numbers = #tpu.dot_dimension_numbers<[2], [1], [1], [2], [0, 0, 0, 1, 1, 2], [0], [0]>} : vector<16x4x4xbf16>, vector<16x4x8xbf16>, vector<16x4x8xf32> -> vector<16x4x8xf32>
    "tpu.trace_stop"() : () -> ()
    %72 = arith.truncf %71 : vector<16x4x8xf32> to vector<16x4x8xbf16>
    %c0_45 = arith.constant 0 : index
    %c0_46 = arith.constant 0 : index
    %c0_47 = arith.constant 0 : index
    %c0_48 = arith.constant 0 : index
    %73 = vector.load %arg11[%c0_45, %c0_46, %c0_47, %c0_48] : memref<1x16x8x128xbf16, #tpu.memory_space<vmem>>, vector<1x16x8x128xbf16>
    %74 = vector.shape_cast %73 : vector<1x16x8x128xbf16> to vector<16x8x128xbf16>
    "tpu.trace_start"() <{level = 10 : i32, message = "hqd,hdn->hqn"}> : () -> ()
    %cst_49 = arith.constant dense<0.000000e+00> : vector<16x4x128xf32>
    %75 = tpu.matmul %72, %74, %cst_49 {dimension_numbers = #tpu.dot_dimension_numbers<[2], [1], [1], [2], [0, 0, 0, 1, 1, 2], [0], [0]>} : vector<16x4x8xbf16>, vector<16x8x128xbf16>, vector<16x4x128xf32> -> vector<16x4x128xf32>
    "tpu.trace_stop"() : () -> ()
    %cst_50 = arith.constant dense<0.000000e+00> : vector<4x128xf32>
    %76 = vector.multi_reduction <add>, %75, %cst_50 [0] : vector<16x4x128xf32> to vector<4x128xf32>
    %77 = arith.addf %4, %76 : vector<4x128xf32>
    %c0_51 = arith.constant 0 : index
    %c0_52 = arith.constant 0 : index
    %c0_53 = arith.constant 0 : index
    %78 = vector.load %arg12[%c0_51, %c0_52, %c0_53] : memref<1x1x128xf32, #tpu.memory_space<vmem>>, vector<1x1x128xf32>
    %79 = vector.shape_cast %78 : vector<1x1x128xf32> to vector<1x128xf32>
    %80 = vector.broadcast %79 : vector<1x128xf32> to vector<4x128xf32>
    %81 = arith.addf %77, %80 : vector<4x128xf32>
    %c0_54 = arith.constant 0 : index
    %c0_55 = arith.constant 0 : index
    %c0_56 = arith.constant 0 : index
    %82 = vector.load %arg13[%c0_54, %c0_55, %c0_56] : memref<1x1x128xf32, #tpu.memory_space<vmem>>, vector<1x1x128xf32>
    %83 = vector.shape_cast %82 : vector<1x1x128xf32> to vector<1x128xf32>
    %c0_57 = arith.constant 0 : index
    %c0_58 = arith.constant 0 : index
    %c0_59 = arith.constant 0 : index
    %84 = vector.load %arg14[%c0_57, %c0_58, %c0_59] : memref<1x1x128xf32, #tpu.memory_space<vmem>>, vector<1x1x128xf32>
    %85 = vector.shape_cast %84 : vector<1x1x128xf32> to vector<1x128xf32>
    %cst_60 = arith.constant dense<0.000000e+00> : vector<4xf32>
    %86 = vector.multi_reduction <add>, %81, %cst_60 [1] : vector<4x128xf32> to vector<4xf32>
    %87 = vector.shape_cast %86 : vector<4xf32> to vector<4x1xf32>
    %cst_61 = arith.constant 1.280000e+02 : f32
    %88 = vector.broadcast %cst_61 : f32 to vector<4x1xf32>
    %89 = arith.divf %87, %88 : vector<4x1xf32>
    %90 = vector.broadcast %89 : vector<4x1xf32> to vector<4x128xf32>
    %91 = arith.subf %81, %90 : vector<4x128xf32>
    %92 = arith.mulf %91, %91 : vector<4x128xf32>
    %cst_62 = arith.constant dense<0.000000e+00> : vector<4xf32>
    %93 = vector.multi_reduction <add>, %92, %cst_62 [1] : vector<4x128xf32> to vector<4xf32>
    %94 = vector.shape_cast %93 : vector<4xf32> to vector<4x1xf32>
    %cst_63 = arith.constant 1.280000e+02 : f32
    %95 = vector.broadcast %cst_63 : f32 to vector<4x1xf32>
    %96 = arith.divf %94, %95 : vector<4x1xf32>
    %cst_64 = arith.constant 9.99999974E-6 : f32
    %97 = vector.broadcast %cst_64 : f32 to vector<4x1xf32>
    %98 = arith.addf %96, %97 : vector<4x1xf32>
    %99 = math.rsqrt %98 : vector<4x1xf32>
    %100 = vector.broadcast %99 : vector<4x1xf32> to vector<4x128xf32>
    %101 = arith.mulf %91, %100 : vector<4x128xf32>
    %102 = vector.broadcast %83 : vector<1x128xf32> to vector<4x128xf32>
    %103 = arith.mulf %101, %102 : vector<4x128xf32>
    %104 = vector.broadcast %85 : vector<1x128xf32> to vector<4x128xf32>
    %105 = arith.addf %103, %104 : vector<4x128xf32>
    %106 = arith.truncf %105 : vector<4x128xf32> to vector<4x128xbf16>
    %c0_65 = arith.constant 0 : index
    %c0_66 = arith.constant 0 : index
    %c0_67 = arith.constant 0 : index
    %107 = vector.load %arg15[%c0_65, %c0_66, %c0_67] : memref<1x128x256xbf16, #tpu.memory_space<vmem>>, vector<1x128x256xbf16>
    %108 = vector.shape_cast %107 : vector<1x128x256xbf16> to vector<128x256xbf16>
    %cst_68 = arith.constant dense<0.000000e+00> : vector<4x256xf32>
    %109 = tpu.matmul %106, %108, %cst_68 {dimension_numbers = #tpu.dot_dimension_numbers<[1], [0], [0], [1], [0, 0, 1, 1], [], []>} : vector<4x128xbf16>, vector<128x256xbf16>, vector<4x256xf32> -> vector<4x256xf32>
    %c0_69 = arith.constant 0 : index
    %c0_70 = arith.constant 0 : index
    %c0_71 = arith.constant 0 : index
    %110 = vector.load %arg16[%c0_69, %c0_70, %c0_71] : memref<1x1x256xf32, #tpu.memory_space<vmem>>, vector<1x1x256xf32>
    %111 = vector.shape_cast %110 : vector<1x1x256xf32> to vector<1x256xf32>
    %112 = vector.broadcast %111 : vector<1x256xf32> to vector<4x256xf32>
    %113 = arith.addf %109, %112 : vector<4x256xf32>
    %cst_72 = arith.constant 5.000000e-01 : f32
    %114 = vector.broadcast %cst_72 : f32 to vector<4x256xf32>
    %115 = arith.mulf %114, %113 : vector<4x256xf32>
    %cst_73 = arith.constant 4.471500e-02 : f32
    %116 = vector.broadcast %cst_73 : f32 to vector<4x256xf32>
    %117 = arith.mulf %116, %113 : vector<4x256xf32>
    %118 = arith.mulf %117, %113 : vector<4x256xf32>
    %119 = arith.mulf %118, %113 : vector<4x256xf32>
    %120 = arith.addf %113, %119 : vector<4x256xf32>
    %cst_74 = arith.constant 0.797884583 : f32
    %121 = vector.broadcast %cst_74 : f32 to vector<4x256xf32>
    %122 = arith.mulf %121, %120 : vector<4x256xf32>
    %123 = math.tanh %122 : vector<4x256xf32>
    %cst_75 = arith.constant 1.000000e+00 : f32
    %124 = vector.broadcast %cst_75 : f32 to vector<4x256xf32>
    %125 = arith.addf %124, %123 : vector<4x256xf32>
    %126 = arith.mulf %115, %125 : vector<4x256xf32>
    %127 = arith.truncf %126 : vector<4x256xf32> to vector<4x256xbf16>
    %c0_76 = arith.constant 0 : index
    %c0_77 = arith.constant 0 : index
    %c0_78 = arith.constant 0 : index
    %128 = vector.load %arg17[%c0_76, %c0_77, %c0_78] : memref<1x256x128xbf16, #tpu.memory_space<vmem>>, vector<1x256x128xbf16>
    %129 = vector.shape_cast %128 : vector<1x256x128xbf16> to vector<256x128xbf16>
    %cst_79 = arith.constant dense<0.000000e+00> : vector<4x128xf32>
    %130 = tpu.matmul %127, %129, %cst_79 {dimension_numbers = #tpu.dot_dimension_numbers<[1], [0], [0], [1], [0, 0, 1, 1], [], []>} : vector<4x256xbf16>, vector<256x128xbf16>, vector<4x128xf32> -> vector<4x128xf32>
    %131 = arith.addf %81, %130 : vector<4x128xf32>
    %c0_80 = arith.constant 0 : index
    %c0_81 = arith.constant 0 : index
    %c0_82 = arith.constant 0 : index
    %132 = vector.load %arg18[%c0_80, %c0_81, %c0_82] : memref<1x1x128xf32, #tpu.memory_space<vmem>>, vector<1x1x128xf32>
    %133 = vector.shape_cast %132 : vector<1x1x128xf32> to vector<1x128xf32>
    %134 = vector.broadcast %133 : vector<1x128xf32> to vector<4x128xf32>
    %135 = arith.addf %131, %134 : vector<4x128xf32>
    %c0_83 = arith.constant 0 : index
    %c0_84 = arith.constant 0 : index
    %c0_85 = arith.constant 0 : index
    %136 = vector.load %arg19[%c0_83, %c0_84, %c0_85] : memref<1x4x128xf32, #tpu.memory_space<vmem>>, vector<1x4x128xf32>
    %137 = vector.shape_cast %136 : vector<1x4x128xf32> to vector<4x128xf32>
    %138 = vector.shape_cast %135 : vector<4x128xf32> to vector<1x4x128xf32>
    tpu.vector_store %arg19[%c0_83, %c0_84, %c0_85], %138 {strides = array<i32>} : memref<1x4x128xf32, #tpu.memory_space<vmem>>, vector<1x4x128xf32>,
    return
  }
  func.func @transform_0(%arg0: i32, %arg1: i32) -> (i32, i32, i32) {
    %c0_i32 = arith.constant 0 : i32
    %c0_i32_0 = arith.constant 0 : i32
    %c0_i32_1 = arith.constant 0 : i32
    return %arg0, %c0_i32, %c0_i32_0 : i32, i32, i32
  }
  func.func @transform_1(%arg0: i32, %arg1: i32) -> (i32, i32, i32) {
    %c0_i32 = arith.constant 0 : i32
    %c0_i32_0 = arith.constant 0 : i32
    %c0_i32_1 = arith.constant 0 : i32
    return %arg1, %c0_i32, %c0_i32_0 : i32, i32, i32
  }
  func.func @transform_2(%arg0: i32, %arg1: i32) -> (i32, i32, i32) {
    %c0_i32 = arith.constant 0 : i32
    %c0_i32_0 = arith.constant 0 : i32
    %c0_i32_1 = arith.constant 0 : i32
    return %arg1, %c0_i32, %c0_i32_0 : i32, i32, i32
  }
  func.func @transform_3(%arg0: i32, %arg1: i32) -> (i32, i32, i32, i32) {
    %c0_i32 = arith.constant 0 : i32
    %c0_i32_0 = arith.constant 0 : i32
    %c0_i32_1 = arith.constant 0 : i32
    %c0_i32_2 = arith.constant 0 : i32
    return %arg1, %c0_i32, %c0_i32_0, %c0_i32_1 : i32, i32, i32, i32
  }
  func.func @transform_4(%arg0: i32, %arg1: i32) -> (i32, i32, i32, i32) {
    %c0_i32 = arith.constant 0 : i32
    %c0_i32_0 = arith.constant 0 : i32
    %c0_i32_1 = arith.constant 0 : i32
    %c0_i32_2 = arith.constant 0 : i32
    return %arg1, %c0_i32, %c0_i32_0, %c0_i32_1 : i32, i32, i32, i32
  }
  func.func @transform_5(%arg0: i32, %arg1: i32) -> (i32, i32, i32, i32) {
    %c0_i32 = arith.constant 0 : i32
    %c0_i32_0 = arith.constant 0 : i32
    %c0_i32_1 = arith.constant 0 : i32
    %c0_i32_2 = arith.constant 0 : i32
    return %arg1, %c0_i32, %c0_i32_0, %c0_i32_1 : i32, i32, i32, i32
  }
  func.func @transform_6(%arg0: i32, %arg1: i32) -> (i32, i32, i32, i32) {
    %c0_i32 = arith.constant 0 : i32
    %c0_i32_0 = arith.constant 0 : i32
    %c0_i32_1 = arith.constant 0 : i32
    %c0_i32_2 = arith.constant 0 : i32
    return %arg1, %c0_i32, %c0_i32_0, %c0_i32_1 : i32, i32, i32, i32
  }
  func.func @transform_7(%arg0: i32, %arg1: i32) -> (i32, i32, i32, i32) {
    %c0_i32 = arith.constant 0 : i32
    %c0_i32_0 = arith.constant 0 : i32
    %c0_i32_1 = arith.constant 0 : i32
    %c0_i32_2 = arith.constant 0 : i32
    return %arg1, %c0_i32, %c0_i32_0, %c0_i32_1 : i32, i32, i32, i32
  }
  func.func @transform_8(%arg0: i32, %arg1: i32) -> (i32, i32, i32, i32) {
    %c0_i32 = arith.constant 0 : i32
    %c0_i32_0 = arith.constant 0 : i32
    %c0_i32_1 = arith.constant 0 : i32
    %c0_i32_2 = arith.constant 0 : i32
    return %arg1, %c0_i32, %c0_i32_0, %c0_i32_1 : i32, i32, i32, i32
  }
  func.func @transform_9(%arg0: i32, %arg1: i32) -> (i32, i32, i32, i32) {
    %c0_i32 = arith.constant 0 : i32
    %c0_i32_0 = arith.constant 0 : i32
    %c0_i32_1 = arith.constant 0 : i32
    %c0_i32_2 = arith.constant 0 : i32
    return %arg1, %c0_i32, %c0_i32_0, %c0_i32_1 : i32, i32, i32, i32
  }
  func.func @transform_10(%arg0: i32, %arg1: i32) -> (i32, i32, i32) {
    %c0_i32 = arith.constant 0 : i32
    %c0_i32_0 = arith.constant 0 : i32
    %c0_i32_1 = arith.constant 0 : i32
    return %arg1, %c0_i32, %c0_i32_0 : i32, i32, i32
  }
  func.func @transform_11(%arg0: i32, %arg1: i32) -> (i32, i32, i32) {
    %c0_i32 = arith.constant 0 : i32
    %c0_i32_0 = arith.constant 0 : i32
    %c0_i32_1 = arith.constant 0 : i32
    return %arg1, %c0_i32, %c0_i32_0 : i32, i32, i32
  }
  func.func @transform_12(%arg0: i32, %arg1: i32) -> (i32, i32, i32) {
    %c0_i32 = arith.constant 0 : i32
    %c0_i32_0 = arith.constant 0 : i32
    %c0_i32_1 = arith.constant 0 : i32
    return %arg1, %c0_i32, %c0_i32_0 : i32, i32, i32
  }
  func.func @transform_13(%arg0: i32, %arg1: i32) -> (i32, i32, i32) {
    %c0_i32 = arith.constant 0 : i32
    %c0_i32_0 = arith.constant 0 : i32
    %c0_i32_1 = arith.constant 0 : i32
    return %arg1, %c0_i32, %c0_i32_0 : i32, i32, i32
  }
  func.func @transform_14(%arg0: i32, %arg1: i32) -> (i32, i32, i32) {
    %c0_i32 = arith.constant 0 : i32
    %c0_i32_0 = arith.constant 0 : i32
    %c0_i32_1 = arith.constant 0 : i32
    return %arg1, %c0_i32, %c0_i32_0 : i32, i32, i32
  }
  func.func @transform_15(%arg0: i32, %arg1: i32) -> (i32, i32, i32) {
    %c0_i32 = arith.constant 0 : i32
    %c0_i32_0 = arith.constant 0 : i32
    %c0_i32_1 = arith.constant 0 : i32
    return %arg1, %c0_i32, %c0_i32_0 : i32, i32, i32
  }
  func.func @transform_16(%arg0: i32, %arg1: i32) -> (i32, i32, i32) {
    %c0_i32 = arith.constant 0 : i32
    %c0_i32_0 = arith.constant 0 : i32
    %c0_i32_1 = arith.constant 0 : i32
    return %arg1, %c0_i32, %c0_i32_0 : i32, i32, i32
  }
  func.func @transform_17(%arg0: i32, %arg1: i32) -> (i32, i32, i32) {
    %c0_i32 = arith.constant 0 : i32
    %c0_i32_0 = arith.constant 0 : i32
    %c0_i32_1 = arith.constant 0 : i32
    return %arg0, %c0_i32, %c0_i32_0 : i32, i32, i32
  }
}

</mosaic_0001>

<bundles_post_ra>
// kernel: moondream_forward.3
= control target key start
LH: loop header
LB: loop body
LE: loop exit
PB: predicated region body
PF: predicated region fallthrough
CT: control target
= control target key end

     0   :  { %v627_v35 = vmov 0.0   ;;  %vm344_vm0 = vcmask 1045504   ;;  %vm628_vm1 = vmmov 0   ;;  %vm340_vm2 = vcmask 621568   ;;  %s783_s1 = inlined_call_operand.vmem [shape: bf16[588,128], index: 1, kind: input, shape index: {}]   ;;  %s784_s0 = inlined_call_operand.vmem [shape: bf16[8,588], index: 0, kind: input, shape index: {}]   ;;  %s785_s2 = inlined_call_operand.vmem [shape: f32[1,128], index: 2, kind: input, shape index: {}]   ;;  %s786_s3 = inlined_call_operand.vmem [shape: f32[8,128], index: 3, kind: input, shape index: {}]   ;;  %s787_s4 = inlined_call_operand.vmem [shape: f32[8,128], index: 4, kind: output, shape index: {}]  }
   0x1   :  { %v585_v0 = vld [vmem:[%s783_s1 + $0x78] sm:$0xff]   ;;  %v589_v4 = vld [vmem:[%s783_s1 + $0x70] sm:$0xff]   ;;  %v593_v8 = vld [vmem:[%s783_s1 + $0x68] sm:$0xff]  }
   0x2   :  { %v586_v1 = vld [vmem:[%s783_s1 + $0x38] sm:$0xff]   ;;  %519 = vmatprep.subr.bf16.mxu0 %v585_v0  ;;  %v590_v5 = vld [vmem:[%s783_s1 + $0x30] sm:$0xff]   ;;  %v594_v9 = vld [vmem:[%s783_s1 + $0x28] sm:$0xff]  }
   0x3   :  { %v587_v2 = vld [vmem:[%s783_s1 + $0xf8] sm:$0xff]   ;;  %520 = vmatpush3.bf16.msra.mxu0 %v586_v1  ;;  %v591_v6 = vld [vmem:[%s783_s1 + $0xf0] sm:$0xff]   ;;  %v595_v10 = vld [vmem:[%s783_s1 + $0xe8] sm:$0xff]  }
   0x4   :  { %v588_v3 = vld [vmem:[%s783_s1 + $0xb8] sm:$0xff]   ;;  %541 = vmatprep.subr.bf16.mxu1 %v587_v2  ;;  %521 = vmatprep.subr.bf16.mxu0 %v589_v4  ;;  %v592_v7 = vld [vmem:[%s783_s1 + $0xb0] sm:$0xff]   ;;  %v596_v11 = vld [vmem:[%s783_s1 + $0xa8] sm:$0xff]  }
   0x5   :  { %542 = vmatpush3.bf16.msra.mxu1 %v588_v3  ;;  %v597_v12 = vld [vmem:[%s783_s1 + $0x60] sm:$0xff]   ;;  %v601_v16 = vld [vmem:[%s783_s1 + $0x58] sm:$0xff]   ;;  %v605_v20 = vld [vmem:[%s783_s1 + $0x50] sm:$0xff]  }
   0x6   :  { %543 = vmatprep.subr.bf16.mxu1 %v591_v6  ;;  %v598_v13 = vld [vmem:[%s783_s1 + $0x20] sm:$0xff]   ;;  %v602_v17 = vld [vmem:[%s783_s1 + $0x18] sm:$0xff]   ;;  %v606_v21 = vld [vmem:[%s783_s1 + $0x10] sm:$0xff]  }
   0x7   :  { %522 = vmatpush3.bf16.msra.mxu0 %v590_v5  ;;  %v599_v14 = vld [vmem:[%s783_s1 + $0xe0] sm:$0xff]   ;;  %v603_v18 = vld [vmem:[%s783_s1 + $0xd8] sm:$0xff]   ;;  %v607_v22 = vld [vmem:[%s783_s1 + $0xd0] sm:$0xff]  }
   0x8   :  { %523 = vmatprep.subr.bf16.mxu0 %v593_v8  ;;  %v600_v15 = vld [vmem:[%s783_s1 + $0xa0] sm:$0xff]   ;;  %v604_v19 = vld [vmem:[%s783_s1 + $0x98] sm:$0xff]   ;;  %v608_v23 = vld [vmem:[%s783_s1 + $0x90] sm:$0xff]  }
   0x9   :  { %544 = vmatpush3.bf16.msra.mxu1 %v592_v7  ;;  %v609_v24 = vld [vmem:[%s783_s1 + $0x48] sm:$0xff]   ;;  %v613_v28 = vld [vmem:[%s783_s1 + $0x40] sm:$0xff]   ;;  %v623_v41 = vld [vmem:[%s783_s1 + $0x118] sm:$0xff]  }
   0xa   :  { %545 = vmatprep.subr.bf16.mxu1 %v595_v10  ;;  %v610_v25 = vld [vmem:[%s783_s1 + $0x8] sm:$0xff]   ;;  %v614_v29 = vld [vmem:[%s783_s1] sm:$0xff]   ;;  %v624_v42 = vld [vmem:[%s783_s1 + $0x110] sm:$0xff]  }
   0xb   :  { %524 = vmatpush3.bf16.msra.mxu0 %v594_v9  ;;  %v611_v26 = vld [vmem:[%s783_s1 + $0xc8] sm:$0xff]   ;;  %v615_v30 = vld [vmem:[%s783_s1 + $0xc0] sm:$0xff]   ;;  %v618_v45 = vld [vmem:[%s784_s0 + $0x10] ss:$0 sps:$4 sm:$0xff]  }
   0xc   :  { %525 = vmatprep.subr.bf16.mxu0 %v597_v12  ;;  %v612_v27 = vld [vmem:[%s783_s1 + $0x88] sm:$0xff]   ;;  %v18_v31 = vld [vmem:[%s784_s0] sm:$0xff] }
   0xd   :  { %546 = vmatpush3.bf16.msra.mxu1 %v596_v11  ;;  %v476_v32 = vcombine.low %v18_v31, %v18_v31  ;;  %v477_v33 = vcombine.high %v18_v31, %v18_v31  ;;  %v619_v34 = vld [vmem:[%s783_s1 + $0x80] sm:$0xff]   ;;  %v19_v36 = vld [vmem:[%s784_s0 + $0x8] sm:$0xff] }
   0xe   :  { %547 = vmatprep.subr.bf16.mxu1 %v599_v14  ;;  %v478_v37 = vcombine.low %v19_v36, %v19_v36  ;;  %v479_v38 = vcombine.high %v19_v36, %v19_v36  ;;  %v622_v39 = vld [vmem:[%s783_s1 + $0x120] sm:$0x3f]   ;;  %v625_v43 = vld [vmem:[%s783_s1 + $0x108] sm:$0xff]  }
   0xf   :  { %526 = vmatpush3.bf16.msra.mxu0 %v598_v13  ;;  %380 = vmatprep.mubr.bf16.mxu0 %v477_v33  ;;  %v346_v40 = vsel %vm344_vm0, %v622_v39, 0  ;;  %v626_v44 = vld [vmem:[%s783_s1 + $0x100] sm:$0xff]  }
  0x10   :  { %527 = vmatprep.subr.bf16.mxu0 %v601_v16  ;;  %420 = vmatprep.mubr.bf16.mxu1 %v479_v38  ;;  %v475_v55 = vld [vmem:[%s785_s2] ss:$0 sm:$0xff] }
  0x11   :  { %548 = vmatpush3.bf16.msra.mxu1 %v600_v15  ;;  %v468_v60 = vld [vmem:[%s786_s3] sm:$0xff] }
  0x12   :  { %549 = vmatprep.subr.bf16.mxu1 %v603_v18 }
  0x13   :  { %528 = vmatpush3.bf16.msra.mxu0 %v602_v17 }
  0x14   :  { %529 = vmatprep.subr.bf16.mxu0 %v605_v20 }
  0x15   :  { %550 = vmatpush3.bf16.msra.mxu1 %v604_v19 }
  0x16   :  { %551 = vmatprep.subr.bf16.mxu1 %v607_v22 }
  0x17   :  { %530 = vmatpush3.bf16.msra.mxu0 %v606_v21 }
  0x18   :  { %531 = vmatprep.subr.bf16.mxu0 %v609_v24 }
  0x19   :  { %552 = vmatpush3.bf16.msra.mxu1 %v608_v23 }
  0x1a   :  { %553 = vmatprep.subr.bf16.mxu1 %v611_v26 }
  0x1b   :  { %532 = vmatpush3.bf16.msra.mxu0 %v610_v25 }
  0x1c   :  { %533 = vmatprep.subr.bf16.mxu0 %v613_v28 }
  0x1d   :  { %554 = vmatpush3.bf16.msra.mxu1 %v612_v27 }
  0x1e   :  { %555 = vmatprep.subr.bf16.mxu1 %v615_v30 }
  0x1f   :  { %534 = vmatpush3.bf16.msra.mxu0 %v614_v29 }
  0x20   :  { %569 = vmatprep.subr.bf16.mxu0 %v627_v35 }
  0x21   :  { %556 = vmatpush3.bf16.msra.mxu1 %v619_v34 }
  0x22   :  { %381 = vmatmul.mubr.bf16.vlgmr.msra.gmra.mxu0 %v476_v32 }
  0x23   :  { %579 = vmatprep.mubr.msk.bf16.mxu0 %vm628_vm1, %v627_v35  ;;  %570 = vmatpush3.bf16.msra.mxu0 %v346_v40 }
  0x24   :  { %421 = vmatmul.mubr.bf16.vlgmr.msra.gmra.mxu1 %v478_v37  ;;  %571 = vmatprep.subr.bf16.mxu0 %v627_v35 }
  0x27   :  { %572 = vmatpush3.bf16.msra.mxu0 %v623_v41 }
  0x28   :  { %573 = vmatprep.subr.bf16.mxu0 %v627_v35 }
  0x2b   :  { %574 = vmatpush3.bf16.msra.mxu0 %v624_v42 }
  0x2c   :  { %575 = vmatprep.subr.bf16.mxu0 %v627_v35 }
  0x2f   :  { %576 = vmatpush3.bf16.msra.mxu0 %v625_v43 }
  0x30   :  { %577 = vmatprep.subr.bf16.mxu0 %v627_v35 }
  0x33   :  { %578 = vmatpush3.bf16.msra.mxu0 %v626_v44 }
  0x36   :  { %580 = vmatmul.mubr.msk.bf16.vlgmr.msra.gmra.mxu0 %vm340_vm2, %v618_v45 }
  0xe2   :  { %v535_v46 = vpop.f32.mrf.mxu0 }
  0xe4   :  { %v536_v47 = vpop.f32.mrf.mxu0  ;;  %v557_v48 = vpop.f32.mrf.mxu1 }
  0xe5   :  { %v537_v54 = vadd.f32 %v536_v47, %v535_v46 }
  0xe6   :  { %v538_v49 = vpop.f32.mrf.mxu0  ;;  %v558_v50 = vpop.f32.mrf.mxu1 }
  0xe7   :  { %v383_v56 = vadd.f32 %v537_v54, %v475_v55  ;;  %v559_v57 = vadd.f32 %v558_v50, %v557_v48 }
  0xe8   :  { %v539_v51 = vpop.f32.mrf.mxu0  ;;  %v560_v52 = vpop.f32.mrf.mxu1 }
  0xe9   :  { %v423_v58 = vadd.f32 %v559_v57, %v383_v56 }
  0xea   :  { %v561_v53 = vpop.f32.mrf.mxu1 }
  0xf6   :  { %v462_v59 = vpop.f32.mrf.mxu0 }
  0xf7   :  { %v463_v61 = vadd.f32 %v462_v59, %v423_v58 }
  0xf8   :  { %v581_v62 = vpop.f32.mrf.mxu0 }
  0xf9   :  { %v469_v63 = vadd.f32 %v468_v60, %v463_v61 }
  0xfa   :  { %v465_v0 = vpop.f32.mrf.mxu0 }
  0xfb   :  { %470 = vst [vmem:[%s787_s4] sm:$0xff] %v469_v63 }
  0xfc   :  { %v582_v1 = vpop.f32.mrf.mxu0 }

// kernel: moondream_forward.5
= control target key start
LH: loop header
LB: loop body
LE: loop exit
PB: predicated region body
PF: predicated region fallthrough
CT: control target
= control target key end

     0   :  { %v510_v16 = vmov 0   ;;  %v75_v48 = vlaneseq  ;;  %s665_s0 = inlined_call_operand.vmem [shape: f32[8,128], index: 0, kind: input, shape index: {}]   ;;  %s666_s3 = inlined_call_operand.vmem [shape: bf16[128,256], index: 3, kind: input, shape index: {}]   ;;  %s667_s1 = inlined_call_operand.vmem [shape: f32[1,128], index: 1, kind: input, shape index: {}]   ;;  %s668_s2 = inlined_call_operand.vmem [shape: f32[1,128], index: 2, kind: input, shape index: {}]   ;;  %s669_s5 = inlined_call_operand.vmem [shape: bf16[256,128], index: 5, kind: input, shape index: {}]   ;;  %s670_s4 = inlined_call_operand.vmem [shape: f32[1,256], index: 4, kind: input, shape index: {}]   ;;  %s671_s6 = inlined_call_operand.vmem [shape: f32[1,128], index: 6, kind: input, shape index: {}]   ;;  %s672_s7 = inlined_call_operand.vmem [shape: f32[8,128], index: 7, kind: output, shape index: {}]  }
   0x1   :  { %v27_v0 = vld [vmem:[%s665_s0] sm:$0xff]  ;;  %v464_v1 = vld [vmem:[%s666_s3 + $0x74] ss:$8 sps:$4 sm:$0xff]   ;;  %v466_v2 = vld [vmem:[%s666_s3 + $0x70] ss:$8 sps:$4 sm:$0xff]   ;;  %197 = vmatprep.mubr.bf16.mxu0 %v510_v16 }
   0x2   :  { %30 = vadd.xlane.f32.xlu0 %v27_v0  ;;  %165 = vmatprep.subr.bf16.mxu0 %v464_v1  ;;  %v467_v3 = vld [vmem:[%s666_s3 + $0x64] ss:$8 sps:$4 sm:$0xff]   ;;  %v469_v4 = vld [vmem:[%s666_s3 + $0x60] ss:$8 sps:$4 sm:$0xff]   ;;  %v470_v9 = vld [vmem:[%s666_s3 + $0x54] ss:$8 sps:$4 sm:$0xff]  }
   0x3   :  { %166 = vmatpush1.bf16.msra.mxu0 %v466_v2  ;;  %v472_v10 = vld [vmem:[%s666_s3 + $0x50] ss:$8 sps:$4 sm:$0xff]   ;;  %v473_v11 = vld [vmem:[%s666_s3 + $0x44] ss:$8 sps:$4 sm:$0xff]   ;;  %v475_v12 = vld [vmem:[%s666_s3 + $0x40] ss:$8 sps:$4 sm:$0xff]  }
   0x4   :  { %167 = vmatprep.subr.bf16.mxu0 %v467_v3  ;;  %v476_v13 = vld [vmem:[%s666_s3 + $0x34] ss:$8 sps:$4 sm:$0xff]   ;;  %v478_v14 = vld [vmem:[%s666_s3 + $0x30] ss:$8 sps:$4 sm:$0xff]   ;;  %v479_v15 = vld [vmem:[%s666_s3 + $0x24] ss:$8 sps:$4 sm:$0xff]  }
   0x5   :  { %v481_v17 = vld [vmem:[%s666_s3 + $0x20] ss:$8 sps:$4 sm:$0xff]   ;;  %v482_v18 = vld [vmem:[%s666_s3 + $0x14] ss:$8 sps:$4 sm:$0xff]   ;;  %v484_v19 = vld [vmem:[%s666_s3 + $0x10] ss:$8 sps:$4 sm:$0xff]  }
   0x6   :  { %v485_v20 = vld [vmem:[%s666_s3 + $0x4] ss:$8 sps:$4 sm:$0xff]   ;;  %v487_v21 = vld [vmem:[%s666_s3] ss:$8 sps:$4 sm:$0xff]   ;;  %v488_v32 = vld [vmem:[%s669_s5 + $0x78] sm:$0xff]   ;;  %v76_v49 = vshrl.u32 %v75_v48, 7 }
   0x7   :  { %168 = vmatpush1.bf16.msra.mxu0 %v469_v4  ;;  %v406_v26 = vld [vmem:[%s667_s1] ss:$0 sm:$0xff]  ;;  %v489_v33 = vld [vmem:[%s669_s5 + $0x38] sm:$0xff]   ;;  %441 = vmatprep.subr.bf16.mxu1 %v488_v32  ;;  %v490_v34 = vld [vmem:[%s669_s5 + $0x70] sm:$0xff]  }
   0x8   :  { %169 = vmatprep.subr.bf16.mxu0 %v470_v9  ;;  %v407_v28 = vld [vmem:[%s668_s2] ss:$0 sm:$0xff]  ;;  %442 = vmatpush3.bf16.msra.mxu1 %v489_v33  ;;  %v491_v35 = vld [vmem:[%s669_s5 + $0x30] sm:$0xff]   ;;  %v492_v36 = vld [vmem:[%s669_s5 + $0x68] sm:$0xff]   ;;  %v77_v50 = vsub.s32 0, %v76_v49  ;;  %v81_v52 = vsub.s32 1, %v76_v49 }
   0x9   :  { %443 = vmatprep.subr.bf16.mxu1 %v490_v34  ;;  %v493_v37 = vld [vmem:[%s669_s5 + $0x28] sm:$0xff]   ;;  %v494_v38 = vld [vmem:[%s669_s5 + $0x60] sm:$0xff]   ;;  %v496_v40 = vld [vmem:[%s669_s5 + $0x58] sm:$0xff]  }
   0xa   :  { %v495_v39 = vld [vmem:[%s669_s5 + $0x20] sm:$0xff]   ;;  %v497_v41 = vld [vmem:[%s669_s5 + $0x18] sm:$0xff]   ;;  %v498_v42 = vld [vmem:[%s669_s5 + $0x50] sm:$0xff]  }
   0xb   :  { %170 = vmatpush1.bf16.msra.mxu0 %v472_v10  ;;  %v499_v43 = vld [vmem:[%s669_s5 + $0x10] sm:$0xff]   ;;  %v500_v44 = vld [vmem:[%s669_s5 + $0x48] sm:$0xff]   ;;  %v502_v46 = vld [vmem:[%s669_s5 + $0x40] sm:$0xff]  }
   0xc   :  { %171 = vmatprep.subr.bf16.mxu0 %v473_v11  ;;  %444 = vmatpush3.bf16.msra.mxu1 %v491_v35  ;;  %v501_v45 = vld [vmem:[%s669_s5 + $0x8] sm:$0xff]   ;;  %v503_v47 = vld [vmem:[%s669_s5] sm:$0xff]  }
   0xd   :  { %445 = vmatprep.subr.bf16.mxu1 %v492_v36  ;;  %v73_v51 = vld [vmem:[%s670_s4] sm:$0x3] }
   0xe   :  { %v78_v53 = vrot.slane %v73_v51, %v77_v50  ;;  %v82_v54 = vrot.slane %v73_v51, %v81_v52 }
   0xf   :  { %172 = vmatpush1.bf16.msra.mxu0 %v475_v12 }
  0x10   :  { %173 = vmatprep.subr.bf16.mxu0 %v476_v13  ;;  %446 = vmatpush3.bf16.msra.mxu1 %v493_v37 }
  0x11   :  { %447 = vmatprep.subr.bf16.mxu1 %v494_v38 }
  0x13   :  { %174 = vmatpush1.bf16.msra.mxu0 %v478_v14 }
  0x14   :  { %175 = vmatprep.subr.bf16.mxu0 %v479_v15  ;;  %448 = vmatpush3.bf16.msra.mxu1 %v495_v39 }
  0x15   :  { %449 = vmatprep.subr.bf16.mxu1 %v496_v40 }
  0x17   :  { %176 = vmatpush1.bf16.msra.mxu0 %v481_v17 }
  0x18   :  { %177 = vmatprep.subr.bf16.mxu0 %v482_v18  ;;  %450 = vmatpush3.bf16.msra.mxu1 %v497_v41  ;;  %v424_v18 = vld [vmem:[%s671_s6] ss:$0 sm:$0xff] }
  0x19   :  { %451 = vmatprep.subr.bf16.mxu1 %v498_v42 }
  0x1b   :  { %178 = vmatpush1.bf16.msra.mxu0 %v484_v19 }
  0x1c   :  { %179 = vmatprep.subr.bf16.mxu0 %v485_v20  ;;  %452 = vmatpush3.bf16.msra.mxu1 %v499_v43 }
  0x1d   :  { %453 = vmatprep.subr.bf16.mxu1 %v500_v44 }
  0x1f   :  { %180 = vmatpush1.bf16.msra.mxu0 %v487_v21 }
  0x20   :  { %454 = vmatpush3.bf16.msra.mxu1 %v501_v45 }
  0x21   :  { %455 = vmatprep.subr.bf16.mxu1 %v502_v46 }
  0x24   :  { %456 = vmatpush3.bf16.msra.mxu1 %v503_v47 }
  0x8b   :  { %v31_v5 = vpop.xlane.xlu0 %30 }
  0x8c   :  { %v33_v6 = vmul.f32 0.0078125, %v31_v5 }
  0x8e   :  { %v34_v7 = vsub.f32 %v27_v0, %v33_v6 }
  0x90   :  { %v35_v8 = vmul.f32 %v34_v7, %v34_v7 }
  0x92   :  { %36 = vadd.xlane.f32.xlu0 %v35_v8 }
 0x11b   :  { %v37_v22 = vpop.xlane.xlu0 %36 }
 0x11c   :  { %v38_v23 = vmul.f32 0.0078125, %v37_v22 }
 0x11e   :  { %v39_v24 = vadd.f32 1e-05, %v38_v23 }
 0x120   :  { %504 = vrsqrt.f32 %v39_v24 }
 0x12d   :  { %v505_v25 = vpop.eup %504 }
 0x12e   :  { %v41_v27 = vmul.f32 %v505_v25, %v34_v7 }
 0x130   :  { %v48_v29 = vmul.f32 %v406_v26, %v41_v27 }
 0x132   :  { %v55_v30 = vadd.f32 %v407_v28, %v48_v29 }
 0x134   :  { %v56_v31 = vpack.c.bf16 %v55_v30, %v55_v30 }
 0x136   :  { %198 = vmatmul.mubr.bf16.vlgmr.msra.gmra.mxu0 %v56_v31 }
 0x1f6   :  { %v199_v55 = vpop.f32.mrf.mxu0 }
 0x1f7   :  { %v200_v56 = vadd.f32 %v199_v55, %v78_v53 }
 0x1f8   :  { %v201_v57 = vpop.f32.mrf.mxu0 }
 0x1f9   :  { %v208_v58 = vmul.f32 0.044715, %v200_v56  ;;  %v202_v59 = vadd.f32 %v201_v57, %v82_v54  ;;  %v206_v10 = vmul.f32 0.5, %v200_v56 }
 0x1fa   :  { %v203_v60 = vpop.f32.mrf.mxu0 }
 0x1fb   :  { %v210_v61 = vmul.f32 %v208_v58, %v200_v56  ;;  %v209_v62 = vmul.f32 0.044715, %v202_v59  ;;  %v207_v11 = vmul.f32 0.5, %v202_v59 }
 0x1fc   :  { %v204_v63 = vpop.f32.mrf.mxu0 }
 0x1fd   :  { %v211_v0 = vmul.f32 %v209_v62, %v202_v59  ;;  %v212_v1 = vmul.f32 %v210_v61, %v200_v56 }
 0x1ff   :  { %v213_v2 = vmul.f32 %v211_v0, %v202_v59  ;;  %v214_v3 = vadd.f32 %v212_v1, %v200_v56 }
 0x201   :  { %v215_v4 = vadd.f32 %v213_v2, %v202_v59  ;;  %v216_v5 = vmul.f32 0.7978846, %v214_v3 }
 0x203   :  { %v217_v6 = vmul.f32 0.7978846, %v215_v4  ;;  %506 = vtanh.f32 %v216_v5 }
 0x205   :  { %508 = vtanh.f32 %v217_v6 }
 0x210   :  { %v507_v7 = vpop.eup %506 }
 0x211   :  { %v220_v8 = vadd.f32 1.0, %v507_v7 }
 0x212   :  { %v509_v9 = vpop.eup %508 }
 0x213   :  { %v221_v12 = vadd.f32 1.0, %v509_v9  ;;  %v222_v13 = vmul.f32 %v220_v8, %v206_v10 }
 0x215   :  { %v223_v14 = vmul.f32 %v221_v12, %v207_v11  ;;  %v224_v16 = vpack.c.bf16 %v222_v13, %v222_v13 }
 0x217   :  { %v225_v15 = vpack.c.bf16 %v223_v14, %v223_v14 }
 0x219   :  { %393 = vmatprep.mubr.bf16.mxu1 %v225_v15 }
 0x21a   :  { %394 = vmatmul.mubr.bf16.vlgmr.msra.gmra.mxu1 %v224_v16 }
 0x2da   :  { %v457_v17 = vpop.f32.mrf.mxu1 }
 0x2dc   :  { %v458_v19 = vpop.f32.mrf.mxu1 }
 0x2dd   :  { %v459_v20 = vadd.f32 %v458_v19, %v457_v17 }
 0x2de   :  { %v460_v21 = vpop.f32.mrf.mxu1 }
 0x2df   :  { %v396_v22 = vadd.f32 %v459_v20, %v424_v18 }
 0x2e0   :  { %v461_v23 = vpop.f32.mrf.mxu1 }
 0x2e1   :  { %401 = vst [vmem:[%s672_s7] sm:$0xff] %v396_v22 }

// kernel: moondream_forward.4
= control target key start
LH: loop header
LB: loop body
LE: loop exit
PB: predicated region body
PF: predicated region fallthrough
CT: control target
= control target key end

     0   :  { %s7572_s24 = smov 0   ;;  %s7574_s25 = smov 0   ;;  %s8598_s0 = inlined_call_operand.vmem [shape: f32[2,4,128], index: 0, kind: input, shape index: {}]   ;;  %s8599_s1 = inlined_call_operand.vmem [shape: f32[2,1,128], index: 1, kind: input, shape index: {}]   ;;  %s8600_s2 = inlined_call_operand.vmem [shape: f32[2,1,128], index: 2, kind: input, shape index: {}]   ;;  %s8601_s3 = inlined_call_operand.vmem [shape: bf16[2,16,8,128], index: 3, kind: input, shape index: {}]   ;;  %s8602_s4 = inlined_call_operand.vmem [shape: bf16[2,16,8,128], index: 4, kind: input, shape index: {}]   ;;  %s8603_s5 = inlined_call_operand.vmem [shape: bf16[2,16,8,128], index: 5, kind: input, shape index: {}]   ;;  %s8604_s6 = inlined_call_operand.vmem [shape: f32[2,16,1,8], index: 6, kind: input, shape index: {}]   ;;  %s8605_s7 = inlined_call_operand.vmem [shape: f32[2,16,1,8], index: 7, kind: input, shape index: {}]   ;;  %s8606_s8 = inlined_call_operand.vmem [shape: f32[2,16,1,8], index: 8, kind: input, shape index: {}]   ;;  %s8607_s9 = inlined_call_operand.vmem [shape: bf16[2,16,8,128], index: 9, kind: input, shape index: {}]   ;;  %s8608_s10 = inlined_call_operand.vmem [shape: f32[2,1,128], index: 10, kind: input, shape index: {}]   ;;  %s8609_s11 = inlined_call_operand.vmem [shape: f32[2,1,128], index: 11, kind: input, shape index: {}]   ;;  %s8610_s12 = inlined_call_operand.vmem [shape: f32[2,1,128], index: 12, kind: input, shape index: {}]   ;;  %s8611_s13 = inlined_call_operand.vmem [shape: bf16[2,128,256], index: 13, kind: input, shape index: {}]   ;;  %s8612_s14 = inlined_call_operand.vmem [shape: f32[2,1,256], index: 14, kind: input, shape index: {}]   ;;  %s8613_s15 = inlined_call_operand.vmem [shape: bf16[2,256,128], index: 15, kind: input, shape index: {}]   ;;  %s8614_s16 = inlined_call_operand.vmem [shape: f32[2,1,128], index: 16, kind: input, shape index: {}]   ;;  %s8615_s17 = inlined_call_operand.vmem [shape: f32[2,4,128], index: 17, kind: output, shape index: {}]  }
   0x1   :  { %8621 = sst [smem:[#allocation9_spill]] %s8598_s0  ;;  %s7576_s26 = smov 0  }
   0x2   :  { %8622 = sst [smem:[#allocation10_spill]] %s8599_s1  ;;  %s7578_s27 = smov 0  }
   0x3   :  { %8623 = sst [smem:[#allocation11_spill]] %s8601_s3  ;;  %s7580_s28 = smov 0  }
   0x4   :  { %8624 = sst [smem:[#allocation12_spill]] %s8602_s4 }
   0x5   :  { %8625 = sst [smem:[#allocation13_spill]] %s8603_s5 }
   0x6   :  { %8626 = sst [smem:[#allocation14_spill]] %s8604_s6 }
   0x7   :  { %8627 = sst [smem:[#allocation15_spill]] %s8605_s7 }
   0x8   :  { %8628 = sst [smem:[#allocation16_spill]] %s8606_s8 }
   0x9   :  { %8629 = sst [smem:[#allocation17_spill]] %s8607_s9 }
   0xa   :  { %8630 = sst [smem:[#allocation18_spill]] %s8609_s11 }
   0xb   :  { %8631 = sst [smem:[#allocation19_spill]] %s8610_s12 }
   0xc   :  { %8632 = sst [smem:[#allocation20_spill]] %s8611_s13 }
   0xd   :  { %8633 = sst [smem:[#allocation21_spill]] %s8612_s14 }
   0xe   :  { %8634 = sst [smem:[#allocation22_spill]] %s8613_s15 }
   0xf   :  { %8635 = sst [smem:[#allocation23_spill]] %s8614_s16 }
  0x10   :  { %8636 = sst [smem:[#allocation24_spill]] %s8615_s17 }
  0x11 LB: > { %8637 = sst [smem:[#allocation2_spill]] %s7461_s24  ;;  %s36_s29 = sadd.s32 1, %s7469_s26  ;;  %s7477_s28 = sphi %s7580_s28, %s27_s28   ;;  %s7473_s27 = sphi %s7578_s27, %s8675_s27   ;;  %s7469_s26 = sphi %s7576_s26, %s8674_s26   ;;  %s7465_s25 = sphi %s7574_s25, %s8673_s25   ;;  %s7461_s24 = sphi %s7572_s24, %s8672_s24  }
  0x12   : > { %8638 = sst [smem:[#allocation3_spill]] %s7469_s26  ;;  %s39_s0 = sadd.s32 1, %s7473_s27 }
  0x13   : > { %8639 = sst [smem:[#allocation4_spill]] %s7473_s27  ;;  %p37_p0 = scmp.ge.s32.totalorder %s36_s29, 2 }
  0x14   : > { %8640 = sst [smem:[#allocation5_spill]] %s7477_s28  ;;  %p6331_p1 = scmp.ge.s32.totalorder %s7477_s28, 1 }
  0x15   : > { %p642_p2 = scmp.lt.s32.totalorder %s7477_s28, 5  ;;  %s8677_s29 = smov (%p37_p0, %s36_s29), 0 }
  0x16   : > { %8641 = sst [smem:[#allocation6_spill]] %s8677_s29  ;;  %s8679_s0 = smov (!%p37_p0, %s39_s0), %s7473_s27 }
  0x17   : > { %p643_p3 = pnand %p6331_p1, %p642_p2  ;;  %p41_p4 = scmp.ge.s32.totalorder %s8679_s0, 2 }
  0x19   : > { %s8681_s0 = smov (%p41_p4, %s8679_s0), 0  ;;  %646 = sbr.rel (%p643_p3) target bundleno = 2352 (0x930), region = 88 }
  0x1a   : > { %8642 = sst [smem:[#allocation7_spill]] %s8681_s0 }
  0x1e   : > { %p756_p5 = scmp.lt.s32.totalorder %s7465_s25, 1  ;;  %p760_p6 = scmp.lt.s32.totalorder %s7461_s24, 1 }
  0x1f   : > { %s8643_s20 = sld [smem:[#allocation9_spill]] }
  0x20   : > { %s8683_s25 = smov (!%p756_p5, %s7465_s25), 1  ;;  %s8645_s3 = sld [smem:[#allocation11_spill]] }
  0x21   : > { %s7606_s30 = scalar_select %p760_p6, %s7461_s24, 1 }
  0x22   : > { %s6332_s18 = sshll.u32 %s8683_s25, 2  ;;  %s8646_s4 = sld [smem:[#allocation12_spill]] }
  0x23   : > { %s6487_s24 = sshll.u32 %s7606_s30, 6  ;;  %s8647_s5 = sld [smem:[#allocation13_spill]] }
  0x24   : > { %s6339_s26 = sshll.u32 %s7606_s30, 4  ;;  %s8648_s6 = sld [smem:[#allocation14_spill]] }
  0x25   : > { %s759_s21 = scalar_lea.vmem %s8643_s20, %s6332_s18  ;;  %s8650_s7 = sld [smem:[#allocation15_spill]] }
  0x26   : > { %s7623_s15 = scalar_lea.vmem %s8645_s3, %s6487_s24  ;;  %s8651_s8 = sld [smem:[#allocation16_spill]] }
  0x27   : > { %s8652_s9 = sld [smem:[#allocation17_spill]]  ;;  %s6491_s14 = sshll.u32 %s7606_s30, 7 }
  0x28   : > { %s7628_s19 = scalar_lea.vmem %s8646_s4, %s6487_s24  ;;  %s8655_s13 = sld [smem:[#allocation20_spill]] }
  0x29   : > { %s7633_s0 = scalar_lea.vmem %s8647_s5, %s6487_s24  ;;  %s6346_s3 = sshll.u32 %s7606_s30, 1 }
  0x2a   : > { %s7639_s23 = scalar_lea.vmem %s8648_s6, %s6339_s26  ;;  %s8657_s6 = sld [smem:[#allocation22_spill]] }
  0x2b   : > { %8649 = sst [smem:[#allocation8_spill]] %s7639_s23  ;;  %s7644_s28 = scalar_lea.vmem %s8650_s7, %s6339_s26 }
  0x2c   : > { %s7649_s29 = scalar_lea.vmem %s8651_s8, %s6339_s26  ;;  %s8658_s17 = sld [smem:[#allocation23_spill]] }
  0x2d   : > { %s7654_s20 = scalar_lea.vmem %s8652_s9, %s6487_s24  ;;  %s8656_s9 = sld [smem:[#allocation21_spill]] }
  0x2e   : > { %s7672_s8 = scalar_lea.vmem %s8655_s13, %s6491_s14  ;;  %s8659_s26 = sld [smem:[#allocation24_spill]] }
  0x2f   : > { %s8660_s13 = sld [smem:[#allocation2_spill]] }
  0x30   : > { %s7683_s22 = scalar_lea.vmem %s8657_s6, %s6491_s14 }
  0x32   : > { %s823_s23 = scalar_lea.vmem %s8658_s17, %s7606_s30 }
  0x33   : > { %s7678_s4 = scalar_lea.vmem %s8656_s9, %s6346_s3 }
  0x34   : > { %s7692_s25 = scalar_lea.vmem %s8659_s26, %s6332_s18 }
  0x35   : > { %p6350_p7 = scmp.ne.s32.totalorder %s8660_s13, 0 }
  0x37   : > { %832 = sbr.rel (%p6350_p7) target bundleno = 62 (0x3e), region = 92 }
  0x3c   : > { %v833_v0 = vld [vmem:[%s759_s21] sm:$0xf] }
  0x3d   : > { %834 = vst [vmem:[%s7692_s25] sm:$0xf] %v833_v0 }
  0x3e PF: > { %vm838_vm0 = vcmask 1043456   ;;  %v7479_v8 = vmov 0.0   ;;  %v868_v9 = vld [vmem:[%s7623_s15] sm:$0xf]  ;;  %v869_v10 = vld [vmem:[%s7623_s15 + $0x4] sm:$0xf]  ;;  %s8663_s27 = scalar_lea.vmem %s8600_s2, %s7606_s30 }
  0x3f   : > { %6707 = vmatprep.subr.bf16.mxu0 %v7479_v8  ;;  %6713 = vmatprep.subr.bf16.mxu1 %v7479_v8  ;;  %vm7480_vm1 = vmmov 0   ;;  %s8661_s12 = sld [smem:[#allocation10_spill]]  ;;  %v6352_v17 = vld [vmem:[%s8663_s27] ss:$0 sm:$0xff]  ;;  %v870_v21 = vld [vmem:[%s7623_s15 + $0x8] sm:$0xf] }
  0x40   : > { %6708 = vmatpush3.bf16.xpose.msra.mxu0 %v868_v9  ;;  %6714 = vmatpush3.bf16.xpose.msra.mxu1 %v869_v10  ;;  %v871_v22 = vld [vmem:[%s7623_s15 + $0xc] sm:$0xf]  ;;  %v872_v23 = vld [vmem:[%s7623_s15 + $0x10] sm:$0xf]  ;;  %v873_v24 = vld [vmem:[%s7623_s15 + $0x14] sm:$0xf] }
  0x41   : > { %6719 = vmatprep.subr.bf16.mxu0 %v7479_v8  ;;  %6725 = vmatprep.subr.bf16.mxu1 %v7479_v8  ;;  %v874_v25 = vld [vmem:[%s7623_s15 + $0x18] sm:$0xf]  ;;  %v875_v26 = vld [vmem:[%s7623_s15 + $0x1c] sm:$0xf]  ;;  %v876_v27 = vld [vmem:[%s7623_s15 + $0x20] sm:$0xf] }
  0x42   : > { %6709 = vmatprep.mubr.msk.bf16.mxu0 %vm7480_vm1, %v7479_v8  ;;  %6715 = vmatprep.mubr.msk.bf16.mxu1 %vm7480_vm1, %v7479_v8  ;;  %v877_v28 = vld [vmem:[%s7623_s15 + $0x24] sm:$0xf]  ;;  %v878_v29 = vld [vmem:[%s7623_s15 + $0x28] sm:$0xf]  ;;  %v879_v30 = vld [vmem:[%s7623_s15 + $0x2c] sm:$0xf] }
  0x43   : > { %v880_v31 = vld [vmem:[%s7623_s15 + $0x30] sm:$0xf]  ;;  %v881_v32 = vld [vmem:[%s7623_s15 + $0x34] sm:$0xf]  ;;  %v882_v33 = vld [vmem:[%s7623_s15 + $0x38] sm:$0xf] }
  0x44   : > { %v835_v1 = vld [vmem:[%s7692_s25] sm:$0xf]  ;;  %v883_v34 = vld [vmem:[%s7623_s15 + $0x3c] sm:$0xf]  ;;  %v1637_v36 = vld [vmem:[%s7628_s19 + $0x4] sm:$0xf] }
  0x45   : > { %v839_v2 = vsel %vm838_vm0, %v835_v1, 0.0  ;;  %s8662_s13 = scalar_lea.vmem %s8661_s12, %s7606_s30  ;;  %v1636_v35 = vld [vmem:[%s7628_s19] sm:$0xf]  ;;  %v1638_v37 = vld [vmem:[%s7628_s19 + $0x8] sm:$0xf]  ;;  %s8664_s15 = sld [smem:[#allocation8_spill]] }
  0x46   : > { %840 = vadd.xlane.f32.xlu0 %v839_v2  ;;  %v6351_v15 = vld [vmem:[%s8662_s13] ss:$0 sm:$0xff]  ;;  %v1639_v38 = vld [vmem:[%s7628_s19 + $0xc] sm:$0xf]  ;;  %v1640_v39 = vld [vmem:[%s7628_s19 + $0x10] sm:$0xf] }
  0x47   : > { %v1641_v40 = vld [vmem:[%s7628_s19 + $0x14] sm:$0xf]  ;;  %v1642_v41 = vld [vmem:[%s7628_s19 + $0x18] sm:$0xf]  ;;  %v1643_v42 = vld [vmem:[%s7628_s19 + $0x1c] sm:$0xf] }
  0x48   : > { %v1644_v43 = vld [vmem:[%s7628_s19 + $0x20] sm:$0xf]  ;;  %v1645_v44 = vld [vmem:[%s7628_s19 + $0x24] sm:$0xf]  ;;  %v1646_v45 = vld [vmem:[%s7628_s19 + $0x28] sm:$0xf] }
  0x49   : > { %v1647_v46 = vld [vmem:[%s7628_s19 + $0x2c] sm:$0xf]  ;;  %v1648_v47 = vld [vmem:[%s7628_s19 + $0x30] sm:$0xf]  ;;  %v1649_v48 = vld [vmem:[%s7628_s19 + $0x34] sm:$0xf] }
  0x4a   : > { %v1650_v49 = vld [vmem:[%s7628_s19 + $0x38] sm:$0xf]  ;;  %v1651_v50 = vld [vmem:[%s7628_s19 + $0x3c] sm:$0xf]  ;;  %v2404_v51 = vld [vmem:[%s7633_s0] sm:$0xf]  ;;  %s8665_s19 = scalar_lea.vmem %s8608_s10, %s7606_s30 }
  0x4b   : > { %v2405_v52 = vld [vmem:[%s7633_s0 + $0x4] sm:$0xf]  ;;  %v2406_v53 = vld [vmem:[%s7633_s0 + $0x8] sm:$0xf]  ;;  %v2407_v54 = vld [vmem:[%s7633_s0 + $0xc] sm:$0xf] }
  0x4c   : > { %v2408_v55 = vld [vmem:[%s7633_s0 + $0x10] sm:$0xf]  ;;  %v2409_v56 = vld [vmem:[%s7633_s0 + $0x14] sm:$0xf]  ;;  %v2410_v57 = vld [vmem:[%s7633_s0 + $0x18] sm:$0xf] }
  0x4d   : > { %v2411_v58 = vld [vmem:[%s7633_s0 + $0x1c] sm:$0xf]  ;;  %v2412_v59 = vld [vmem:[%s7633_s0 + $0x20] sm:$0xf]  ;;  %v2413_v60 = vld [vmem:[%s7633_s0 + $0x24] sm:$0xf] }
  0x4e   : > { %v2414_v61 = vld [vmem:[%s7633_s0 + $0x28] sm:$0xf]  ;;  %v2415_v62 = vld [vmem:[%s7633_s0 + $0x2c] sm:$0xf]  ;;  %v2416_v63 = vld [vmem:[%s7633_s0 + $0x30] sm:$0xf] }
  0x4f   : > { %v2417_v0 = vld [vmem:[%s7633_s0 + $0x34] sm:$0xf]  ;;  %v2419_v2 = vld [vmem:[%s7633_s0 + $0x3c] sm:$0xf]  ;;  %vm3204_vm2 = vcmask 64512   ;;  %vm4170_vm3 = vcmask 1041408  }
  0x50   : > { %vm3957_vm4 = vcmask 27648   ;;  %vm4166_vm5 = vcmask 31744   ;;  %s8666_s16 = sld [smem:[#allocation18_spill]] }
  0x51   : > { %s8668_s24 = sld [smem:[#allocation19_spill]] }
  0x56   : > { %s8667_s14 = scalar_lea.vmem %s8666_s16, %s7606_s30 }
  0x57   : > { %s8669_s1 = scalar_lea.vmem %s8668_s24, %s7606_s30 }
  0xcf   : > { %v841_v3 = vpop.xlane.xlu0 %840 }
  0xd0   : > { %v843_v4 = vmul.f32 0.0078125, %v841_v3 }
  0xd2   : > { %v844_v5 = vsub.f32 %v835_v1, %v843_v4  ;;  %v2418_v1 = vld [vmem:[%s7633_s0 + $0x38] sm:$0xf] }
  0xd4   : > { %v845_v6 = vmul.f32 %v844_v5, %v844_v5 }
  0xd6   : > { %v846_v7 = vsel %vm838_vm0, %v845_v6, 0.0 }
  0xd7   : > { %847 = vadd.xlane.f32.xlu0 %v846_v7 }
 0x160   : > { %v848_v11 = vpop.xlane.xlu0 %847 }
 0x161   : > { %v849_v12 = vmul.f32 0.0078125, %v848_v11 }
 0x163   : > { %v850_v13 = vadd.f32 1e-05, %v849_v12 }
 0x165   : > { %7366 = vrsqrt.f32 %v850_v13 }
 0x172   : > { %v7367_v14 = vpop.eup %7366 }
 0x173   : > { %v852_v16 = vmul.f32 %v7367_v14, %v844_v5 }
 0x175   : > { %v859_v18 = vmul.f32 %v6351_v15, %v852_v16 }
 0x177   : > { %v866_v19 = vadd.f32 %v6352_v17, %v859_v18 }
 0x179   : > { %v7719_v20 = vpack.c.bf16 %v866_v19, %v866_v19 }
 0x17b   : > { %6710 = vmatmul.mubr.bf16.vlgmr.msra.gmra.mxu0 %v7719_v20  ;;  %6716 = vmatmul.mubr.bf16.vlgmr.msra.gmra.mxu1 %v7719_v20 }
 0x17c   : > { %6720 = vmatpush3.bf16.xpose.msra.mxu0 %v870_v21  ;;  %6726 = vmatpush3.bf16.xpose.msra.mxu1 %v871_v22 }
 0x17d   : > { %6721 = vmatprep.mubr.msk.bf16.mxu0 %vm7480_vm1, %v7479_v8  ;;  %6727 = vmatprep.mubr.msk.bf16.mxu1 %vm7480_vm1, %v7479_v8 }
 0x17e   : > { %6731 = vmatprep.subr.bf16.mxu0 %v7479_v8  ;;  %6737 = vmatprep.subr.bf16.mxu1 %v7479_v8 }
 0x183   : > { %6722 = vmatmul.mubr.bf16.vlgmr.msra.gmra.mxu0 %v7719_v20  ;;  %6728 = vmatmul.mubr.bf16.vlgmr.msra.gmra.mxu1 %v7719_v20 }
 0x184   : > { %6732 = vmatpush3.bf16.xpose.msra.mxu0 %v872_v23  ;;  %6738 = vmatpush3.bf16.xpose.msra.mxu1 %v873_v24 }
 0x185   : > { %6733 = vmatprep.mubr.msk.bf16.mxu0 %vm7480_vm1, %v7479_v8  ;;  %6739 = vmatprep.mubr.msk.bf16.mxu1 %vm7480_vm1, %v7479_v8 }
 0x186   : > { %6743 = vmatprep.subr.bf16.mxu0 %v7479_v8  ;;  %6749 = vmatprep.subr.bf16.mxu1 %v7479_v8 }
 0x18b   : > { %6734 = vmatmul.mubr.bf16.vlgmr.msra.gmra.mxu0 %v7719_v20  ;;  %6740 = vmatmul.mubr.bf16.vlgmr.msra.gmra.mxu1 %v7719_v20 }
 0x18c   : > { %6744 = vmatpush3.bf16.xpose.msra.mxu0 %v874_v25  ;;  %6750 = vmatpush3.bf16.xpose.msra.mxu1 %v875_v26 }
 0x18d   : > { %6745 = vmatprep.mubr.msk.bf16.mxu0 %vm7480_vm1, %v7479_v8  ;;  %6751 = vmatprep.mubr.msk.bf16.mxu1 %vm7480_vm1, %v7479_v8 }
 0x18e   : > { %6755 = vmatprep.subr.bf16.mxu0 %v7479_v8  ;;  %6761 = vmatprep.subr.bf16.mxu1 %v7479_v8 }
 0x193   : > { %6746 = vmatmul.mubr.bf16.vlgmr.msra.gmra.mxu0 %v7719_v20  ;;  %6752 = vmatmul.mubr.bf16.vlgmr.msra.gmra.mxu1 %v7719_v20 }
 0x194   : > { %6756 = vmatpush3.bf16.xpose.msra.mxu0 %v876_v27  ;;  %6762 = vmatpush3.bf16.xpose.msra.mxu1 %v877_v28 }
 0x195   : > { %6757 = vmatprep.mubr.msk.bf16.mxu0 %vm7480_vm1, %v7479_v8  ;;  %6763 = vmatprep.mubr.msk.bf16.mxu1 %vm7480_vm1, %v7479_v8 }
 0x196   : > { %6767 = vmatprep.subr.bf16.mxu0 %v7479_v8  ;;  %6773 = vmatprep.subr.bf16.mxu1 %v7479_v8 }
 0x19b   : > { %6758 = vmatmul.mubr.bf16.vlgmr.msra.gmra.mxu0 %v7719_v20  ;;  %6764 = vmatmul.mubr.bf16.vlgmr.msra.gmra.mxu1 %v7719_v20 }
 0x19c   : > { %6768 = vmatpush3.bf16.xpose.msra.mxu0 %v878_v29  ;;  %6774 = vmatpush3.bf16.xpose.msra.mxu1 %v879_v30 }
 0x19d   : > { %6769 = vmatprep.mubr.msk.bf16.mxu0 %vm7480_vm1, %v7479_v8  ;;  %6775 = vmatprep.mubr.msk.bf16.mxu1 %vm7480_vm1, %v7479_v8 }
 0x19e   : > { %6779 = vmatprep.subr.bf16.mxu0 %v7479_v8  ;;  %6785 = vmatprep.subr.bf16.mxu1 %v7479_v8 }
 0x1a3   : > { %6770 = vmatmul.mubr.bf16.vlgmr.msra.gmra.mxu0 %v7719_v20  ;;  %6776 = vmatmul.mubr.bf16.vlgmr.msra.gmra.mxu1 %v7719_v20 }
 0x1a4   : > { %6780 = vmatpush3.bf16.xpose.msra.mxu0 %v880_v31  ;;  %6786 = vmatpush3.bf16.xpose.msra.mxu1 %v881_v32 }
 0x1a5   : > { %6781 = vmatprep.mubr.msk.bf16.mxu0 %vm7480_vm1, %v7479_v8  ;;  %6787 = vmatprep.mubr.msk.bf16.mxu1 %vm7480_vm1, %v7479_v8 }
 0x1a6   : > { %6791 = vmatprep.subr.bf16.mxu0 %v7479_v8  ;;  %6797 = vmatprep.subr.bf16.mxu1 %v7479_v8 }
 0x1ab   : > { %6782 = vmatmul.mubr.bf16.vlgmr.msra.gmra.mxu0 %v7719_v20  ;;  %6788 = vmatmul.mubr.bf16.vlgmr.msra.gmra.mxu1 %v7719_v20 }
 0x1ac   : > { %6792 = vmatpush3.bf16.xpose.msra.mxu0 %v882_v33  ;;  %6798 = vmatpush3.bf16.xpose.msra.mxu1 %v883_v34 }
 0x1ad   : > { %6793 = vmatprep.mubr.msk.bf16.mxu0 %vm7480_vm1, %v7479_v8  ;;  %6799 = vmatprep.mubr.msk.bf16.mxu1 %vm7480_vm1, %v7479_v8 }
 0x1ae   : > { %6803 = vmatprep.subr.bf16.mxu0 %v7479_v8  ;;  %6809 = vmatprep.subr.bf16.mxu1 %v7479_v8 }
 0x1b3   : > { %6794 = vmatmul.mubr.bf16.vlgmr.msra.gmra.mxu0 %v7719_v20  ;;  %6800 = vmatmul.mubr.bf16.vlgmr.msra.gmra.mxu1 %v7719_v20 }
 0x1b4   : > { %6804 = vmatpush3.bf16.xpose.msra.mxu0 %v1636_v35  ;;  %6810 = vmatpush3.bf16.xpose.msra.mxu1 %v1637_v36 }
 0x1b5   : > { %6805 = vmatprep.mubr.msk.bf16.mxu0 %vm7480_vm1, %v7479_v8  ;;  %6811 = vmatprep.mubr.msk.bf16.mxu1 %vm7480_vm1, %v7479_v8 }
 0x1b6   : > { %6815 = vmatprep.subr.bf16.mxu0 %v7479_v8  ;;  %6821 = vmatprep.subr.bf16.mxu1 %v7479_v8 }
 0x1bb   : > { %6806 = vmatmul.mubr.bf16.vlgmr.msra.gmra.mxu0 %v7719_v20  ;;  %6812 = vmatmul.mubr.bf16.vlgmr.msra.gmra.mxu1 %v7719_v20 }
 0x1bc   : > { %6816 = vmatpush3.bf16.xpose.msra.mxu0 %v1638_v37  ;;  %6822 = vmatpush3.bf16.xpose.msra.mxu1 %v1639_v38 }
 0x1bd   : > { %6817 = vmatprep.mubr.msk.bf16.mxu0 %vm7480_vm1, %v7479_v8  ;;  %6823 = vmatprep.mubr.msk.bf16.mxu1 %vm7480_vm1, %v7479_v8 }
 0x1be   : > { %6827 = vmatprep.subr.bf16.mxu0 %v7479_v8  ;;  %6833 = vmatprep.subr.bf16.mxu1 %v7479_v8 }
 0x1c3   : > { %6818 = vmatmul.mubr.bf16.vlgmr.msra.gmra.mxu0 %v7719_v20  ;;  %6824 = vmatmul.mubr.bf16.vlgmr.msra.gmra.mxu1 %v7719_v20 }
 0x1c4   : > { %6828 = vmatpush3.bf16.xpose.msra.mxu0 %v1640_v39  ;;  %6834 = vmatpush3.bf16.xpose.msra.mxu1 %v1641_v40 }
 0x1c5   : > { %6829 = vmatprep.mubr.msk.bf16.mxu0 %vm7480_vm1, %v7479_v8  ;;  %6835 = vmatprep.mubr.msk.bf16.mxu1 %vm7480_vm1, %v7479_v8 }
 0x1c6   : > { %6839 = vmatprep.subr.bf16.mxu0 %v7479_v8  ;;  %6845 = vmatprep.subr.bf16.mxu1 %v7479_v8 }
 0x1cb   : > { %6830 = vmatmul.mubr.bf16.vlgmr.msra.gmra.mxu0 %v7719_v20  ;;  %6836 = vmatmul.mubr.bf16.vlgmr.msra.gmra.mxu1 %v7719_v20 }
 0x1cc   : > { %6840 = vmatpush3.bf16.xpose.msra.mxu0 %v1642_v41  ;;  %6846 = vmatpush3.bf16.xpose.msra.mxu1 %v1643_v42 }
 0x1cd   : > { %6841 = vmatprep.mubr.msk.bf16.mxu0 %vm7480_vm1, %v7479_v8  ;;  %6847 = vmatprep.mubr.msk.bf16.mxu1 %vm7480_vm1, %v7479_v8 }
 0x1ce   : > { %6851 = vmatprep.subr.bf16.mxu0 %v7479_v8  ;;  %6857 = vmatprep.subr.bf16.mxu1 %v7479_v8 }
 0x1d3   : > { %6842 = vmatmul.mubr.bf16.vlgmr.msra.gmra.mxu0 %v7719_v20  ;;  %6848 = vmatmul.mubr.bf16.vlgmr.msra.gmra.mxu1 %v7719_v20 }
 0x1d4   : > { %6852 = vmatpush3.bf16.xpose.msra.mxu0 %v1644_v43  ;;  %6858 = vmatpush3.bf16.xpose.msra.mxu1 %v1645_v44 }
 0x1d5   : > { %6853 = vmatprep.mubr.msk.bf16.mxu0 %vm7480_vm1, %v7479_v8  ;;  %6859 = vmatprep.mubr.msk.bf16.mxu1 %vm7480_vm1, %v7479_v8 }
 0x1d6   : > { %6863 = vmatprep.subr.bf16.mxu0 %v7479_v8  ;;  %6869 = vmatprep.subr.bf16.mxu1 %v7479_v8 }
 0x1db   : > { %6854 = vmatmul.mubr.bf16.vlgmr.msra.gmra.mxu0 %v7719_v20  ;;  %6860 = vmatmul.mubr.bf16.vlgmr.msra.gmra.mxu1 %v7719_v20 }
 0x1dc   : > { %6864 = vmatpush3.bf16.xpose.msra.mxu0 %v1646_v45  ;;  %6870 = vmatpush3.bf16.xpose.msra.mxu1 %v1647_v46 }
 0x1dd   : > { %6865 = vmatprep.mubr.msk.bf16.mxu0 %vm7480_vm1, %v7479_v8  ;;  %6871 = vmatprep.mubr.msk.bf16.mxu1 %vm7480_vm1, %v7479_v8 }
 0x1de   : > { %6875 = vmatprep.subr.bf16.mxu0 %v7479_v8  ;;  %6881 = vmatprep.subr.bf16.mxu1 %v7479_v8 }
 0x1e3   : > { %6866 = vmatmul.mubr.bf16.vlgmr.msra.gmra.mxu0 %v7719_v20  ;;  %6872 = vmatmul.mubr.bf16.vlgmr.msra.gmra.mxu1 %v7719_v20 }
 0x1e4   : > { %6876 = vmatpush3.bf16.xpose.msra.mxu0 %v1648_v47  ;;  %6882 = vmatpush3.bf16.xpose.msra.mxu1 %v1649_v48 }
 0x1e5   : > { %6877 = vmatprep.mubr.msk.bf16.mxu0 %vm7480_vm1, %v7479_v8  ;;  %6883 = vmatprep.mubr.msk.bf16.mxu1 %vm7480_vm1, %v7479_v8 }
 0x1e6   : > { %6887 = vmatprep.subr.bf16.mxu0 %v7479_v8  ;;  %6893 = vmatprep.subr.bf16.mxu1 %v7479_v8 }
 0x1eb   : > { %6878 = vmatmul.mubr.bf16.vlgmr.msra.gmra.mxu0 %v7719_v20  ;;  %6884 = vmatmul.mubr.bf16.vlgmr.msra.gmra.mxu1 %v7719_v20 }
 0x1ec   : > { %6888 = vmatpush3.bf16.xpose.msra.mxu0 %v1650_v49  ;;  %6894 = vmatpush3.bf16.xpose.msra.mxu1 %v1651_v50 }
 0x1ed   : > { %6889 = vmatprep.mubr.msk.bf16.mxu0 %vm7480_vm1, %v7479_v8  ;;  %6895 = vmatprep.mubr.msk.bf16.mxu1 %vm7480_vm1, %v7479_v8 }
 0x1ee   : > { %6899 = vmatprep.subr.bf16.mxu0 %v7479_v8  ;;  %6905 = vmatprep.subr.bf16.mxu1 %v7479_v8 }
 0x1f3   : > { %6890 = vmatmul.mubr.bf16.vlgmr.msra.gmra.mxu0 %v7719_v20  ;;  %6896 = vmatmul.mubr.bf16.vlgmr.msra.gmra.mxu1 %v7719_v20 }
 0x1f4   : > { %6900 = vmatpush3.bf16.xpose.msra.mxu0 %v2404_v51  ;;  %6906 = vmatpush3.bf16.xpose.msra.mxu1 %v2405_v52 }
 0x1f5   : > { %6901 = vmatprep.mubr.msk.bf16.mxu0 %vm7480_vm1, %v7479_v8  ;;  %6907 = vmatprep.mubr.msk.bf16.mxu1 %vm7480_vm1, %v7479_v8 }
 0x1f6   : > { %6911 = vmatprep.subr.bf16.mxu0 %v7479_v8  ;;  %6917 = vmatprep.subr.bf16.mxu1 %v7479_v8 }
 0x1fb   : > { %6902 = vmatmul.mubr.bf16.vlgmr.msra.gmra.mxu0 %v7719_v20  ;;  %6908 = vmatmul.mubr.bf16.vlgmr.msra.gmra.mxu1 %v7719_v20 }
 0x1fc   : > { %6912 = vmatpush3.bf16.xpose.msra.mxu0 %v2406_v53  ;;  %6918 = vmatpush3.bf16.xpose.msra.mxu1 %v2407_v54 }
 0x1fd   : > { %6913 = vmatprep.mubr.msk.bf16.mxu0 %vm7480_vm1, %v7479_v8  ;;  %6919 = vmatprep.mubr.msk.bf16.mxu1 %vm7480_vm1, %v7479_v8 }
 0x1fe   : > { %6923 = vmatprep.subr.bf16.mxu0 %v7479_v8  ;;  %6929 = vmatprep.subr.bf16.mxu1 %v7479_v8 }
 0x203   : > { %6914 = vmatmul.mubr.bf16.vlgmr.msra.gmra.mxu0 %v7719_v20  ;;  %6920 = vmatmul.mubr.bf16.vlgmr.msra.gmra.mxu1 %v7719_v20 }
 0x204   : > { %6924 = vmatpush3.bf16.xpose.msra.mxu0 %v2408_v55  ;;  %6930 = vmatpush3.bf16.xpose.msra.mxu1 %v2409_v56 }
 0x205   : > { %6925 = vmatprep.mubr.msk.bf16.mxu0 %vm7480_vm1, %v7479_v8  ;;  %6931 = vmatprep.mubr.msk.bf16.mxu1 %vm7480_vm1, %v7479_v8 }
 0x206   : > { %6935 = vmatprep.subr.bf16.mxu0 %v7479_v8  ;;  %6941 = vmatprep.subr.bf16.mxu1 %v7479_v8 }
 0x20b   : > { %6926 = vmatmul.mubr.bf16.vlgmr.msra.gmra.mxu0 %v7719_v20  ;;  %6932 = vmatmul.mubr.bf16.vlgmr.msra.gmra.mxu1 %v7719_v20 }
 0x20c   : > { %6936 = vmatpush3.bf16.xpose.msra.mxu0 %v2410_v57  ;;  %6942 = vmatpush3.bf16.xpose.msra.mxu1 %v2411_v58 }
 0x20d   : > { %6937 = vmatprep.mubr.msk.bf16.mxu0 %vm7480_vm1, %v7479_v8  ;;  %6943 = vmatprep.mubr.msk.bf16.mxu1 %vm7480_vm1, %v7479_v8 }
 0x20e   : > { %6947 = vmatprep.subr.bf16.mxu0 %v7479_v8  ;;  %6953 = vmatprep.subr.bf16.mxu1 %v7479_v8 }
 0x213   : > { %6938 = vmatmul.mubr.bf16.vlgmr.msra.gmra.mxu0 %v7719_v20  ;;  %6944 = vmatmul.mubr.bf16.vlgmr.msra.gmra.mxu1 %v7719_v20 }
 0x214   : > { %6948 = vmatpush3.bf16.xpose.msra.mxu0 %v2412_v59  ;;  %6954 = vmatpush3.bf16.xpose.msra.mxu1 %v2413_v60 }
 0x215   : > { %6949 = vmatprep.mubr.msk.bf16.mxu0 %vm7480_vm1, %v7479_v8  ;;  %6955 = vmatprep.mubr.msk.bf16.mxu1 %vm7480_vm1, %v7479_v8 }
 0x216   : > { %6959 = vmatprep.subr.bf16.mxu0 %v7479_v8  ;;  %6965 = vmatprep.subr.bf16.mxu1 %v7479_v8 }
 0x21b   : > { %6950 = vmatmul.mubr.bf16.vlgmr.msra.gmra.mxu0 %v7719_v20  ;;  %6956 = vmatmul.mubr.bf16.vlgmr.msra.gmra.mxu1 %v7719_v20 }
 0x21c   : > { %6960 = vmatpush3.bf16.xpose.msra.mxu0 %v2414_v61  ;;  %6966 = vmatpush3.bf16.xpose.msra.mxu1 %v2415_v62 }
 0x21d   : > { %6961 = vmatprep.mubr.msk.bf16.mxu0 %vm7480_vm1, %v7479_v8  ;;  %6967 = vmatprep.mubr.msk.bf16.mxu1 %vm7480_vm1, %v7479_v8 }
 0x21e   : > { %6971 = vmatprep.subr.bf16.mxu0 %v7479_v8  ;;  %6977 = vmatprep.subr.bf16.mxu1 %v7479_v8 }
 0x223   : > { %6962 = vmatmul.mubr.bf16.vlgmr.msra.gmra.mxu0 %v7719_v20  ;;  %6968 = vmatmul.mubr.bf16.vlgmr.msra.gmra.mxu1 %v7719_v20 }
 0x224   : > { %6972 = vmatpush3.bf16.xpose.msra.mxu0 %v2416_v63  ;;  %6978 = vmatpush3.bf16.xpose.msra.mxu1 %v2417_v0 }
 0x225   : > { %6973 = vmatprep.mubr.msk.bf16.mxu0 %vm7480_vm1, %v7479_v8  ;;  %6979 = vmatprep.mubr.msk.bf16.mxu1 %vm7480_vm1, %v7479_v8 }
 0x226   : > { %6983 = vmatprep.subr.bf16.mxu0 %v7479_v8  ;;  %6989 = vmatprep.subr.bf16.mxu1 %v7479_v8 }
 0x22b   : > { %6974 = vmatmul.mubr.bf16.vlgmr.msra.gmra.mxu0 %v7719_v20  ;;  %6980 = vmatmul.mubr.bf16.vlgmr.msra.gmra.mxu1 %v7719_v20 }
 0x22c   : > { %6984 = vmatpush3.bf16.xpose.msra.mxu0 %v2418_v1  ;;  %6990 = vmatpush3.bf16.xpose.msra.mxu1 %v2419_v2 }
 0x22d   : > { %6985 = vmatprep.mubr.msk.bf16.mxu0 %vm7480_vm1, %v7479_v8  ;;  %6991 = vmatprep.mubr.msk.bf16.mxu1 %vm7480_vm1, %v7479_v8 }
 0x22e   : > { %6995 = vmatprep.subr.bf16.mxu0 %v7479_v8  ;;  %7001 = vmatprep.subr.bf16.mxu1 %v7479_v8 }
 0x233   : > { %6986 = vmatmul.mubr.bf16.vlgmr.msra.gmra.mxu0 %v7719_v20  ;;  %6992 = vmatmul.mubr.bf16.vlgmr.msra.gmra.mxu1 %v7719_v20 }
 0x234   : > { %6997 = vmatprep.mubr.msk.bf16.mxu0 %vm7480_vm1, %v7479_v8  ;;  %7003 = vmatprep.mubr.msk.bf16.mxu1 %vm7480_vm1, %v7479_v8 }
 0x23b   : > { %v7957_v3 = vpop.f32.mrf.mxu0  ;;  %v7959_v4 = vpop.f32.mrf.mxu1 }
 0x23d   : > { %v6711_v5 = vpop.f32.mrf.mxu0  ;;  %v6717_v6 = vpop.f32.mrf.mxu1 }
 0x23e   : > { %v6369_v6 = vld [vmem:[%s7644_s28] ss:$0 sm:$0xff] }
 0x23f   : > { %v1033_v7 = vpop.f32.mrf.mxu0  ;;  %v1073_v9 = vpop.f32.mrf.mxu1 }
 0x240   : > { %v6370_v7 = vld [vmem:[%s7644_s28 + $0x1] ss:$0 sm:$0xff] }
 0x241   : > { %v6712_v10 = vpop.f32.mrf.mxu0  ;;  %v6718_v11 = vpop.f32.mrf.mxu1 }
 0x243   : > { %v7961_v12 = vpop.f32.mrf.mxu0  ;;  %v7963_v13 = vpop.f32.mrf.mxu1 }
 0x245   : > { %v6723_v14 = vpop.f32.mrf.mxu0  ;;  %v6729_v15 = vpop.f32.mrf.mxu1 }
 0x247   : > { %v1113_v16 = vpop.f32.mrf.mxu0  ;;  %v1153_v17 = vpop.f32.mrf.mxu1 }
 0x249   : > { %v6724_v18 = vpop.f32.mrf.mxu0  ;;  %v6730_v19 = vpop.f32.mrf.mxu1 }
 0x24a   : > { %v6353_v19 = vld [vmem:[%s8664_s15] ss:$0 sm:$0xff] }
 0x24b   : > { %v7965_v20 = vpop.f32.mrf.mxu0  ;;  %v7967_v21 = vpop.f32.mrf.mxu1 }
 0x24d   : > { %v6735_v22 = vpop.f32.mrf.mxu0  ;;  %v6741_v23 = vpop.f32.mrf.mxu1 }
 0x24e   : > { %v6354_v22 = vld [vmem:[%s8664_s15 + $0x1] ss:$0 sm:$0xff] }
 0x24f   : > { %v1193_v24 = vpop.f32.mrf.mxu0  ;;  %v1233_v25 = vpop.f32.mrf.mxu1 }
 0x251   : > { %v6736_v26 = vpop.f32.mrf.mxu0  ;;  %v6742_v27 = vpop.f32.mrf.mxu1 }
 0x253   : > { %v7969_v28 = vpop.f32.mrf.mxu0  ;;  %v7971_v29 = vpop.f32.mrf.mxu1 }
 0x255   : > { %v6747_v30 = vpop.f32.mrf.mxu0  ;;  %v6753_v31 = vpop.f32.mrf.mxu1 }
 0x256   : > { %v6371_v31 = vld [vmem:[%s7644_s28 + $0x2] ss:$0 sm:$0xff] }
 0x257   : > { %v1273_v32 = vpop.f32.mrf.mxu0  ;;  %v1313_v33 = vpop.f32.mrf.mxu1 }
 0x258   : > { %v6372_v32 = vld [vmem:[%s7644_s28 + $0x3] ss:$0 sm:$0xff]  ;;  %v1031_v33 = vadd.f32 %v6353_v19, %v7957_v3 }
 0x259   : > { %v6748_v34 = vpop.f32.mrf.mxu0  ;;  %v6754_v35 = vpop.f32.mrf.mxu1  ;;  %v6356_v3 = vld [vmem:[%s8664_s15 + $0x3] ss:$0 sm:$0xff] }
 0x25a   : > { %v1071_v34 = vadd.f32 %v6354_v22, %v7959_v4  ;;  %v6375_v22 = vld [vmem:[%s7644_s28 + $0x6] ss:$0 sm:$0xff] }
 0x25b   : > { %v7973_v36 = vpop.f32.mrf.mxu0  ;;  %v7975_v37 = vpop.f32.mrf.mxu1 }
 0x25d   : > { %v6759_v38 = vpop.f32.mrf.mxu0  ;;  %v6765_v39 = vpop.f32.mrf.mxu1 }
 0x25f   : > { %v1353_v40 = vpop.f32.mrf.mxu0  ;;  %v1393_v41 = vpop.f32.mrf.mxu1 }
 0x261   : > { %v6760_v42 = vpop.f32.mrf.mxu0  ;;  %v6766_v43 = vpop.f32.mrf.mxu1 }
 0x262   : > { %v3172_v43 = vpack.c.bf16 %v1031_v33, %v1031_v33 }
 0x263   : > { %v7977_v44 = vpop.f32.mrf.mxu0  ;;  %v7979_v45 = vpop.f32.mrf.mxu1 }
 0x265   : > { %v6771_v46 = vpop.f32.mrf.mxu0  ;;  %v6777_v47 = vpop.f32.mrf.mxu1 }
 0x266   : > { %v3173_v46 = vpack.c.bf16 %v1071_v34, %v1071_v34 }
 0x267   : > { %v1433_v48 = vpop.f32.mrf.mxu0  ;;  %v1473_v49 = vpop.f32.mrf.mxu1 }
 0x268   : > { %v6355_v49 = vld [vmem:[%s8664_s15 + $0x2] ss:$0 sm:$0xff] }
 0x269   : > { %v6772_v50 = vpop.f32.mrf.mxu0  ;;  %v6778_v51 = vpop.f32.mrf.mxu1 }
 0x26b   : > { %v7981_v52 = vpop.f32.mrf.mxu0  ;;  %v7983_v53 = vpop.f32.mrf.mxu1 }
 0x26d   : > { %v6783_v54 = vpop.f32.mrf.mxu0  ;;  %v6789_v55 = vpop.f32.mrf.mxu1 }
 0x26f   : > { %v1513_v56 = vpop.f32.mrf.mxu0  ;;  %v1553_v57 = vpop.f32.mrf.mxu1 }
 0x270   : > { %v6373_v57 = vld [vmem:[%s7644_s28 + $0x4] ss:$0 sm:$0xff] }
 0x271   : > { %v6784_v58 = vpop.f32.mrf.mxu0  ;;  %v6790_v59 = vpop.f32.mrf.mxu1 }
 0x272   : > { %v6374_v58 = vld [vmem:[%s7644_s28 + $0x5] ss:$0 sm:$0xff]  ;;  %v1111_v59 = vadd.f32 %v6355_v49, %v7961_v12  ;;  %v6378_v49 = vld [vmem:[%s7644_s28 + $0x9] ss:$0 sm:$0xff] }
 0x273   : > { %v7985_v60 = vpop.f32.mrf.mxu0  ;;  %v7987_v61 = vpop.f32.mrf.mxu1 }
 0x275   : > { %v6795_v62 = vpop.f32.mrf.mxu0  ;;  %v6801_v63 = vpop.f32.mrf.mxu1 }
 0x276   : > { %v1151_v62 = vadd.f32 %v6356_v3, %v7963_v13 }
 0x277   : > { %v1593_v0 = vpop.f32.mrf.mxu0  ;;  %v1633_v1 = vpop.f32.mrf.mxu1 }
 0x278   : > { %v3175_v13 = vpack.c.bf16 %v1151_v62, %v1151_v62  ;;  %v6361_v62 = vld [vmem:[%s8664_s15 + $0x8] ss:$0 sm:$0xff] }
 0x279   : > { %v6796_v2 = vpop.f32.mrf.mxu0  ;;  %v6802_v5 = vpop.f32.mrf.mxu1 }
 0x27b   : > { %v1798_v9 = vpop.f32.mrf.mxu0  ;;  %v1838_v10 = vpop.f32.mrf.mxu1 }
 0x27c   : > { %v1799_v11 = vadd.f32 %v6369_v6, %v1798_v9  ;;  %v1839_v14 = vadd.f32 %v6370_v7, %v1838_v10  ;;  %v3174_v6 = vpack.c.bf16 %v1111_v59, %v1111_v59  ;;  %v6357_v10 = vld [vmem:[%s8664_s15 + $0x4] ss:$0 sm:$0xff] }
 0x27d   : > { %v6807_v15 = vpop.f32.mrf.mxu0  ;;  %v6813_v16 = vpop.f32.mrf.mxu1 }
 0x27e   : > { %v3188_v17 = vpack.c.bf16 %v1799_v11, %v1799_v11  ;;  %v3189_v18 = vpack.c.bf16 %v1839_v14, %v1839_v14  ;;  %v6358_v11 = vld [vmem:[%s8664_s15 + $0x5] ss:$0 sm:$0xff] }
 0x27f   : > { %v1801_v23 = vpop.f32.mrf.mxu0  ;;  %v1841_v24 = vpop.f32.mrf.mxu1 }
 0x280   : > { %v3209_v25 = vsel %vm3204_vm2, %v3188_v17, 0  ;;  %v3255_v26 = vsel %vm3204_vm2, %v3189_v18, 0  ;;  %v6376_v23 = vld [vmem:[%s7644_s28 + $0x7] ss:$0 sm:$0xff]  ;;  %v1191_v24 = vadd.f32 %v6357_v10, %v7965_v20 }
 0x281   : > { %v6808_v27 = vpop.f32.mrf.mxu0  ;;  %v6814_v30 = vpop.f32.mrf.mxu1  ;;  %6996 = vmatpush3.bf16.xpose.msra.mxu0 %v3209_v25  ;;  %7002 = vmatpush3.bf16.xpose.msra.mxu1 %v3255_v26  ;;  %v1231_v25 = vadd.f32 %v6358_v11, %v7967_v21 }
 0x282   : > { %7007 = vmatprep.subr.bf16.mxu0 %v7479_v8  ;;  %7013 = vmatprep.subr.bf16.mxu1 %v7479_v8  ;;  %v3176_v33 = vpack.c.bf16 %v1191_v24, %v1191_v24  ;;  %v6364_v24 = vld [vmem:[%s8664_s15 + $0xb] ss:$0 sm:$0xff] }
 0x283   : > { %v1878_v35 = vpop.f32.mrf.mxu0  ;;  %v1918_v38 = vpop.f32.mrf.mxu1  ;;  %v3177_v21 = vpack.c.bf16 %v1231_v25, %v1231_v25 }
 0x284   : > { %v1879_v39 = vadd.f32 %v6371_v31, %v1878_v35  ;;  %v1919_v40 = vadd.f32 %v6372_v32, %v1918_v38  ;;  %v6359_v38 = vld [vmem:[%s8664_s15 + $0x6] ss:$0 sm:$0xff] }
 0x285   : > { %v6819_v41 = vpop.f32.mrf.mxu0  ;;  %v6825_v42 = vpop.f32.mrf.mxu1  ;;  %v1271_v3 = vadd.f32 %v6359_v38, %v7969_v28 }
 0x286   : > { %v3190_v47 = vpack.c.bf16 %v1879_v39, %v1879_v39  ;;  %v3191_v48 = vpack.c.bf16 %v1919_v40, %v1919_v40  ;;  %v6360_v39 = vld [vmem:[%s8664_s15 + $0x7] ss:$0 sm:$0xff] }
 0x287   : > { %v1881_v50 = vpop.f32.mrf.mxu0  ;;  %v1921_v4 = vpop.f32.mrf.mxu1 }
 0x288   : > { %v3301_v51 = vsel %vm3204_vm2, %v3190_v47, 0  ;;  %v3347_v54 = vsel %vm3204_vm2, %v3191_v48, 0  ;;  %6998 = vmatmul.mubr.msk.bf16.vlgmr.msra.gmra.mxu0 %vm3204_vm2, %v3172_v43  ;;  %7004 = vmatmul.mubr.msk.bf16.vlgmr.msra.gmra.mxu1 %vm3204_vm2, %v3173_v46  ;;  %v6377_v48 = vld [vmem:[%s7644_s28 + $0x8] ss:$0 sm:$0xff]  ;;  %v1311_v50 = vadd.f32 %v6360_v39, %v7971_v29 }
 0x289   : > { %v6820_v55 = vpop.f32.mrf.mxu0  ;;  %v6826_v56 = vpop.f32.mrf.mxu1  ;;  %7008 = vmatpush3.bf16.xpose.msra.mxu0 %v3301_v51  ;;  %7014 = vmatpush3.bf16.xpose.msra.mxu1 %v3347_v54 }
 0x28a   : > { %7009 = vmatprep.mubr.msk.bf16.mxu0 %vm7480_vm1, %v7479_v8  ;;  %7015 = vmatprep.mubr.msk.bf16.mxu1 %vm7480_vm1, %v7479_v8  ;;  %v3179_v29 = vpack.c.bf16 %v1311_v50, %v1311_v50 }
 0x28b   : > { %v1958_v63 = vpop.f32.mrf.mxu0  ;;  %v1998_v0 = vpop.f32.mrf.mxu1  ;;  %7019 = vmatprep.subr.bf16.mxu0 %v7479_v8  ;;  %7025 = vmatprep.subr.bf16.mxu1 %v7479_v8 }
 0x28c   : > { %v1959_v1 = vadd.f32 %v6373_v57, %v1958_v63  ;;  %v1999_v2 = vadd.f32 %v6374_v58, %v1998_v0  ;;  %v3178_v57 = vpack.c.bf16 %v1271_v3, %v1271_v3  ;;  %v6362_v63 = vld [vmem:[%s8664_s15 + $0x9] ss:$0 sm:$0xff] }
 0x28d   : > { %v6831_v5 = vpop.f32.mrf.mxu0  ;;  %v6837_v12 = vpop.f32.mrf.mxu1  ;;  %v1391_v10 = vadd.f32 %v6362_v63, %v7975_v37 }
 0x28e   : > { %v3192_v7 = vpack.c.bf16 %v1959_v1, %v1959_v1  ;;  %v3193_v9 = vpack.c.bf16 %v1999_v2, %v1999_v2 }
 0x28f   : > { %v1961_v14 = vpop.f32.mrf.mxu0  ;;  %v2001_v15 = vpop.f32.mrf.mxu1  ;;  %v3181_v37 = vpack.c.bf16 %v1391_v10, %v1391_v10 }
 0x290   : > { %v3393_v16 = vsel %vm3204_vm2, %v3192_v7, 0  ;;  %v3439_v17 = vsel %vm3204_vm2, %v3193_v9, 0  ;;  %7010 = vmatmul.mubr.msk.bf16.vlgmr.msra.gmra.mxu0 %vm3204_vm2, %v3174_v6  ;;  %7016 = vmatmul.mubr.msk.bf16.vlgmr.msra.gmra.mxu1 %vm3204_vm2, %v3175_v13  ;;  %v6379_v13 = vld [vmem:[%s7644_s28 + $0xa] ss:$0 sm:$0xff]  ;;  %v6380_v7 = vld [vmem:[%s7644_s28 + $0xb] ss:$0 sm:$0xff]  ;;  %v1351_v9 = vadd.f32 %v6361_v62, %v7973_v36 }
 0x291   : > { %v6832_v18 = vpop.f32.mrf.mxu0  ;;  %v6838_v19 = vpop.f32.mrf.mxu1  ;;  %7020 = vmatpush3.bf16.xpose.msra.mxu0 %v3393_v16  ;;  %7026 = vmatpush3.bf16.xpose.msra.mxu1 %v3439_v17 }
 0x292   : > { %7021 = vmatprep.mubr.msk.bf16.mxu0 %vm7480_vm1, %v7479_v8  ;;  %7027 = vmatprep.mubr.msk.bf16.mxu1 %vm7480_vm1, %v7479_v8  ;;  %v3180_v18 = vpack.c.bf16 %v1351_v9, %v1351_v9 }
 0x293   : > { %v2038_v26 = vpop.f32.mrf.mxu0  ;;  %v2078_v27 = vpop.f32.mrf.mxu1  ;;  %7031 = vmatprep.subr.bf16.mxu0 %v7479_v8  ;;  %7037 = vmatprep.subr.bf16.mxu1 %v7479_v8 }
 0x294   : > { %v2039_v30 = vadd.f32 %v6375_v22, %v2038_v26  ;;  %v2079_v31 = vadd.f32 %v6376_v23, %v2078_v27  ;;  %v6363_v23 = vld [vmem:[%s8664_s15 + $0xa] ss:$0 sm:$0xff] }
 0x295   : > { %v6843_v32 = vpop.f32.mrf.mxu0  ;;  %v6849_v20 = vpop.f32.mrf.mxu1 }
 0x296   : > { %v3194_v34 = vpack.c.bf16 %v2039_v30, %v2039_v30  ;;  %v3195_v35 = vpack.c.bf16 %v2079_v31, %v2079_v31  ;;  %v6381_v20 = vld [vmem:[%s7644_s28 + $0xc] ss:$0 sm:$0xff] }
 0x297   : > { %v2041_v40 = vpop.f32.mrf.mxu0  ;;  %v2081_v41 = vpop.f32.mrf.mxu1 }
 0x298   : > { %v3485_v42 = vsel %vm3204_vm2, %v3194_v34, 0  ;;  %v3531_v43 = vsel %vm3204_vm2, %v3195_v35, 0  ;;  %7022 = vmatmul.mubr.msk.bf16.vlgmr.msra.gmra.mxu0 %vm3204_vm2, %v3176_v33  ;;  %7028 = vmatmul.mubr.msk.bf16.vlgmr.msra.gmra.mxu1 %vm3204_vm2, %v3177_v21  ;;  %v6382_v33 = vld [vmem:[%s7644_s28 + $0xd] ss:$0 sm:$0xff]  ;;  %v1431_v21 = vadd.f32 %v6363_v23, %v7977_v44  ;;  %v1471_v34 = vadd.f32 %v6364_v24, %v7979_v45 }
 0x299   : > { %v6844_v46 = vpop.f32.mrf.mxu0  ;;  %v6850_v47 = vpop.f32.mrf.mxu1  ;;  %7032 = vmatpush3.bf16.xpose.msra.mxu0 %v3485_v42  ;;  %7038 = vmatpush3.bf16.xpose.msra.mxu1 %v3531_v43 }
 0x29a   : > { %7033 = vmatprep.mubr.msk.bf16.mxu0 %vm7480_vm1, %v7479_v8  ;;  %7039 = vmatprep.mubr.msk.bf16.mxu1 %vm7480_vm1, %v7479_v8  ;;  %v3182_v42 = vpack.c.bf16 %v1431_v21, %v1431_v21  ;;  %v3183_v45 = vpack.c.bf16 %v1471_v34, %v1471_v34  ;;  %v6365_v47 = vld [vmem:[%s8664_s15 + $0xc] ss:$0 sm:$0xff]  ;;  %v6388_v21 = vld [vmem:[%s7649_s29 + $0x3] ss:$0 sm:$0xff] }
 0x29b   : > { %v2118_v4 = vpop.f32.mrf.mxu0  ;;  %v2158_v51 = vpop.f32.mrf.mxu1  ;;  %7043 = vmatprep.subr.bf16.mxu0 %v7479_v8  ;;  %7049 = vmatprep.subr.bf16.mxu1 %v7479_v8 }
 0x29c   : > { %v2119_v54 = vadd.f32 %v6377_v48, %v2118_v4  ;;  %v2159_v55 = vadd.f32 %v6378_v49, %v2158_v51  ;;  %v6366_v48 = vld [vmem:[%s8664_s15 + $0xd] ss:$0 sm:$0xff] }
 0x29d   : > { %v6855_v56 = vpop.f32.mrf.mxu0  ;;  %v6861_v28 = vpop.f32.mrf.mxu1 }
 0x29e   : > { %v3196_v58 = vpack.c.bf16 %v2119_v54, %v2119_v54  ;;  %v3197_v59 = vpack.c.bf16 %v2159_v55, %v2159_v55  ;;  %v6383_v55 = vld [vmem:[%s7644_s28 + $0xe] ss:$0 sm:$0xff]  ;;  %v6384_v56 = vld [vmem:[%s7644_s28 + $0xf] ss:$0 sm:$0xff]  ;;  %v1511_v28 = vadd.f32 %v6365_v47, %v7981_v52 }
 0x29f   : > { %v2121_v0 = vpop.f32.mrf.mxu0  ;;  %v2161_v1 = vpop.f32.mrf.mxu1 }
 0x2a0   : > { %v3577_v2 = vsel %vm3204_vm2, %v3196_v58, 0  ;;  %v3623_v5 = vsel %vm3204_vm2, %v3197_v59, 0  ;;  %7034 = vmatmul.mubr.msk.bf16.vlgmr.msra.gmra.mxu0 %vm3204_vm2, %v3178_v57  ;;  %7040 = vmatmul.mubr.msk.bf16.vlgmr.msra.gmra.mxu1 %vm3204_vm2, %v3179_v29  ;;  %v1551_v57 = vadd.f32 %v6366_v48, %v7983_v53  ;;  %v3184_v0 = vpack.c.bf16 %v1511_v28, %v1511_v28 }
 0x2a1   : > { %v6856_v12 = vpop.f32.mrf.mxu0  ;;  %v6862_v6 = vpop.f32.mrf.mxu1  ;;  %7044 = vmatpush3.bf16.xpose.msra.mxu0 %v3577_v2  ;;  %7050 = vmatpush3.bf16.xpose.msra.mxu1 %v3623_v5  ;;  %v6367_v5 = vld [vmem:[%s8664_s15 + $0xe] ss:$0 sm:$0xff] }
 0x2a2   : > { %7045 = vmatprep.mubr.msk.bf16.mxu0 %vm7480_vm1, %v7479_v8  ;;  %7051 = vmatprep.mubr.msk.bf16.mxu1 %vm7480_vm1, %v7479_v8  ;;  %v3185_v53 = vpack.c.bf16 %v1551_v57, %v1551_v57  ;;  %v6368_v12 = vld [vmem:[%s8664_s15 + $0xf] ss:$0 sm:$0xff] }
 0x2a3   : > { %v2198_v11 = vpop.f32.mrf.mxu0  ;;  %v2238_v14 = vpop.f32.mrf.mxu1  ;;  %7055 = vmatprep.subr.bf16.mxu0 %v7479_v8  ;;  %7061 = vmatprep.subr.bf16.mxu1 %v7479_v8 }
 0x2a4   : > { %v2199_v15 = vadd.f32 %v6379_v13, %v2198_v11  ;;  %v2239_v16 = vadd.f32 %v6380_v7, %v2238_v14  ;;  %v6385_v14 = vld [vmem:[%s7649_s29] ss:$0 sm:$0xff] }
 0x2a5   : > { %v6867_v17 = vpop.f32.mrf.mxu0  ;;  %v6873_v36 = vpop.f32.mrf.mxu1 }
 0x2a6   : > { %v3198_v19 = vpack.c.bf16 %v2199_v15, %v2199_v15  ;;  %v3199_v22 = vpack.c.bf16 %v2239_v16, %v2239_v16  ;;  %v6386_v15 = vld [vmem:[%s7649_s29 + $0x1] ss:$0 sm:$0xff]  ;;  %v1591_v16 = vadd.f32 %v6367_v5, %v7985_v60  ;;  %v1631_v17 = vadd.f32 %v6368_v12, %v7987_v61 }
 0x2a7   : > { %v2201_v25 = vpop.f32.mrf.mxu0  ;;  %v2241_v26 = vpop.f32.mrf.mxu1 }
 0x2a8   : > { %v3669_v27 = vsel %vm3204_vm2, %v3198_v19, 0  ;;  %v3715_v30 = vsel %vm3204_vm2, %v3199_v22, 0  ;;  %7046 = vmatmul.mubr.msk.bf16.vlgmr.msra.gmra.mxu0 %vm3204_vm2, %v3180_v18  ;;  %7052 = vmatmul.mubr.msk.bf16.vlgmr.msra.gmra.mxu1 %vm3204_vm2, %v3181_v37  ;;  %v3186_v61 = vpack.c.bf16 %v1591_v16, %v1591_v16  ;;  %v3187_v23 = vpack.c.bf16 %v1631_v17, %v1631_v17 }
 0x2a9   : > { %v6868_v31 = vpop.f32.mrf.mxu0  ;;  %v6874_v32 = vpop.f32.mrf.mxu1  ;;  %7056 = vmatpush3.bf16.xpose.msra.mxu0 %v3669_v27  ;;  %7062 = vmatpush3.bf16.xpose.msra.mxu1 %v3715_v30 }
 0x2aa   : > { %7057 = vmatprep.mubr.msk.bf16.mxu0 %vm7480_vm1, %v7479_v8  ;;  %7063 = vmatprep.mubr.msk.bf16.mxu1 %vm7480_vm1, %v7479_v8 }
 0x2ab   : > { %v2278_v35 = vpop.f32.mrf.mxu0  ;;  %v2318_v38 = vpop.f32.mrf.mxu1  ;;  %7067 = vmatprep.subr.bf16.mxu0 %v7479_v8  ;;  %7073 = vmatprep.subr.bf16.mxu1 %v7479_v8 }
 0x2ac   : > { %v2279_v39 = vadd.f32 %v6381_v20, %v2278_v35  ;;  %v2319_v40 = vadd.f32 %v6382_v33, %v2318_v38  ;;  %v6387_v33 = vld [vmem:[%s7649_s29 + $0x2] ss:$0 sm:$0xff] }
 0x2ad   : > { %v6879_v41 = vpop.f32.mrf.mxu0  ;;  %v6885_v44 = vpop.f32.mrf.mxu1 }
 0x2ae   : > { %v3200_v43 = vpack.c.bf16 %v2279_v39, %v2279_v39  ;;  %v3201_v46 = vpack.c.bf16 %v2319_v40, %v2319_v40 }
 0x2af   : > { %v2281_v49 = vpop.f32.mrf.mxu0  ;;  %v2321_v3 = vpop.f32.mrf.mxu1 }
 0x2b0   : > { %v3761_v50 = vsel %vm3204_vm2, %v3200_v43, 0  ;;  %v3807_v4 = vsel %vm3204_vm2, %v3201_v46, 0  ;;  %7058 = vmatmul.mubr.msk.bf16.vlgmr.msra.gmra.mxu0 %vm3204_vm2, %v3182_v42  ;;  %7064 = vmatmul.mubr.msk.bf16.vlgmr.msra.gmra.mxu1 %vm3204_vm2, %v3183_v45  ;;  %v6389_v3 = vld [vmem:[%s7649_s29 + $0x4] ss:$0 sm:$0xff] }
 0x2b1   : > { %v6880_v51 = vpop.f32.mrf.mxu0  ;;  %v6886_v54 = vpop.f32.mrf.mxu1  ;;  %7068 = vmatpush3.bf16.xpose.msra.mxu0 %v3761_v50  ;;  %7074 = vmatpush3.bf16.xpose.msra.mxu1 %v3807_v4  ;;  %v6390_v50 = vld [vmem:[%s7649_s29 + $0x5] ss:$0 sm:$0xff] }
 0x2b2   : > { %7069 = vmatprep.mubr.msk.bf16.mxu0 %vm7480_vm1, %v7479_v8  ;;  %7075 = vmatprep.mubr.msk.bf16.mxu1 %vm7480_vm1, %v7479_v8 }
 0x2b3   : > { %v2358_v29 = vpop.f32.mrf.mxu0  ;;  %v2398_v58 = vpop.f32.mrf.mxu1  ;;  %7079 = vmatprep.subr.bf16.mxu0 %v7479_v8  ;;  %7085 = vmatprep.subr.bf16.mxu1 %v7479_v8 }
 0x2b4   : > { %v2359_v59 = vadd.f32 %v6383_v55, %v2358_v29  ;;  %v2399_v62 = vadd.f32 %v6384_v56, %v2398_v58 }
 0x2b5   : > { %v6891_v63 = vpop.f32.mrf.mxu0  ;;  %v6897_v52 = vpop.f32.mrf.mxu1 }
 0x2b6   : > { %v3202_v1 = vpack.c.bf16 %v2359_v59, %v2359_v59  ;;  %v3203_v2 = vpack.c.bf16 %v2399_v62, %v2399_v62 }
 0x2b7   : > { %v2361_v6 = vpop.f32.mrf.mxu0  ;;  %v2401_v13 = vpop.f32.mrf.mxu1 }
 0x2b8   : > { %v3853_v7 = vsel %vm3204_vm2, %v3202_v1, 0  ;;  %v3899_v9 = vsel %vm3204_vm2, %v3203_v2, 0  ;;  %7070 = vmatmul.mubr.msk.bf16.vlgmr.msra.gmra.mxu0 %vm3204_vm2, %v3184_v0  ;;  %7076 = vmatmul.mubr.msk.bf16.vlgmr.msra.gmra.mxu1 %vm3204_vm2, %v3185_v53  ;;  %v6391_v53 = vld [vmem:[%s7649_s29 + $0x6] ss:$0 sm:$0xff]  ;;  %v6392_v1 = vld [vmem:[%s7649_s29 + $0x7] ss:$0 sm:$0xff] }
 0x2b9   : > { %v6892_v10 = vpop.f32.mrf.mxu0  ;;  %v6898_v11 = vpop.f32.mrf.mxu1  ;;  %7080 = vmatpush3.bf16.xpose.msra.mxu0 %v3853_v7  ;;  %7086 = vmatpush3.bf16.xpose.msra.mxu1 %v3899_v9 }
 0x2ba   : > { %7081 = vmatprep.mubr.msk.bf16.mxu0 %vm7480_vm1, %v7479_v8  ;;  %7087 = vmatprep.mubr.msk.bf16.mxu1 %vm7480_vm1, %v7479_v8 }
 0x2bb   : > { %v2566_v36 = vpop.f32.mrf.mxu0  ;;  %v2606_v18 = vpop.f32.mrf.mxu1  ;;  %7091 = vmatprep.subr.bf16.mxu0 %v7479_v8  ;;  %7097 = vmatprep.subr.bf16.mxu1 %v7479_v8 }
 0x2bc   : > { %v2567_v37 = vadd.f32 %v6385_v14, %v2566_v36  ;;  %v2607_v19 = vadd.f32 %v6386_v15, %v2606_v18  ;;  %v6393_v18 = vld [vmem:[%s7649_s29 + $0x8] ss:$0 sm:$0xff] }
 0x2bd   : > { %v6903_v22 = vpop.f32.mrf.mxu0  ;;  %v6909_v60 = vpop.f32.mrf.mxu1 }
 0x2be   : > { %v4150_v24 = vpack.c.bf16 %v2567_v37, %v2567_v37  ;;  %v4151_v25 = vpack.c.bf16 %v2607_v19, %v2607_v19  ;;  %v6394_v37 = vld [vmem:[%s7649_s29 + $0x9] ss:$0 sm:$0xff] }
 0x2bf   : > { %v2569_v26 = vpop.f32.mrf.mxu0  ;;  %v2609_v27 = vpop.f32.mrf.mxu1 }
 0x2c0   : > { %v4172_v30 = vsel %vm4170_vm3, %v4150_v24, 0  ;;  %v4218_v31 = vsel %vm4170_vm3, %v4151_v25, 0  ;;  %7082 = vmatmul.mubr.msk.bf16.vlgmr.msra.gmra.mxu0 %vm3204_vm2, %v3186_v61  ;;  %7088 = vmatmul.mubr.msk.bf16.vlgmr.msra.gmra.mxu1 %vm3204_vm2, %v3187_v23 }
 0x2c1   : > { %v6904_v32 = vpop.f32.mrf.mxu0  ;;  %v6910_v20 = vpop.f32.mrf.mxu1  ;;  %7092 = vmatpush3.bf16.msra.mxu0 %v4172_v30  ;;  %7098 = vmatpush3.bf16.msra.mxu1 %v4218_v31 }
 0x2c2   : > { %7093 = vmatprep.mubr.msk.bf16.mxu0 %vm7480_vm1, %v7479_v8  ;;  %7103 = vmatprep.subr.bf16.mxu0 %v7479_v8 }
 0x2c3   : > { %v2646_v34 = vpop.f32.mrf.mxu0  ;;  %v2686_v35 = vpop.f32.mrf.mxu1  ;;  %7099 = vmatprep.mubr.msk.bf16.mxu1 %vm7480_vm1, %v7479_v8  ;;  %7109 = vmatprep.subr.bf16.mxu1 %v7479_v8 }
 0x2c4   : > { %v2647_v38 = vadd.f32 %v6387_v33, %v2646_v34  ;;  %v2687_v39 = vadd.f32 %v6388_v21, %v2686_v35  ;;  %v6395_v21 = vld [vmem:[%s7649_s29 + $0xa] ss:$0 sm:$0xff]  ;;  %v6396_v34 = vld [vmem:[%s7649_s29 + $0xb] ss:$0 sm:$0xff] }
 0x2c5   : > { %v6915_v40 = vpop.f32.mrf.mxu0  ;;  %v6921_v41 = vpop.f32.mrf.mxu1 }
 0x2c6   : > { %v4152_v44 = vpack.c.bf16 %v2647_v38, %v2647_v38  ;;  %v4153_v42 = vpack.c.bf16 %v2687_v39, %v2687_v39 }
 0x2c7   : > { %v2649_v45 = vpop.f32.mrf.mxu0  ;;  %v2689_v43 = vpop.f32.mrf.mxu1 }
 0x2c8   : > { %v8126_v46 = vsel %vm4170_vm3, %v4152_v44, 0  ;;  %v8129_v47 = vsel %vm4170_vm3, %v4153_v42, 0 }
 0x2c9   : > { %v6916_v48 = vpop.f32.mrf.mxu0  ;;  %v6922_v49 = vpop.f32.mrf.mxu1 }
 0x2cb   : > { %v2726_v4 = vpop.f32.mrf.mxu0  ;;  %v2766_v51 = vpop.f32.mrf.mxu1 }
 0x2cc   : > { %v2727_v54 = vadd.f32 %v6389_v3, %v2726_v4  ;;  %v2767_v55 = vadd.f32 %v6390_v50, %v2766_v51  ;;  %v6397_v51 = vld [vmem:[%s7649_s29 + $0xc] ss:$0 sm:$0xff] }
 0x2cd   : > { %v6927_v56 = vpop.f32.mrf.mxu0  ;;  %v6933_v28 = vpop.f32.mrf.mxu1 }
 0x2ce   : > { %v4154_v57 = vpack.c.bf16 %v2727_v54, %v2727_v54  ;;  %v4155_v29 = vpack.c.bf16 %v2767_v55, %v2767_v55  ;;  %v6398_v54 = vld [vmem:[%s7649_s29 + $0xd] ss:$0 sm:$0xff] }
 0x2cf   : > { %v2729_v58 = vpop.f32.mrf.mxu0  ;;  %v2769_v59 = vpop.f32.mrf.mxu1 }
 0x2d0   : > { %v8134_v62 = vsel %vm4170_vm3, %v4154_v57, 0  ;;  %v8137_v63 = vsel %vm4170_vm3, %v4155_v29, 0 }
 0x2d1   : > { %v6928_v52 = vpop.f32.mrf.mxu0  ;;  %v6934_v0 = vpop.f32.mrf.mxu1 }
 0x2d3   : > { %v2806_v2 = vpop.f32.mrf.mxu0  ;;  %v2846_v5 = vpop.f32.mrf.mxu1 }
 0x2d4   : > { %v2807_v12 = vadd.f32 %v6391_v53, %v2806_v2  ;;  %v2847_v6 = vadd.f32 %v6392_v1, %v2846_v5 }
 0x2d5   : > { %v6939_v13 = vpop.f32.mrf.mxu0  ;;  %v6945_v7 = vpop.f32.mrf.mxu1 }
 0x2d6   : > { %v4156_v9 = vpack.c.bf16 %v2807_v12, %v2807_v12  ;;  %v4157_v10 = vpack.c.bf16 %v2847_v6, %v2847_v6  ;;  %v6399_v6 = vld [vmem:[%s7649_s29 + $0xe] ss:$0 sm:$0xff]  ;;  %v6400_v13 = vld [vmem:[%s7649_s29 + $0xf] ss:$0 sm:$0xff] }
 0x2d7   : > { %v2809_v11 = vpop.f32.mrf.mxu0  ;;  %v2849_v14 = vpop.f32.mrf.mxu1 }
 0x2d8   : > { %v8142_v15 = vsel %vm4170_vm3, %v4156_v9, 0  ;;  %v8145_v16 = vsel %vm4170_vm3, %v4157_v10, 0 }
 0x2d9   : > { %v6940_v17 = vpop.f32.mrf.mxu0  ;;  %v6946_v36 = vpop.f32.mrf.mxu1 }
 0x2db   : > { %v2886_v19 = vpop.f32.mrf.mxu0  ;;  %v2926_v22 = vpop.f32.mrf.mxu1 }
 0x2dc   : > { %v2887_v60 = vadd.f32 %v6393_v18, %v2886_v19  ;;  %v2927_v61 = vadd.f32 %v6394_v37, %v2926_v22 }
 0x2dd   : > { %v6951_v23 = vpop.f32.mrf.mxu0  ;;  %v6957_v24 = vpop.f32.mrf.mxu1 }
 0x2de   : > { %v4158_v25 = vpack.c.bf16 %v2887_v60, %v2887_v60  ;;  %v4159_v26 = vpack.c.bf16 %v2927_v61, %v2927_v61 }
 0x2df   : > { %v2889_v27 = vpop.f32.mrf.mxu0  ;;  %v2929_v30 = vpop.f32.mrf.mxu1 }
 0x2e0   : > { %v8150_v31 = vsel %vm4170_vm3, %v4158_v25, 0  ;;  %v8153_v32 = vsel %vm4170_vm3, %v4159_v26, 0 }
 0x2e1   : > { %v6952_v20 = vpop.f32.mrf.mxu0  ;;  %v6958_v33 = vpop.f32.mrf.mxu1 }
 0x2e3   : > { %v2966_v35 = vpop.f32.mrf.mxu0  ;;  %v3006_v38 = vpop.f32.mrf.mxu1 }
 0x2e4   : > { %v2967_v39 = vadd.f32 %v6395_v21, %v2966_v35  ;;  %v3007_v40 = vadd.f32 %v6396_v34, %v3006_v38 }
 0x2e5   : > { %v6963_v41 = vpop.f32.mrf.mxu0  ;;  %v6969_v44 = vpop.f32.mrf.mxu1 }
 0x2e6   : > { %v4160_v42 = vpack.c.bf16 %v2967_v39, %v2967_v39  ;;  %v4161_v45 = vpack.c.bf16 %v3007_v40, %v3007_v40 }
 0x2e7   : > { %v2969_v43 = vpop.f32.mrf.mxu0  ;;  %v3009_v48 = vpop.f32.mrf.mxu1 }
 0x2e8   : > { %v8158_v49 = vsel %vm4170_vm3, %v4160_v42, 0  ;;  %v8161_v3 = vsel %vm4170_vm3, %v4161_v45, 0 }
 0x2e9   : > { %v6964_v50 = vpop.f32.mrf.mxu0  ;;  %v6970_v4 = vpop.f32.mrf.mxu1 }
 0x2eb   : > { %v3046_v55 = vpop.f32.mrf.mxu0  ;;  %v3086_v56 = vpop.f32.mrf.mxu1 }
 0x2ec   : > { %v3047_v28 = vadd.f32 %v6397_v51, %v3046_v55  ;;  %v3087_v57 = vadd.f32 %v6398_v54, %v3086_v56 }
 0x2ed   : > { %v6975_v29 = vpop.f32.mrf.mxu0  ;;  %v6981_v58 = vpop.f32.mrf.mxu1 }
 0x2ee   : > { %v4162_v59 = vpack.c.bf16 %v3047_v28, %v3047_v28  ;;  %v4163_v52 = vpack.c.bf16 %v3087_v57, %v3087_v57 }
 0x2ef   : > { %v3049_v0 = vpop.f32.mrf.mxu0  ;;  %v3089_v53 = vpop.f32.mrf.mxu1 }
 0x2f0   : > { %v8166_v1 = vsel %vm4170_vm3, %v4162_v59, 0  ;;  %v8169_v2 = vsel %vm4170_vm3, %v4163_v52, 0 }
 0x2f1   : > { %v6976_v5 = vpop.f32.mrf.mxu0  ;;  %v6982_v12 = vpop.f32.mrf.mxu1 }
 0x2f3   : > { %v3126_v7 = vpop.f32.mrf.mxu0  ;;  %v3166_v9 = vpop.f32.mrf.mxu1 }
 0x2f4   : > { %v3127_v10 = vadd.f32 %v6399_v6, %v3126_v7  ;;  %v3167_v11 = vadd.f32 %v6400_v13, %v3166_v9 }
 0x2f5   : > { %v6987_v14 = vpop.f32.mrf.mxu0  ;;  %v6993_v17 = vpop.f32.mrf.mxu1 }
 0x2f6   : > { %v4164_v36 = vpack.c.bf16 %v3127_v10, %v3127_v10  ;;  %v4165_v18 = vpack.c.bf16 %v3167_v11, %v3167_v11 }
 0x2f7   : > { %v3129_v37 = vpop.f32.mrf.mxu0  ;;  %v3169_v19 = vpop.f32.mrf.mxu1 }
 0x2f8   : > { %v8174_v22 = vsel %vm4170_vm3, %v4164_v36, 0  ;;  %v8177_v60 = vsel %vm4170_vm3, %v4165_v18, 0 }
 0x2f9   : > { %v6988_v61 = vpop.f32.mrf.mxu0  ;;  %v6994_v23 = vpop.f32.mrf.mxu1 }
 0x348   : > { %v3245_v24 = vpop.f32.mrf.mxu0  ;;  %v3291_v25 = vpop.f32.mrf.mxu1 }
 0x349   : > { %v8179_v26 = vmul.f32 0.35355338, %v3245_v24  ;;  %v8181_v20 = vmul.f32 0.35355338, %v3291_v25 }
 0x34a   : > { %v6999_v27 = vpop.f32.mrf.mxu0  ;;  %v7005_v30 = vpop.f32.mrf.mxu1 }
 0x34b   : > { %v3958_v33 = vsel %vm3957_vm4, %v8179_v26, -inf  ;;  %v3961_v39 = vsel %vm3957_vm4, %v8181_v20, -inf }
 0x34c   : > { %v3294_v21 = vpop.f32.mrf.mxu1  ;;  %3959 = vmax.xlane.f32.xlu1 %v3958_v33  ;;  %v3248_v34 = vpop.f32.mrf.mxu0 }
 0x34e   : > { %v7000_v35 = vpop.f32.mrf.mxu0  ;;  %v7006_v38 = vpop.f32.mrf.mxu1 }
 0x350   : > { %v3383_v40 = vpop.f32.mrf.mxu1  ;;  %3962 = vmax.xlane.f32.xlu1 %v3961_v39  ;;  %v3337_v41 = vpop.f32.mrf.mxu0 }
 0x351   : > { %v8187_v44 = vmul.f32 0.35355338, %v3383_v40  ;;  %v8189_v42 = vmul.f32 0.35355338, %v3337_v41 }
 0x352   : > { %v7011_v45 = vpop.f32.mrf.mxu0  ;;  %v7017_v43 = vpop.f32.mrf.mxu1 }
 0x353   : > { %v3967_v48 = vsel %vm3957_vm4, %v8187_v44, -inf  ;;  %v3964_v50 = vsel %vm3957_vm4, %v8189_v42, -inf }
 0x354   : > { %v3386_v4 = vpop.f32.mrf.mxu1  ;;  %3968 = vmax.xlane.f32.xlu1 %v3967_v48  ;;  %3965 = vmax.xlane.f32.xlu0 %v3964_v50  ;;  %v3340_v51 = vpop.f32.mrf.mxu0 }
 0x356   : > { %v7012_v54 = vpop.f32.mrf.mxu0  ;;  %v7018_v55 = vpop.f32.mrf.mxu1 }
 0x358   : > { %v3429_v56 = vpop.f32.mrf.mxu0  ;;  %v3475_v28 = vpop.f32.mrf.mxu1 }
 0x359   : > { %v8195_v57 = vmul.f32 0.35355338, %v3429_v56  ;;  %v8197_v29 = vmul.f32 0.35355338, %v3475_v28 }
 0x35a   : > { %v7023_v58 = vpop.f32.mrf.mxu0  ;;  %v7029_v59 = vpop.f32.mrf.mxu1 }
 0x35b   : > { %v3973_v52 = vsel %vm3957_vm4, %v8197_v29, -inf  ;;  %v3970_v0 = vsel %vm3957_vm4, %v8195_v57, -inf }
 0x35c   : > { %v3478_v53 = vpop.f32.mrf.mxu1  ;;  %3974 = vmax.xlane.f32.xlu1 %v3973_v52  ;;  %3971 = vmax.xlane.f32.xlu0 %v3970_v0  ;;  %v3432_v5 = vpop.f32.mrf.mxu0 }
 0x35e   : > { %v7024_v12 = vpop.f32.mrf.mxu0  ;;  %v7030_v6 = vpop.f32.mrf.mxu1 }
 0x360   : > { %v3521_v13 = vpop.f32.mrf.mxu0  ;;  %v3567_v7 = vpop.f32.mrf.mxu1 }
 0x361   : > { %v8203_v9 = vmul.f32 0.35355338, %v3521_v13  ;;  %v8205_v10 = vmul.f32 0.35355338, %v3567_v7 }
 0x362   : > { %v7035_v11 = vpop.f32.mrf.mxu0  ;;  %v7041_v14 = vpop.f32.mrf.mxu1 }
 0x363   : > { %v3979_v17 = vsel %vm3957_vm4, %v8205_v10, -inf  ;;  %v3976_v36 = vsel %vm3957_vm4, %v8203_v9, -inf }
 0x364   : > { %v3570_v18 = vpop.f32.mrf.mxu1  ;;  %3980 = vmax.xlane.f32.xlu1 %v3979_v17  ;;  %3977 = vmax.xlane.f32.xlu0 %v3976_v36  ;;  %v3524_v37 = vpop.f32.mrf.mxu0 }
 0x366   : > { %v7036_v19 = vpop.f32.mrf.mxu0  ;;  %v7042_v61 = vpop.f32.mrf.mxu1 }
 0x368   : > { %v3613_v23 = vpop.f32.mrf.mxu0  ;;  %v3659_v24 = vpop.f32.mrf.mxu1 }
 0x369   : > { %v8211_v25 = vmul.f32 0.35355338, %v3613_v23  ;;  %v8213_v27 = vmul.f32 0.35355338, %v3659_v24 }
 0x36a   : > { %v7047_v30 = vpop.f32.mrf.mxu0  ;;  %v7053_v33 = vpop.f32.mrf.mxu1 }
 0x36b   : > { %v3985_v21 = vsel %vm3957_vm4, %v8213_v27, -inf  ;;  %v3982_v34 = vsel %vm3957_vm4, %v8211_v25, -inf }
 0x36c   : > { %v3662_v35 = vpop.f32.mrf.mxu1  ;;  %3986 = vmax.xlane.f32.xlu1 %v3985_v21  ;;  %3983 = vmax.xlane.f32.xlu0 %v3982_v34  ;;  %v3616_v38 = vpop.f32.mrf.mxu0 }
 0x36e   : > { %v7048_v39 = vpop.f32.mrf.mxu0  ;;  %v7054_v40 = vpop.f32.mrf.mxu1 }
 0x370   : > { %v3705_v41 = vpop.f32.mrf.mxu0  ;;  %v3751_v45 = vpop.f32.mrf.mxu1 }
 0x371   : > { %v8219_v43 = vmul.f32 0.35355338, %v3705_v41  ;;  %v8221_v48 = vmul.f32 0.35355338, %v3751_v45 }
 0x372   : > { %v7059_v50 = vpop.f32.mrf.mxu0  ;;  %v7065_v4 = vpop.f32.mrf.mxu1 }
 0x373   : > { %v3991_v51 = vsel %vm3957_vm4, %v8221_v48, -inf  ;;  %v3988_v54 = vsel %vm3957_vm4, %v8219_v43, -inf }
 0x374   : > { %v3754_v55 = vpop.f32.mrf.mxu1  ;;  %3992 = vmax.xlane.f32.xlu1 %v3991_v51  ;;  %3989 = vmax.xlane.f32.xlu0 %v3988_v54  ;;  %v3708_v56 = vpop.f32.mrf.mxu0 }
 0x376   : > { %v7060_v28 = vpop.f32.mrf.mxu0  ;;  %v7066_v58 = vpop.f32.mrf.mxu1 }
 0x378   : > { %v3797_v59 = vpop.f32.mrf.mxu0  ;;  %v3843_v52 = vpop.f32.mrf.mxu1 }
 0x379   : > { %v8227_v0 = vmul.f32 0.35355338, %v3797_v59  ;;  %v8229_v53 = vmul.f32 0.35355338, %v3843_v52 }
 0x37a   : > { %v7071_v5 = vpop.f32.mrf.mxu0  ;;  %v7077_v12 = vpop.f32.mrf.mxu1 }
 0x37b   : > { %v3997_v6 = vsel %vm3957_vm4, %v8229_v53, -inf  ;;  %v3994_v13 = vsel %vm3957_vm4, %v8227_v0, -inf }
 0x37c   : > { %v3846_v7 = vpop.f32.mrf.mxu1  ;;  %3998 = vmax.xlane.f32.xlu1 %v3997_v6  ;;  %3995 = vmax.xlane.f32.xlu0 %v3994_v13  ;;  %v3800_v11 = vpop.f32.mrf.mxu0 }
 0x37e   : > { %v7072_v14 = vpop.f32.mrf.mxu0  ;;  %v7078_v17 = vpop.f32.mrf.mxu1 }
 0x380   : > { %v3889_v36 = vpop.f32.mrf.mxu0  ;;  %v3935_v18 = vpop.f32.mrf.mxu1 }
 0x381   : > { %v8235_v37 = vmul.f32 0.35355338, %v3889_v36  ;;  %v8237_v19 = vmul.f32 0.35355338, %v3935_v18 }
 0x382   : > { %v7083_v61 = vpop.f32.mrf.mxu0  ;;  %v7089_v23 = vpop.f32.mrf.mxu1 }
 0x383   : > { %v4003_v24 = vsel %vm3957_vm4, %v8237_v19, -inf  ;;  %v4000_v30 = vsel %vm3957_vm4, %v8235_v37, -inf }
 0x384   : > { %v3938_v33 = vpop.f32.mrf.mxu1  ;;  %4004 = vmax.xlane.f32.xlu1 %v4003_v24  ;;  %4001 = vmax.xlane.f32.xlu0 %v4000_v30  ;;  %v3892_v21 = vpop.f32.mrf.mxu0 }
 0x386   : > { %v7084_v34 = vpop.f32.mrf.mxu0  ;;  %v7090_v35 = vpop.f32.mrf.mxu1 }
 0x3d5   : > { %v3960_v38 = vpop.xlane.xlu1 %3959 }
 0x3d6   : > { %v4006_v39 = vsub.f32 %v8179_v26, %v3960_v38 }
 0x3d8   : > { %v4022_v40 = vmul.f32 1.442695, %v4006_v39 }
 0x3d9   : > { %v3963_v41 = vpop.xlane.xlu1 %3962 }
 0x3da   : > { %7368 = vpow2.f32 %v4022_v40  ;;  %v4007_v45 = vsub.f32 %v8181_v20, %v3963_v41 }
 0x3dc   : > { %v4024_v50 = vmul.f32 1.442695, %v4007_v45 }
 0x3dd   : > { %v3969_v4 = vpop.xlane.xlu1 %3968  ;;  %v3966_v51 = vpop.xlane.xlu0 %3965 }
 0x3de   : > { %7370 = vpow2.f32 %v4024_v50  ;;  %v4009_v54 = vsub.f32 %v8187_v44, %v3969_v4  ;;  %v4008_v55 = vsub.f32 %v8189_v42, %v3966_v51 }
 0x3e0   : > { %v4028_v56 = vmul.f32 1.442695, %v4009_v54  ;;  %v4026_v28 = vmul.f32 1.442695, %v4008_v55 }
 0x3e2   : > { %7372 = vpow2.f32 %v4028_v56 }
 0x3e3   : > { %7374 = vpow2.f32 %v4026_v28 }
 0x3e5   : > { %v3975_v58 = vpop.xlane.xlu1 %3974  ;;  %v3972_v59 = vpop.xlane.xlu0 %3971 }
 0x3e6   : > { %v4011_v26 = vsub.f32 %v8197_v29, %v3975_v58  ;;  %v4010_v52 = vsub.f32 %v8195_v57, %v3972_v59 }
 0x3e7   : > { %v8249_v5 = vpop.eup %7368 }
 0x3e8   : > { %v4032_v20 = vmul.f32 1.442695, %v4011_v26  ;;  %v4030_v12 = vmul.f32 1.442695, %v4010_v52  ;;  %v4054_v6 = vsel %vm3957_vm4, %v8249_v5, 0.0 }
 0x3e9   : > { %4055 = vadd.xlane.f32.xlu0 %v4054_v6 }
 0x3ea   : > { %7376 = vpow2.f32 %v4032_v20 }
 0x3eb   : > { %v8253_v44 = vpop.eup %7370  ;;  %7378 = vpow2.f32 %v4030_v12 }
 0x3ec   : > { %v4057_v42 = vsel %vm3957_vm4, %v8253_v44, 0.0 }
 0x3ed   : > { %4058 = vadd.xlane.f32.xlu1 %v4057_v42  ;;  %v3981_v13 = vpop.xlane.xlu1 %3980  ;;  %v3978_v29 = vpop.xlane.xlu0 %3977 }
 0x3ee   : > { %v4013_v57 = vsub.f32 %v8205_v10, %v3981_v13  ;;  %v4012_v7 = vsub.f32 %v8203_v9, %v3978_v29 }
 0x3ef   : > { %v8259_v11 = vpop.eup %7372 }
 0x3f0   : > { %v8261_v14 = vpop.eup %7374  ;;  %v4036_v17 = vmul.f32 1.442695, %v4013_v57  ;;  %v4034_v36 = vmul.f32 1.442695, %v4012_v7  ;;  %v4063_v18 = vsel %vm3957_vm4, %v8259_v11, 0.0 }
 0x3f1   : > { %4064 = vadd.xlane.f32.xlu1 %v4063_v18  ;;  %v4060_v61 = vsel %vm3957_vm4, %v8261_v14, 0.0 }
 0x3f2   : > { %7380 = vpow2.f32 %v4036_v17  ;;  %4061 = vadd.xlane.f32.xlu0 %v4060_v61 }
 0x3f3   : > { %7382 = vpow2.f32 %v4034_v36 }
 0x3f5   : > { %v3987_v23 = vpop.xlane.xlu1 %3986  ;;  %v3984_v10 = vpop.xlane.xlu0 %3983 }
 0x3f6   : > { %v4015_v9 = vsub.f32 %v8213_v27, %v3987_v23  ;;  %v4014_v24 = vsub.f32 %v8211_v25, %v3984_v10 }
 0x3f7   : > { %v8269_v30 = vpop.eup %7376 }
 0x3f8   : > { %v8271_v33 = vpop.eup %7378  ;;  %v4040_v21 = vmul.f32 1.442695, %v4015_v9  ;;  %v4038_v34 = vmul.f32 1.442695, %v4014_v24  ;;  %v4069_v35 = vsel %vm3957_vm4, %v8269_v30, 0.0 }
 0x3f9   : > { %4070 = vadd.xlane.f32.xlu1 %v4069_v35  ;;  %v4066_v38 = vsel %vm3957_vm4, %v8271_v33, 0.0 }
 0x3fa   : > { %7384 = vpow2.f32 %v4040_v21  ;;  %4067 = vadd.xlane.f32.xlu0 %v4066_v38 }
 0x3fb   : > { %7386 = vpow2.f32 %v4038_v34 }
 0x3fd   : > { %v3993_v39 = vpop.xlane.xlu1 %3992  ;;  %v3990_v27 = vpop.xlane.xlu0 %3989 }
 0x3fe   : > { %v4017_v25 = vsub.f32 %v8221_v48, %v3993_v39  ;;  %v4016_v40 = vsub.f32 %v8219_v43, %v3990_v27 }
 0x3ff   : > { %v8279_v41 = vpop.eup %7380 }
 0x400   : > { %v8281_v45 = vpop.eup %7382  ;;  %v4044_v50 = vmul.f32 1.442695, %v4017_v25  ;;  %v4042_v4 = vmul.f32 1.442695, %v4016_v40  ;;  %v4075_v51 = vsel %vm3957_vm4, %v8279_v41, 0.0 }
 0x401   : > { %4076 = vadd.xlane.f32.xlu1 %v4075_v51  ;;  %v4072_v54 = vsel %vm3957_vm4, %v8281_v45, 0.0 }
 0x402   : > { %7388 = vpow2.f32 %v4044_v50  ;;  %4073 = vadd.xlane.f32.xlu0 %v4072_v54 }
 0x403   : > { %7390 = vpow2.f32 %v4042_v4 }
 0x405   : > { %v3999_v55 = vpop.xlane.xlu1 %3998  ;;  %v3996_v48 = vpop.xlane.xlu0 %3995 }
 0x406   : > { %v4019_v43 = vsub.f32 %v8229_v53, %v3999_v55  ;;  %v4018_v56 = vsub.f32 %v8227_v0, %v3996_v48 }
 0x407   : > { %v8289_v28 = vpop.eup %7384 }
 0x408   : > { %v8291_v58 = vpop.eup %7386  ;;  %v4048_v59 = vmul.f32 1.442695, %v4019_v43  ;;  %v4046_v26 = vmul.f32 1.442695, %v4018_v56  ;;  %v4081_v52 = vsel %vm3957_vm4, %v8289_v28, 0.0 }
 0x409   : > { %4082 = vadd.xlane.f32.xlu1 %v4081_v52  ;;  %v4078_v20 = vsel %vm3957_vm4, %v8291_v58, 0.0 }
 0x40a   : > { %7392 = vpow2.f32 %v4048_v59  ;;  %4079 = vadd.xlane.f32.xlu0 %v4078_v20 }
 0x40b   : > { %7394 = vpow2.f32 %v4046_v26 }
 0x40d   : > { %v4005_v12 = vpop.xlane.xlu1 %4004  ;;  %v4002_v53 = vpop.xlane.xlu0 %4001 }
 0x40e   : > { %v4021_v0 = vsub.f32 %v8237_v19, %v4005_v12  ;;  %v4020_v6 = vsub.f32 %v8235_v37, %v4002_v53 }
 0x40f   : > { %v8299_v42 = vpop.eup %7388 }
 0x410   : > { %v8301_v13 = vpop.eup %7390  ;;  %v4052_v29 = vmul.f32 1.442695, %v4021_v0  ;;  %v4050_v57 = vmul.f32 1.442695, %v4020_v6  ;;  %v4087_v7 = vsel %vm3957_vm4, %v8299_v42, 0.0 }
 0x411   : > { %4088 = vadd.xlane.f32.xlu1 %v4087_v7  ;;  %v4084_v17 = vsel %vm3957_vm4, %v8301_v13, 0.0 }
 0x412   : > { %7396 = vpow2.f32 %v4052_v29  ;;  %4085 = vadd.xlane.f32.xlu0 %v4084_v17 }
 0x413   : > { %7398 = vpow2.f32 %v4050_v57 }
 0x417   : > { %v8307_v36 = vpop.eup %7392 }
 0x418   : > { %v8309_v19 = vpop.eup %7394  ;;  %v4093_v37 = vsel %vm3957_vm4, %v8307_v36, 0.0 }
 0x419   : > { %4094 = vadd.xlane.f32.xlu1 %v4093_v37  ;;  %v4090_v18 = vsel %vm3957_vm4, %v8309_v19, 0.0 }
 0x41a   : > { %4091 = vadd.xlane.f32.xlu0 %v4090_v18 }
 0x41f   : > { %v8315_v61 = vpop.eup %7396 }
 0x420   : > { %v8317_v23 = vpop.eup %7398  ;;  %v4099_v10 = vsel %vm3957_vm4, %v8315_v61, 0.0 }
 0x421   : > { %4100 = vadd.xlane.f32.xlu1 %v4099_v10  ;;  %v4096_v9 = vsel %vm3957_vm4, %v8317_v23, 0.0 }
 0x422   : > { %4097 = vadd.xlane.f32.xlu0 %v4096_v9 }
 0x472   : > { %v4056_v24 = vpop.xlane.xlu0 %4055 }
 0x473   : > { %7400 = vrcp.f32 %v4056_v24 }
 0x476   : > { %v4059_v21 = vpop.xlane.xlu1 %4058 }
 0x477   : > { %7402 = vrcp.f32 %v4059_v21 }
 0x47a   : > { %v4065_v34 = vpop.xlane.xlu1 %4064 }
 0x47b   : > { %7404 = vrcp.f32 %v4065_v34  ;;  %v4062_v35 = vpop.xlane.xlu0 %4061 }
 0x47c   : > { %7406 = vrcp.f32 %v4062_v35 }
 0x480   : > { %v7401_v38 = vpop.eup %7400 }
 0x481   : > { %v4118_v39 = vmul.f32 %v7401_v38, %v8249_v5 }
 0x482   : > { %v4071_v27 = vpop.xlane.xlu1 %4070 }
 0x483   : > { %v4134_v25 = vpack.c.bf16 %v4118_v39, %v4118_v39  ;;  %7408 = vrcp.f32 %v4071_v27  ;;  %v4068_v40 = vpop.xlane.xlu0 %4067 }
 0x484   : > { %v7403_v50 = vpop.eup %7402  ;;  %7410 = vrcp.f32 %v4068_v40 }
 0x485   : > { %v4119_v4 = vmul.f32 %v7403_v50, %v8253_v44  ;;  %7094 = vmatmul.mubr.msk.bf16.vlgmr.msra.gmra.mxu0 %vm4166_vm5, %v4134_v25 }
 0x486   : > { %7104 = vmatpush3.bf16.msra.mxu0 %v8126_v46  ;;  %7105 = vmatprep.mubr.msk.bf16.mxu0 %vm7480_vm1, %v7479_v8 }
 0x487   : > { %v4135_v51 = vpack.c.bf16 %v4119_v4, %v4119_v4  ;;  %7115 = vmatprep.subr.bf16.mxu0 %v7479_v8  ;;  %v4923_v4 = vld [vmem:[%s7654_s20 + $0xc] sm:$0xf] }
 0x488   : > { %v7405_v5 = vpop.eup %7404 }
 0x489   : > { %v7407_v54 = vpop.eup %7406  ;;  %7100 = vmatmul.mubr.msk.bf16.vlgmr.msra.gmra.mxu1 %vm4166_vm5, %v4135_v51  ;;  %v4121_v46 = vmul.f32 %v7405_v5, %v8259_v11 }
 0x48a   : > { %v4120_v55 = vmul.f32 %v7407_v54, %v8261_v14  ;;  %7110 = vmatpush3.bf16.msra.mxu1 %v8129_v47  ;;  %v4077_v48 = vpop.xlane.xlu1 %4076  ;;  %7111 = vmatprep.mubr.msk.bf16.mxu1 %vm7480_vm1, %v7479_v8 }
 0x48b   : > { %7412 = vrcp.f32 %v4077_v48  ;;  %v4074_v44 = vpop.xlane.xlu0 %4073  ;;  %7121 = vmatprep.subr.bf16.mxu1 %v7479_v8  ;;  %v4137_v56 = vpack.c.bf16 %v4121_v46, %v4121_v46 }
 0x48c   : > { %v4136_v43 = vpack.c.bf16 %v4120_v55, %v4120_v55  ;;  %7414 = vrcp.f32 %v4074_v44  ;;  %v5078_v55 = vsel %vm838_vm0, %v4923_v4, 0  ;;  %v4924_v44 = vld [vmem:[%s7654_s20 + $0x10] sm:$0xf] }
 0x48d   : > { %v4932_v4 = vld [vmem:[%s7654_s20 + $0x30] sm:$0xf] }
 0x48e   : > { %7106 = vmatmul.mubr.msk.bf16.vlgmr.msra.gmra.mxu0 %vm4166_vm5, %v4136_v43 }
 0x48f   : > { %7116 = vmatpush3.bf16.msra.mxu0 %v8134_v62  ;;  %7117 = vmatprep.mubr.msk.bf16.mxu0 %vm7480_vm1, %v7479_v8 }
 0x490   : > { %v7409_v47 = vpop.eup %7408  ;;  %7127 = vmatprep.subr.bf16.mxu0 %v7479_v8 }
 0x491   : > { %v7411_v14 = vpop.eup %7410  ;;  %7112 = vmatmul.mubr.msk.bf16.vlgmr.msra.gmra.mxu1 %vm4166_vm5, %v4137_v56  ;;  %v4123_v26 = vmul.f32 %v7409_v47, %v8269_v30 }
 0x492   : > { %v4122_v11 = vmul.f32 %v7411_v14, %v8271_v33  ;;  %7122 = vmatpush3.bf16.msra.mxu1 %v8137_v63  ;;  %v4083_v59 = vpop.xlane.xlu1 %4082  ;;  %7123 = vmatprep.mubr.msk.bf16.mxu1 %vm7480_vm1, %v7479_v8 }
 0x493   : > { %7416 = vrcp.f32 %v4083_v59  ;;  %v4080_v62 = vpop.xlane.xlu0 %4079  ;;  %7133 = vmatprep.subr.bf16.mxu1 %v7479_v8  ;;  %v4139_v20 = vpack.c.bf16 %v4123_v26, %v4123_v26  ;;  %v4925_v59 = vld [vmem:[%s7654_s20 + $0x14] sm:$0xf] }
 0x494   : > { %v4138_v52 = vpack.c.bf16 %v4122_v11, %v4122_v11  ;;  %7418 = vrcp.f32 %v4080_v62  ;;  %v5124_v11 = vsel %vm838_vm0, %v4924_v44, 0 }
 0x496   : > { %7118 = vmatmul.mubr.msk.bf16.vlgmr.msra.gmra.mxu0 %vm4166_vm5, %v4138_v52 }
 0x497   : > { %7128 = vmatpush3.bf16.msra.mxu0 %v8142_v15  ;;  %7129 = vmatprep.mubr.msk.bf16.mxu0 %vm7480_vm1, %v7479_v8 }
 0x498   : > { %v7413_v63 = vpop.eup %7412  ;;  %7139 = vmatprep.subr.bf16.mxu0 %v7479_v8 }
 0x499   : > { %v7415_v33 = vpop.eup %7414  ;;  %7124 = vmatmul.mubr.msk.bf16.vlgmr.msra.gmra.mxu1 %vm4166_vm5, %v4139_v20  ;;  %v4125_v53 = vmul.f32 %v7413_v63, %v8279_v41  ;;  %v5170_v63 = vsel %vm838_vm0, %v4925_v59, 0 }
 0x49a   : > { %v4124_v30 = vmul.f32 %v7415_v33, %v8281_v45  ;;  %7134 = vmatpush3.bf16.msra.mxu1 %v8145_v16  ;;  %v4089_v12 = vpop.xlane.xlu1 %4088  ;;  %7135 = vmatprep.mubr.msk.bf16.mxu1 %vm7480_vm1, %v7479_v8 }
 0x49b   : > { %7420 = vrcp.f32 %v4089_v12  ;;  %v4086_v15 = vpop.xlane.xlu0 %4085  ;;  %7145 = vmatprep.subr.bf16.mxu1 %v7479_v8  ;;  %v4141_v6 = vpack.c.bf16 %v4125_v53, %v4125_v53  ;;  %v4926_v12 = vld [vmem:[%s7654_s20 + $0x18] sm:$0xf] }
 0x49c   : > { %v4140_v0 = vpack.c.bf16 %v4124_v30, %v4124_v30  ;;  %7422 = vrcp.f32 %v4086_v15 }
 0x49e   : > { %7130 = vmatmul.mubr.msk.bf16.vlgmr.msra.gmra.mxu0 %vm4166_vm5, %v4140_v0 }
 0x49f   : > { %7140 = vmatpush3.bf16.msra.mxu0 %v8150_v31  ;;  %7141 = vmatprep.mubr.msk.bf16.mxu0 %vm7480_vm1, %v7479_v8 }
 0x4a0   : > { %v7417_v16 = vpop.eup %7416  ;;  %7151 = vmatprep.subr.bf16.mxu0 %v7479_v8 }
 0x4a1   : > { %v7419_v45 = vpop.eup %7418  ;;  %7136 = vmatmul.mubr.msk.bf16.vlgmr.msra.gmra.mxu1 %vm4166_vm5, %v4141_v6  ;;  %v4127_v57 = vmul.f32 %v7417_v16, %v8289_v28  ;;  %v5216_v16 = vsel %vm838_vm0, %v4926_v12, 0 }
 0x4a2   : > { %v4126_v41 = vmul.f32 %v7419_v45, %v8291_v58  ;;  %7146 = vmatpush3.bf16.msra.mxu1 %v8153_v32  ;;  %v4095_v29 = vpop.xlane.xlu1 %4094  ;;  %7147 = vmatprep.mubr.msk.bf16.mxu1 %vm7480_vm1, %v7479_v8  ;;  %v4927_v45 = vld [vmem:[%s7654_s20 + $0x1c] sm:$0xf] }
 0x4a3   : > { %7424 = vrcp.f32 %v4095_v29  ;;  %v4092_v31 = vpop.xlane.xlu0 %4091  ;;  %7157 = vmatprep.subr.bf16.mxu1 %v7479_v8  ;;  %v4143_v17 = vpack.c.bf16 %v4127_v57, %v4127_v57 }
 0x4a4   : > { %v4142_v7 = vpack.c.bf16 %v4126_v41, %v4126_v41  ;;  %7426 = vrcp.f32 %v4092_v31 }
 0x4a6   : > { %7142 = vmatmul.mubr.msk.bf16.vlgmr.msra.gmra.mxu0 %vm4166_vm5, %v4142_v7  ;;  %v5262_v7 = vsel %vm838_vm0, %v4927_v45, 0 }
 0x4a7   : > { %7152 = vmatpush3.bf16.msra.mxu0 %v8158_v49  ;;  %7153 = vmatprep.mubr.msk.bf16.mxu0 %vm7480_vm1, %v7479_v8 }
 0x4a8   : > { %v7421_v32 = vpop.eup %7420  ;;  %7163 = vmatprep.subr.bf16.mxu0 %v7479_v8 }
 0x4a9   : > { %v7423_v58 = vpop.eup %7422  ;;  %7148 = vmatmul.mubr.msk.bf16.vlgmr.msra.gmra.mxu1 %vm4166_vm5, %v4143_v17  ;;  %v4129_v18 = vmul.f32 %v7421_v32, %v8299_v42 }
 0x4aa   : > { %v4128_v28 = vmul.f32 %v7423_v58, %v8301_v13  ;;  %7158 = vmatpush3.bf16.msra.mxu1 %v8161_v3  ;;  %v4101_v37 = vpop.xlane.xlu1 %4100  ;;  %7159 = vmatprep.mubr.msk.bf16.mxu1 %vm7480_vm1, %v7479_v8  ;;  %v4928_v58 = vld [vmem:[%s7654_s20 + $0x20] sm:$0xf] }
 0x4ab   : > { %7428 = vrcp.f32 %v4101_v37  ;;  %v4098_v49 = vpop.xlane.xlu0 %4097  ;;  %7169 = vmatprep.subr.bf16.mxu1 %v7479_v8  ;;  %v4145_v9 = vpack.c.bf16 %v4129_v18, %v4129_v18 }
 0x4ac   : > { %v4144_v10 = vpack.c.bf16 %v4128_v28, %v4128_v28  ;;  %7430 = vrcp.f32 %v4098_v49 }
 0x4ae   : > { %7154 = vmatmul.mubr.msk.bf16.vlgmr.msra.gmra.mxu0 %vm4166_vm5, %v4144_v10  ;;  %v5308_v10 = vsel %vm838_vm0, %v4928_v58, 0 }
 0x4af   : > { %7164 = vmatpush3.bf16.msra.mxu0 %v8166_v1  ;;  %7165 = vmatprep.mubr.msk.bf16.mxu0 %vm7480_vm1, %v7479_v8 }
 0x4b0   : > { %v7425_v3 = vpop.eup %7424  ;;  %7175 = vmatprep.subr.bf16.mxu0 %v7479_v8 }
 0x4b1   : > { %v7427_v13 = vpop.eup %7426  ;;  %7160 = vmatmul.mubr.msk.bf16.vlgmr.msra.gmra.mxu1 %vm4166_vm5, %v4145_v9  ;;  %v4131_v24 = vmul.f32 %v7425_v3, %v8307_v36  ;;  %v4929_v9 = vld [vmem:[%s7654_s20 + $0x24] sm:$0xf] }
 0x4b2   : > { %v4130_v42 = vmul.f32 %v7427_v13, %v8309_v19  ;;  %7170 = vmatpush3.bf16.msra.mxu1 %v8169_v2  ;;  %7171 = vmatprep.mubr.msk.bf16.mxu1 %vm7480_vm1, %v7479_v8  ;;  %v4920_v19 = vld [vmem:[%s7654_s20] sm:$0xf] }
 0x4b3   : > { %7181 = vmatprep.subr.bf16.mxu1 %v7479_v8  ;;  %v4147_v21 = vpack.c.bf16 %v4131_v24, %v4131_v24  ;;  %v4940_v38 = vsel %vm838_vm0, %v4920_v19, 0 }
 0x4b4   : > { %v4146_v1 = vpack.c.bf16 %v4130_v42, %v4130_v42 }
 0x4b6   : > { %7166 = vmatmul.mubr.msk.bf16.vlgmr.msra.gmra.mxu0 %vm4166_vm5, %v4146_v1  ;;  %v5354_v1 = vsel %vm838_vm0, %v4929_v9, 0 }
 0x4b7   : > { %7176 = vmatpush3.bf16.msra.mxu0 %v8174_v22  ;;  %7177 = vmatprep.mubr.msk.bf16.mxu0 %vm7480_vm1, %v7479_v8 }
 0x4b8   : > { %v7429_v34 = vpop.eup %7428  ;;  %7187 = vmatprep.subr.bf16.mxu0 %v7479_v8 }
 0x4b9   : > { %v7431_v2 = vpop.eup %7430  ;;  %7172 = vmatmul.mubr.msk.bf16.vlgmr.msra.gmra.mxu1 %vm4166_vm5, %v4147_v21  ;;  %v4133_v22 = vmul.f32 %v7429_v34, %v8315_v61 }
 0x4ba   : > { %v4132_v36 = vmul.f32 %v7431_v2, %v8317_v23  ;;  %7182 = vmatpush3.bf16.msra.mxu1 %v8177_v60  ;;  %7183 = vmatprep.mubr.msk.bf16.mxu1 %vm7480_vm1, %v7479_v8  ;;  %v4921_v60 = vld [vmem:[%s7654_s20 + $0x4] sm:$0xf]  ;;  %v4922_v23 = vld [vmem:[%s7654_s20 + $0x8] sm:$0xf] }
 0x4bb   : > { %7193 = vmatprep.subr.bf16.mxu1 %v7479_v8  ;;  %v4149_v39 = vpack.c.bf16 %v4133_v22, %v4133_v22  ;;  %v4986_v61 = vsel %vm838_vm0, %v4921_v60, 0  ;;  %v5032_v40 = vsel %vm838_vm0, %v4922_v23, 0  ;;  %v4930_v2 = vld [vmem:[%s7654_s20 + $0x28] sm:$0xf] }
 0x4bc   : > { %v4148_v35 = vpack.c.bf16 %v4132_v36, %v4132_v36 }
 0x4be   : > { %7178 = vmatmul.mubr.msk.bf16.vlgmr.msra.gmra.mxu0 %vm4166_vm5, %v4148_v35 }
 0x4bf   : > { %7188 = vmatpush3.bf16.msra.mxu0 %v4940_v38  ;;  %7189 = vmatprep.mubr.msk.bf16.mxu0 %vm7480_vm1, %v7479_v8  ;;  %v5400_v38 = vsel %vm838_vm0, %v4930_v2, 0 }
 0x4c0   : > { %7199 = vmatprep.subr.bf16.mxu0 %v7479_v8 }
 0x4c1   : > { %7184 = vmatmul.mubr.msk.bf16.vlgmr.msra.gmra.mxu1 %vm4166_vm5, %v4149_v39  ;;  %v4931_v39 = vld [vmem:[%s7654_s20 + $0x2c] sm:$0xf] }
 0x4c2   : > { %7195 = vmatprep.mubr.msk.bf16.mxu1 %vm7480_vm1, %v7479_v8  ;;  %7194 = vmatpush3.bf16.msra.mxu1 %v4986_v61 }
 0x4c3   : > { %7205 = vmatprep.subr.bf16.mxu1 %v7479_v8 }
 0x545   : > { %v4208_v27 = vpop.f32.mrf.mxu0 }
 0x546   : > { %v4904_v25 = vpack.c.bf16 %v4208_v27, %v4208_v27 }
 0x547   : > { %v7095_v50 = vpop.f32.mrf.mxu0 }
 0x548   : > { %7190 = vmatmul.mubr.msk.bf16.vlgmr.msra.gmra.mxu0 %vm3204_vm2, %v4904_v25  ;;  %v5446_v25 = vsel %vm838_vm0, %v4931_v39, 0 }
 0x549   : > { %v4211_v51 = vpop.f32.mrf.mxu0  ;;  %v4254_v5 = vpop.f32.mrf.mxu1  ;;  %7200 = vmatpush3.bf16.msra.mxu0 %v5032_v40  ;;  %7201 = vmatprep.mubr.msk.bf16.mxu0 %vm7480_vm1, %v7479_v8 }
 0x54a   : > { %v4905_v54 = vpack.c.bf16 %v4254_v5, %v4254_v5  ;;  %7211 = vmatprep.subr.bf16.mxu0 %v7479_v8 }
 0x54b   : > { %v7096_v48 = vpop.f32.mrf.mxu0  ;;  %v7101_v46 = vpop.f32.mrf.mxu1 }
 0x54c   : > { %7196 = vmatmul.mubr.msk.bf16.vlgmr.msra.gmra.mxu1 %vm3204_vm2, %v4905_v54  ;;  %v5492_v48 = vsel %vm838_vm0, %v4932_v4, 0  ;;  %v4933_v46 = vld [vmem:[%s7654_s20 + $0x34] sm:$0xf] }
 0x54d   : > { %v4257_v43 = vpop.f32.mrf.mxu1  ;;  %7206 = vmatpush3.bf16.msra.mxu1 %v5078_v55  ;;  %7207 = vmatprep.mubr.msk.bf16.mxu1 %vm7480_vm1, %v7479_v8 }
 0x54e   : > { %v4300_v56 = vpop.f32.mrf.mxu0  ;;  %7217 = vmatprep.subr.bf16.mxu1 %v7479_v8 }
 0x54f   : > { %v4906_v47 = vpack.c.bf16 %v4300_v56, %v4300_v56  ;;  %v7102_v14 = vpop.f32.mrf.mxu1 }
 0x550   : > { %v7107_v26 = vpop.f32.mrf.mxu0  ;;  %v5538_v14 = vsel %vm838_vm0, %v4933_v46, 0 }
 0x551   : > { %7202 = vmatmul.mubr.msk.bf16.vlgmr.msra.gmra.mxu0 %vm3204_vm2, %v4906_v47  ;;  %v4346_v62 = vpop.f32.mrf.mxu1  ;;  %v4934_v26 = vld [vmem:[%s7654_s20 + $0x38] sm:$0xf] }
 0x552   : > { %v4303_v52 = vpop.f32.mrf.mxu0  ;;  %v4907_v20 = vpack.c.bf16 %v4346_v62, %v4346_v62  ;;  %7212 = vmatpush3.bf16.msra.mxu0 %v5124_v11  ;;  %7213 = vmatprep.mubr.msk.bf16.mxu0 %vm7480_vm1, %v7479_v8 }
 0x553   : > { %v7113_v33 = vpop.f32.mrf.mxu1  ;;  %7223 = vmatprep.subr.bf16.mxu0 %v7479_v8 }
 0x554   : > { %v7108_v30 = vpop.f32.mrf.mxu0  ;;  %7208 = vmatmul.mubr.msk.bf16.vlgmr.msra.gmra.mxu1 %vm3204_vm2, %v4907_v20  ;;  %v5584_v33 = vsel %vm838_vm0, %v4934_v26, 0 }
 0x555   : > { %v4349_v53 = vpop.f32.mrf.mxu1  ;;  %7218 = vmatpush3.bf16.msra.mxu1 %v5170_v63  ;;  %7219 = vmatprep.mubr.msk.bf16.mxu1 %vm7480_vm1, %v7479_v8  ;;  %v4935_v30 = vld [vmem:[%s7654_s20 + $0x3c] sm:$0xf] }
 0x556   : > { %v4392_v15 = vpop.f32.mrf.mxu0  ;;  %7229 = vmatprep.subr.bf16.mxu1 %v7479_v8 }
 0x557   : > { %v4908_v0 = vpack.c.bf16 %v4392_v15, %v4392_v15  ;;  %v7114_v6 = vpop.f32.mrf.mxu1 }
 0x558   : > { %v7119_v41 = vpop.f32.mrf.mxu0  ;;  %v5630_v6 = vsel %vm838_vm0, %v4935_v30, 0 }
 0x559   : > { %7214 = vmatmul.mubr.msk.bf16.vlgmr.msra.gmra.mxu0 %vm3204_vm2, %v4908_v0  ;;  %v4438_v29 = vpop.f32.mrf.mxu1 }
 0x55a   : > { %v4395_v57 = vpop.f32.mrf.mxu0  ;;  %v4909_v31 = vpack.c.bf16 %v4438_v29, %v4438_v29  ;;  %7224 = vmatpush3.bf16.msra.mxu0 %v5216_v16  ;;  %7225 = vmatprep.mubr.msk.bf16.mxu0 %vm7480_vm1, %v7479_v8 }
 0x55b   : > { %v7125_v17 = vpop.f32.mrf.mxu1  ;;  %7235 = vmatprep.subr.bf16.mxu0 %v7479_v8 }
 0x55c   : > { %v7120_v32 = vpop.f32.mrf.mxu0  ;;  %7220 = vmatmul.mubr.msk.bf16.vlgmr.msra.gmra.mxu1 %vm3204_vm2, %v4909_v31 }
 0x55d   : > { %v4441_v28 = vpop.f32.mrf.mxu1  ;;  %7230 = vmatpush3.bf16.msra.mxu1 %v5262_v7  ;;  %7231 = vmatprep.mubr.msk.bf16.mxu1 %vm7480_vm1, %v7479_v8 }
 0x55e   : > { %v4484_v37 = vpop.f32.mrf.mxu0  ;;  %7241 = vmatprep.subr.bf16.mxu1 %v7479_v8 }
 0x55f   : > { %v4910_v18 = vpack.c.bf16 %v4484_v37, %v4484_v37  ;;  %v7126_v49 = vpop.f32.mrf.mxu1 }
 0x560   : > { %v7131_v3 = vpop.f32.mrf.mxu0 }
 0x561   : > { %7226 = vmatmul.mubr.msk.bf16.vlgmr.msra.gmra.mxu0 %vm3204_vm2, %v4910_v18  ;;  %v4530_v13 = vpop.f32.mrf.mxu1 }
 0x562   : > { %v4487_v42 = vpop.f32.mrf.mxu0  ;;  %v4911_v24 = vpack.c.bf16 %v4530_v13, %v4530_v13  ;;  %7236 = vmatpush3.bf16.msra.mxu0 %v5308_v10  ;;  %7237 = vmatprep.mubr.msk.bf16.mxu0 %vm7480_vm1, %v7479_v8 }
 0x563   : > { %v7137_v21 = vpop.f32.mrf.mxu1  ;;  %7247 = vmatprep.subr.bf16.mxu0 %v7479_v8 }
 0x564   : > { %v7132_v34 = vpop.f32.mrf.mxu0  ;;  %7232 = vmatmul.mubr.msk.bf16.vlgmr.msra.gmra.mxu1 %vm3204_vm2, %v4911_v24 }
 0x565   : > { %v4533_v19 = vpop.f32.mrf.mxu1  ;;  %7242 = vmatpush3.bf16.msra.mxu1 %v5354_v1  ;;  %7243 = vmatprep.mubr.msk.bf16.mxu1 %vm7480_vm1, %v7479_v8 }
 0x566   : > { %v4576_v36 = vpop.f32.mrf.mxu0  ;;  %7253 = vmatprep.subr.bf16.mxu1 %v7479_v8 }
 0x567   : > { %v4912_v22 = vpack.c.bf16 %v4576_v36, %v4576_v36  ;;  %v7138_v35 = vpop.f32.mrf.mxu1 }
 0x568   : > { %v7143_v60 = vpop.f32.mrf.mxu0 }
 0x569   : > { %7238 = vmatmul.mubr.msk.bf16.vlgmr.msra.gmra.mxu0 %vm3204_vm2, %v4912_v22  ;;  %v4622_v61 = vpop.f32.mrf.mxu1 }
 0x56a   : > { %v4579_v23 = vpop.f32.mrf.mxu0  ;;  %v4913_v27 = vpack.c.bf16 %v4622_v61, %v4622_v61  ;;  %7248 = vmatpush3.bf16.msra.mxu0 %v5400_v38  ;;  %7249 = vmatprep.mubr.msk.bf16.mxu0 %vm7480_vm1, %v7479_v8 }
 0x56b   : > { %v7149_v40 = vpop.f32.mrf.mxu1  ;;  %7259 = vmatprep.subr.bf16.mxu0 %v7479_v8 }
 0x56c   : > { %v7144_v50 = vpop.f32.mrf.mxu0  ;;  %7244 = vmatmul.mubr.msk.bf16.vlgmr.msra.gmra.mxu1 %vm3204_vm2, %v4913_v27 }
 0x56d   : > { %v4625_v51 = vpop.f32.mrf.mxu1  ;;  %7254 = vmatpush3.bf16.msra.mxu1 %v5446_v25  ;;  %7255 = vmatprep.mubr.msk.bf16.mxu1 %vm7480_vm1, %v7479_v8 }
 0x56e   : > { %v4668_v5 = vpop.f32.mrf.mxu0  ;;  %7265 = vmatprep.subr.bf16.mxu1 %v7479_v8 }
 0x56f   : > { %v4914_v54 = vpack.c.bf16 %v4668_v5, %v4668_v5  ;;  %v7150_v55 = vpop.f32.mrf.mxu1 }
 0x570   : > { %v7155_v44 = vpop.f32.mrf.mxu0 }
 0x571   : > { %7250 = vmatmul.mubr.msk.bf16.vlgmr.msra.gmra.mxu0 %vm3204_vm2, %v4914_v54  ;;  %v4714_v43 = vpop.f32.mrf.mxu1 }
 0x572   : > { %v4671_v56 = vpop.f32.mrf.mxu0  ;;  %v4915_v47 = vpack.c.bf16 %v4714_v43, %v4714_v43  ;;  %7260 = vmatpush3.bf16.msra.mxu0 %v5492_v48  ;;  %7261 = vmatprep.mubr.msk.bf16.mxu0 %vm7480_vm1, %v7479_v8 }
 0x573   : > { %v7161_v11 = vpop.f32.mrf.mxu1  ;;  %7271 = vmatprep.subr.bf16.mxu0 %v7479_v8 }
 0x574   : > { %v7156_v59 = vpop.f32.mrf.mxu0  ;;  %7256 = vmatmul.mubr.msk.bf16.vlgmr.msra.gmra.mxu1 %vm3204_vm2, %v4915_v47 }
 0x575   : > { %v4717_v62 = vpop.f32.mrf.mxu1  ;;  %7266 = vmatpush3.bf16.msra.mxu1 %v5538_v14  ;;  %7267 = vmatprep.mubr.msk.bf16.mxu1 %vm7480_vm1, %v7479_v8 }
 0x576   : > { %v4760_v52 = vpop.f32.mrf.mxu0  ;;  %7277 = vmatprep.subr.bf16.mxu1 %v7479_v8 }
 0x577   : > { %v4916_v20 = vpack.c.bf16 %v4760_v52, %v4760_v52  ;;  %v7162_v63 = vpop.f32.mrf.mxu1 }
 0x578   : > { %v7167_v12 = vpop.f32.mrf.mxu0 }
 0x579   : > { %7262 = vmatmul.mubr.msk.bf16.vlgmr.msra.gmra.mxu0 %vm3204_vm2, %v4916_v20  ;;  %v4806_v53 = vpop.f32.mrf.mxu1 }
 0x57a   : > { %v4763_v15 = vpop.f32.mrf.mxu0  ;;  %v4917_v0 = vpack.c.bf16 %v4806_v53, %v4806_v53  ;;  %7272 = vmatpush3.bf16.msra.mxu0 %v5584_v33  ;;  %7273 = vmatprep.mubr.msk.bf16.mxu0 %vm7480_vm1, %v7479_v8 }
 0x57b   : > { %v7173_v16 = vpop.f32.mrf.mxu1 }
 0x57c   : > { %v7168_v45 = vpop.f32.mrf.mxu0  ;;  %7268 = vmatmul.mubr.msk.bf16.vlgmr.msra.gmra.mxu1 %vm3204_vm2, %v4917_v0 }
 0x57d   : > { %v4809_v41 = vpop.f32.mrf.mxu1  ;;  %7278 = vmatpush3.bf16.msra.mxu1 %v5630_v6  ;;  %7279 = vmatprep.mubr.msk.bf16.mxu1 %vm7480_vm1, %v7479_v8 }
 0x57e   : > { %v4852_v29 = vpop.f32.mrf.mxu0 }
 0x57f   : > { %v4918_v57 = vpack.c.bf16 %v4852_v29, %v4852_v29  ;;  %v7174_v31 = vpop.f32.mrf.mxu1 }
 0x580   : > { %v7179_v7 = vpop.f32.mrf.mxu0 }
 0x581   : > { %7274 = vmatmul.mubr.msk.bf16.vlgmr.msra.gmra.mxu0 %vm3204_vm2, %v4918_v57  ;;  %v4898_v17 = vpop.f32.mrf.mxu1 }
 0x582   : > { %v4855_v32 = vpop.f32.mrf.mxu0  ;;  %v4919_v58 = vpack.c.bf16 %v4898_v17, %v4898_v17 }
 0x583   : > { %v7185_v28 = vpop.f32.mrf.mxu1 }
 0x584   : > { %v7180_v37 = vpop.f32.mrf.mxu0  ;;  %7280 = vmatmul.mubr.msk.bf16.vlgmr.msra.gmra.mxu1 %vm3204_vm2, %v4919_v58 }
 0x585   : > { %v4901_v18 = vpop.f32.mrf.mxu1 }
 0x587   : > { %v7186_v49 = vpop.f32.mrf.mxu1 }
 0x608   : > { %v4976_v10 = vpop.f32.mrf.mxu0 }
 0x609   : > { %v5672_v43 = vsel %vm838_vm0, %v4976_v10, 0.0 }
 0x60a   : > { %v7191_v9 = vpop.f32.mrf.mxu0 }
 0x60c   : > { %v4979_v3 = vpop.f32.mrf.mxu0  ;;  %v5022_v13 = vpop.f32.mrf.mxu1 }
 0x60d   : > { %v5673_v48 = vsel %vm838_vm0, %v5022_v13, 0.0 }
 0x60e   : > { %v7192_v8 = vpop.f32.mrf.mxu0  ;;  %v7197_v42 = vpop.f32.mrf.mxu1  ;;  %v5674_v14 = vadd.f32 %v5673_v48, %v5672_v43  ;;  %v6449_v48 = vld [vmem:[%s8665_s19] ss:$0 sm:$0xff] }
 0x610   : > { %v5025_v24 = vpop.f32.mrf.mxu1 }
 0x611   : > { %v5068_v1 = vpop.f32.mrf.mxu0 }
 0x612   : > { %v7198_v21 = vpop.f32.mrf.mxu1  ;;  %v5675_v56 = vsel %vm838_vm0, %v5068_v1, 0.0 }
 0x613   : > { %v7203_v34 = vpop.f32.mrf.mxu0  ;;  %v5676_v62 = vadd.f32 %v5675_v56, %v5674_v14 }
 0x614   : > { %v5114_v2 = vpop.f32.mrf.mxu1 }
 0x615   : > { %v5071_v19 = vpop.f32.mrf.mxu0  ;;  %v5677_v59 = vsel %vm838_vm0, %v5114_v2, 0.0 }
 0x616   : > { %v7209_v36 = vpop.f32.mrf.mxu1  ;;  %v5678_v33 = vadd.f32 %v5677_v59, %v5676_v62  ;;  %v7328_v59 = vld [vmem:[%s7672_s8 + $0x74] ss:$8 sps:$4 sm:$0xff]   ;;  %v7329_v62 = vld [vmem:[%s7672_s8 + $0x60] ss:$8 sps:$4 sm:$0xff]  }
 0x617   : > { %v7204_v22 = vpop.f32.mrf.mxu0  ;;  %5850 = vmatprep.subr.bf16.mxu0 %v7328_v59 }
 0x618   : > { %v5117_v35 = vpop.f32.mrf.mxu1 }
 0x619   : > { %v5160_v38 = vpop.f32.mrf.mxu0 }
 0x61a   : > { %v7210_v39 = vpop.f32.mrf.mxu1  ;;  %v5679_v20 = vsel %vm838_vm0, %v5160_v38, 0.0 }
 0x61b   : > { %v7215_v60 = vpop.f32.mrf.mxu0  ;;  %v5680_v15 = vadd.f32 %v5679_v20, %v5678_v33 }
 0x61c   : > { %v5206_v61 = vpop.f32.mrf.mxu1 }
 0x61d   : > { %v5163_v23 = vpop.f32.mrf.mxu0  ;;  %v5681_v12 = vsel %vm838_vm0, %v5206_v61, 0.0 }
 0x61e   : > { %v7221_v27 = vpop.f32.mrf.mxu1  ;;  %v5682_v45 = vadd.f32 %v5681_v12, %v5680_v15  ;;  %v7334_v12 = vld [vmem:[%s7672_s8 + $0x54] ss:$8 sps:$4 sm:$0xff]   ;;  %v7337_v15 = vld [vmem:[%s7672_s8 + $0x44] ss:$8 sps:$4 sm:$0xff]  }
 0x61f   : > { %v7216_v25 = vpop.f32.mrf.mxu0 }
 0x620   : > { %v5209_v40 = vpop.f32.mrf.mxu1 }
 0x621   : > { %v5252_v50 = vpop.f32.mrf.mxu0 }
 0x622   : > { %v7222_v4 = vpop.f32.mrf.mxu1  ;;  %v5683_v6 = vsel %vm838_vm0, %v5252_v50, 0.0 }
 0x623   : > { %v7227_v51 = vpop.f32.mrf.mxu0  ;;  %v5684_v31 = vadd.f32 %v5683_v6, %v5682_v45  ;;  %v7340_v6 = vld [vmem:[%s7672_s8 + $0x34] ss:$8 sps:$4 sm:$0xff]   ;;  %v7343_v45 = vld [vmem:[%s7672_s8 + $0x24] ss:$8 sps:$4 sm:$0xff]  }
 0x624   : > { %v5298_v5 = vpop.f32.mrf.mxu1 }
 0x625   : > { %v5255_v54 = vpop.f32.mrf.mxu0  ;;  %v5685_v29 = vsel %vm838_vm0, %v5298_v5, 0.0 }
 0x626   : > { %v7233_v55 = vpop.f32.mrf.mxu1  ;;  %v5686_v58 = vadd.f32 %v5685_v29, %v5684_v31  ;;  %v7344_v29 = vld [vmem:[%s7672_s8 + $0x10] ss:$8 sps:$4 sm:$0xff]   ;;  %v7349_v31 = vld [vmem:[%s7672_s8 + $0x4] ss:$8 sps:$4 sm:$0xff]  }
 0x627   : > { %v7228_v46 = vpop.f32.mrf.mxu0 }
 0x628   : > { %v5301_v44 = vpop.f32.mrf.mxu1  ;;  %v7438_v46 = vld [vmem:[%s7692_s25] sm:$0xf] }
 0x629   : > { %v5344_v47 = vpop.f32.mrf.mxu0 }
 0x62a   : > { %v7234_v11 = vpop.f32.mrf.mxu1  ;;  %v5687_v17 = vsel %vm838_vm0, %v5344_v47, 0.0 }
 0x62b   : > { %v7239_v26 = vpop.f32.mrf.mxu0  ;;  %v5688_v49 = vadd.f32 %v5687_v17, %v5686_v58  ;;  %v7326_v11 = vld [vmem:[%s7672_s8 + $0x70] ss:$8 sps:$4 sm:$0xff]   ;;  %v7347_v17 = vld [vmem:[%s7672_s8] ss:$8 sps:$4 sm:$0xff]  }
 0x62c   : > { %v5390_v52 = vpop.f32.mrf.mxu1  ;;  %v7331_v26 = vld [vmem:[%s7672_s8 + $0x64] ss:$8 sps:$4 sm:$0xff]   ;;  %5851 = vmatpush1.bf16.msra.mxu0 %v7326_v11 }
 0x62d   : > { %v5347_v63 = vpop.f32.mrf.mxu0  ;;  %v5689_v37 = vsel %vm838_vm0, %v5390_v52, 0.0  ;;  %5852 = vmatprep.subr.bf16.mxu0 %v7331_v26 }
 0x62e   : > { %v7245_v30 = vpop.f32.mrf.mxu1  ;;  %v5690_v13 = vadd.f32 %v5689_v37, %v5688_v49 }
 0x62f   : > { %v7240_v53 = vpop.f32.mrf.mxu0 }
 0x630   : > { %v5393_v0 = vpop.f32.mrf.mxu1  ;;  %5853 = vmatpush1.bf16.msra.mxu0 %v7329_v62  ;;  %v7332_v53 = vld [vmem:[%s7672_s8 + $0x50] ss:$8 sps:$4 sm:$0xff]  }
 0x631   : > { %v5436_v16 = vpop.f32.mrf.mxu0  ;;  %5854 = vmatprep.subr.bf16.mxu0 %v7334_v12  ;;  %v7335_v0 = vld [vmem:[%s7672_s8 + $0x40] ss:$8 sps:$4 sm:$0xff]  }
 0x632   : > { %v7246_v41 = vpop.f32.mrf.mxu1  ;;  %v5691_v9 = vsel %vm838_vm0, %v5436_v16, 0.0  ;;  %v7338_v16 = vld [vmem:[%s7672_s8 + $0x30] ss:$8 sps:$4 sm:$0xff]  }
 0x633   : > { %v7251_v57 = vpop.f32.mrf.mxu0  ;;  %v5692_v1 = vadd.f32 %v5691_v9, %v5690_v13  ;;  %v7341_v41 = vld [vmem:[%s7672_s8 + $0x20] ss:$8 sps:$4 sm:$0xff]  }
 0x634   : > { %v5482_v7 = vpop.f32.mrf.mxu1  ;;  %5855 = vmatpush1.bf16.msra.mxu0 %v7332_v53  ;;  %v7346_v57 = vld [vmem:[%s7672_s8 + $0x14] ss:$8 sps:$4 sm:$0xff]  }
 0x635   : > { %v5439_v32 = vpop.f32.mrf.mxu0  ;;  %v5693_v42 = vsel %vm838_vm0, %v5482_v7, 0.0  ;;  %5856 = vmatprep.subr.bf16.mxu0 %v7337_v15  ;;  %v7481_v7 = vmov 0  }
 0x636   : > { %v7257_v28 = vpop.f32.mrf.mxu1  ;;  %v5694_v19 = vadd.f32 %v5693_v42, %v5692_v1  ;;  %5882 = vmatprep.mubr.bf16.mxu0 %v7481_v7  ;;  %v7351_v42 = vld [vmem:[%s7683_s22 + $0x38] sm:$0xff]   ;;  %v7353_v1 = vld [vmem:[%s7683_s22 + $0x30] sm:$0xff]  }
 0x637   : > { %v7252_v18 = vpop.f32.mrf.mxu0 }
 0x638   : > { %v5485_v10 = vpop.f32.mrf.mxu1  ;;  %5857 = vmatpush1.bf16.msra.mxu0 %v7335_v0  ;;  %v6450_v18 = vld [vmem:[%s8667_s14] ss:$0 sm:$0xff] }
 0x639   : > { %v5528_v3 = vpop.f32.mrf.mxu0  ;;  %5858 = vmatprep.subr.bf16.mxu0 %v7340_v6  ;;  %v6451_v10 = vld [vmem:[%s8669_s1] ss:$0 sm:$0xff] }
 0x63a   : > { %v7258_v8 = vpop.f32.mrf.mxu1  ;;  %v5695_v34 = vsel %vm838_vm0, %v5528_v3, 0.0 }
 0x63b   : > { %v7263_v24 = vpop.f32.mrf.mxu0  ;;  %v5696_v38 = vadd.f32 %v5695_v34, %v5694_v19  ;;  %v7350_v8 = vld [vmem:[%s7683_s22 + $0x78] sm:$0xff]   ;;  %v7355_v34 = vld [vmem:[%s7683_s22 + $0x28] sm:$0xff]   ;;  %v7357_v19 = vld [vmem:[%s7683_s22 + $0x20] sm:$0xff]  }
 0x63c   : > { %v5574_v21 = vpop.f32.mrf.mxu1  ;;  %5859 = vmatpush1.bf16.msra.mxu0 %v7338_v16  ;;  %6685 = vmatprep.subr.bf16.mxu1 %v7350_v8  ;;  %v7352_v24 = vld [vmem:[%s7683_s22 + $0x70] sm:$0xff]  }
 0x63d   : > { %v5531_v2 = vpop.f32.mrf.mxu0  ;;  %v5697_v22 = vsel %vm838_vm0, %v5574_v21, 0.0  ;;  %5860 = vmatprep.subr.bf16.mxu0 %v7343_v45  ;;  %6686 = vmatpush3.bf16.msra.mxu1 %v7351_v42  ;;  %v7354_v21 = vld [vmem:[%s7683_s22 + $0x68] sm:$0xff]  }
 0x63e   : > { %v7269_v36 = vpop.f32.mrf.mxu1  ;;  %v5698_v61 = vadd.f32 %v5697_v22, %v5696_v38  ;;  %6687 = vmatprep.subr.bf16.mxu1 %v7352_v24  ;;  %v7356_v2 = vld [vmem:[%s7683_s22 + $0x60] sm:$0xff]   ;;  %v7359_v22 = vld [vmem:[%s7683_s22 + $0x18] sm:$0xff]   ;;  %v7361_v38 = vld [vmem:[%s7683_s22 + $0x10] sm:$0xff]  }
 0x63f   : > { %v7264_v35 = vpop.f32.mrf.mxu0  ;;  %v7358_v36 = vld [vmem:[%s7683_s22 + $0x58] sm:$0xff]  }
 0x640   : > { %v5577_v39 = vpop.f32.mrf.mxu1  ;;  %5861 = vmatpush1.bf16.msra.mxu0 %v7341_v41  ;;  %v7360_v35 = vld [vmem:[%s7683_s22 + $0x50] sm:$0xff]  }
 0x641   : > { %v5620_v60 = vpop.f32.mrf.mxu0  ;;  %5862 = vmatprep.subr.bf16.mxu0 %v7346_v57  ;;  %6688 = vmatpush3.bf16.msra.mxu1 %v7353_v1  ;;  %v7362_v39 = vld [vmem:[%s7683_s22 + $0x48] sm:$0xff]  }
 0x642   : > { %v5699_v23 = vsel %vm838_vm0, %v5620_v60, 0.0  ;;  %v7270_v27 = vpop.f32.mrf.mxu1  ;;  %6689 = vmatprep.subr.bf16.mxu1 %v7354_v21  ;;  %v7363_v60 = vld [vmem:[%s7683_s22 + $0x8] sm:$0xff]  }
 0x643   : > { %v7275_v25 = vpop.f32.mrf.mxu0  ;;  %v5700_v40 = vadd.f32 %v5699_v23, %v5698_v61  ;;  %v7364_v61 = vld [vmem:[%s7683_s22 + $0x40] sm:$0xff]   ;;  %v5760_v27 = vlaneseq }
 0x644   : > { %v5666_v50 = vpop.f32.mrf.mxu1  ;;  %5863 = vmatpush1.bf16.msra.mxu0 %v7344_v29  ;;  %v7365_v23 = vld [vmem:[%s7683_s22] sm:$0xff]  }
 0x645   : > { %v5623_v4 = vpop.f32.mrf.mxu0  ;;  %v5701_v51 = vsel %vm838_vm0, %v5666_v50, 0.0  ;;  %5864 = vmatprep.subr.bf16.mxu0 %v7349_v31  ;;  %6690 = vmatpush3.bf16.msra.mxu1 %v7355_v34  ;;  %v5761_v25 = vshrl.u32 %v5760_v27, 7  ;;  %v5758_v50 = vld [vmem:[%s7678_s4] sm:$0x3] }
 0x646   : > { %v5702_v5 = vadd.f32 %v5701_v51, %v5700_v40  ;;  %v7281_v54 = vpop.f32.mrf.mxu1  ;;  %6691 = vmatprep.subr.bf16.mxu1 %v7356_v2 }
 0x647   : > { %v7276_v55 = vpop.f32.mrf.mxu0  ;;  %v5762_v40 = vsub.s32 0, %v5761_v25  ;;  %v5766_v4 = vsub.s32 1, %v5761_v25 }
 0x648   : > { %v5703_v44 = vadd.f32 %v7438_v46, %v5702_v5  ;;  %v5669_v43 = vpop.f32.mrf.mxu1  ;;  %5865 = vmatpush1.bf16.msra.mxu0 %v7347_v17  ;;  %v6484_v17 = vld [vmem:[%s823_s23] ss:$0 sm:$0xff] }
 0x649   : > { %6692 = vmatpush3.bf16.msra.mxu1 %v7357_v19  ;;  %v5763_v51 = vrot.slane %v5758_v50, %v5762_v40  ;;  %v5767_v5 = vrot.slane %v5758_v50, %v5766_v4 }
 0x64a   : > { %v7282_v56 = vpop.f32.mrf.mxu1  ;;  %v8527_v47 = vadd.f32 %v6449_v48, %v5703_v44  ;;  %6693 = vmatprep.subr.bf16.mxu1 %v7358_v36 }
 0x64c   : > { %v5714_v14 = vsel %vm838_vm0, %v8527_v47, 0.0 }
 0x64d   : > { %5715 = vadd.xlane.f32.xlu0 %v5714_v14  ;;  %6694 = vmatpush3.bf16.msra.mxu1 %v7359_v22 }
 0x64e   : > { %6695 = vmatprep.subr.bf16.mxu1 %v7360_v35 }
 0x651   : > { %6696 = vmatpush3.bf16.msra.mxu1 %v7361_v38 }
 0x652   : > { %6697 = vmatprep.subr.bf16.mxu1 %v7362_v39 }
 0x655   : > { %6698 = vmatpush3.bf16.msra.mxu1 %v7363_v60 }
 0x656   : > { %6699 = vmatprep.subr.bf16.mxu1 %v7364_v61 }
 0x659   : > { %6700 = vmatpush3.bf16.msra.mxu1 %v7365_v23 }
 0x6d6   : > { %v5716_v52 = vpop.xlane.xlu0 %5715 }
 0x6d7   : > { %v5717_v20 = vmul.f32 0.0078125, %v5716_v52 }
 0x6d9   : > { %v5718_v63 = vsub.f32 %v8527_v47, %v5717_v20 }
 0x6db   : > { %v5719_v33 = vmul.f32 %v5718_v63, %v5718_v63 }
 0x6dd   : > { %v5720_v30 = vsel %vm838_vm0, %v5719_v33, 0.0 }
 0x6de   : > { %5721 = vadd.xlane.f32.xlu1 %v5720_v30 }
 0x767   : > { %v5722_v32 = vpop.xlane.xlu1 %5721 }
 0x768   : > { %v5723_v58 = vmul.f32 0.0078125, %v5722_v32 }
 0x76a   : > { %v5724_v28 = vadd.f32 1e-05, %v5723_v58 }
 0x76c   : > { %7432 = vrsqrt.f32 %v5724_v28 }
 0x779   : > { %v7433_v37 = vpop.eup %7432 }
 0x77a   : > { %v5726_v49 = vmul.f32 %v7433_v37, %v5718_v63 }
 0x77c   : > { %v5733_v9 = vmul.f32 %v6450_v18, %v5726_v49 }
 0x77e   : > { %v5740_v3 = vadd.f32 %v6451_v10, %v5733_v9 }
 0x780   : > { %v5741_v13 = vpack.c.bf16 %v5740_v3, %v5740_v3 }
 0x782   : > { %5883 = vmatmul.mubr.bf16.vlgmr.msra.gmra.mxu0 %v5741_v13 }
 0x842   : > { %v5884_v54 = vpop.f32.mrf.mxu0 }
 0x843   : > { %v5885_v55 = vadd.f32 %v5884_v54, %v5763_v51 }
 0x844   : > { %v5886_v48 = vpop.f32.mrf.mxu0 }
 0x845   : > { %v5893_v46 = vmul.f32 0.044715, %v5885_v55  ;;  %v5887_v44 = vadd.f32 %v5886_v48, %v5767_v5  ;;  %v5891_v15 = vmul.f32 0.5, %v5885_v55 }
 0x846   : > { %v5888_v43 = vpop.f32.mrf.mxu0 }
 0x847   : > { %v5895_v56 = vmul.f32 %v5893_v46, %v5885_v55  ;;  %v5894_v14 = vmul.f32 0.044715, %v5887_v44  ;;  %v5892_v0 = vmul.f32 0.5, %v5887_v44 }
 0x848   : > { %v5889_v11 = vpop.f32.mrf.mxu0 }
 0x849   : > { %v5897_v59 = vmul.f32 %v5895_v56, %v5885_v55  ;;  %v5896_v26 = vmul.f32 %v5894_v14, %v5887_v44 }
 0x84b   : > { %v5899_v62 = vadd.f32 %v5897_v59, %v5885_v55  ;;  %v5898_v52 = vmul.f32 %v5896_v26, %v5887_v44 }
 0x84d   : > { %v5901_v20 = vmul.f32 0.7978846, %v5899_v62  ;;  %v5900_v63 = vadd.f32 %v5898_v52, %v5887_v44 }
 0x84f   : > { %7434 = vtanh.f32 %v5901_v20  ;;  %v5902_v33 = vmul.f32 0.7978846, %v5900_v63 }
 0x851   : > { %7436 = vtanh.f32 %v5902_v33 }
 0x85c   : > { %v7435_v30 = vpop.eup %7434 }
 0x85d   : > { %v5905_v12 = vadd.f32 1.0, %v7435_v30 }
 0x85e   : > { %v7437_v53 = vpop.eup %7436 }
 0x85f   : > { %v5906_v6 = vadd.f32 1.0, %v7437_v53  ;;  %v5907_v16 = vmul.f32 %v5905_v12, %v5891_v15 }
 0x861   : > { %v5908_v45 = vmul.f32 %v5906_v6, %v5892_v0  ;;  %v5909_v29 = vpack.c.bf16 %v5907_v16, %v5907_v16 }
 0x863   : > { %v5910_v41 = vpack.c.bf16 %v5908_v45, %v5908_v45 }
 0x865   : > { %6071 = vmatprep.mubr.bf16.mxu1 %v5910_v41 }
 0x866   : > { %6072 = vmatmul.mubr.bf16.vlgmr.msra.gmra.mxu1 %v5909_v29 }
 0x926   : > { %v6701_v57 = vpop.f32.mrf.mxu1 }
 0x928   : > { %v6702_v31 = vpop.f32.mrf.mxu1 }
 0x929   : > { %v6703_v7 = vadd.f32 %v6702_v31, %v6701_v57 }
 0x92a   : > { %v6704_v32 = vpop.f32.mrf.mxu1 }
 0x92b   : > { %v6079_v58 = vadd.f32 %v6703_v7, %v8527_v47 }
 0x92c   : > { %v6705_v28 = vpop.f32.mrf.mxu1 }
 0x92d   : > { %v6087_v37 = vadd.f32 %v6484_v17, %v6079_v58 }
 0x92f   : > { %6088 = vst [vmem:[%s7692_s25] sm:$0xf] %v6087_v37 }
 0x930 PF: > { %s8671_s22 = sld [smem:[#allocation5_spill]] }
 0x931   : > { %s8672_s24 = sld [smem:[#allocation3_spill]] }
 0x932   : > { %s8673_s25 = sld [smem:[#allocation4_spill]] }
 0x933   : > { %s8674_s26 = sld [smem:[#allocation6_spill]] }
 0x934   : > { %s8675_s27 = sld [smem:[#allocation7_spill]] }
 0x936   : > { %s27_s28 = sadd.s32 1, %s8671_s22  }
 0x937   : > { %p24_p8 = scmp.ge.s32.totalorder %s27_s28, 6  }
 0x939   :  { %26 = sbr.rel (!%p24_p8) target bundleno = 17 (0x11), region = 170 }

</bundles_post_ra>
